<compile_context>
chip_gen: v7x
topology: tpu7x:2x2x1
jax: 0.10.0
libtpu: 0.0.40
codegen_flags: <defaults>
</compile_context>

<pallas_src>
import functools

import jax
import jax.numpy as jnp
from jax.experimental import pallas as pl
from jax.experimental.pallas import tpu as pltpu

# ---------------- small BERT config (stand-in for bert-base 768) -------------
B, S, H, NH, FFN, L = 2, 8, 128, 2, 256, 2
DH = H // NH
VOCAB = 256
MAX_POS = 16
TYPE_VOCAB = 2
ENT_BEGIN, ENT_END = 100, 228          # text_entity_begin_idx / end_idx
N_ENT = ENT_END - ENT_BEGIN
LN_EPS = 1e-12

# Row tile for the row-tiled matmul kernels.  256 keeps the per-kernel working
# set under ~48 MiB at bert-base scale (H=768, FFN chunked), which fits v7x's
# 64 MiB VMEM; v5e/v6e (128 MiB) could go to 512.
TM = 256
# FFN reduction chunk.  128 at this demo scale so the accumulation path is
# exercised; raise to 512-1024 at bert-base (FFN=3072).
FFN_CHUNK = 128
# Column tile for the entity decoder (N-tiled so huge entity vocabs fit VMEM).
TN_DEC = 512


def _vmem_limit_bytes():
    try:
        cap = pltpu.get_tpu_info().vmem_capacity_bytes
        return int(min(cap * 3 // 4, 96 * 1024 * 1024))   # 48 MiB on v7x, 96 MiB on v5e/v6e
    except Exception:
        return 64 * 1024 * 1024


_VMEM_LIMIT = _vmem_limit_bytes()


def _cparams(*sem):
    return pltpu.CompilerParams(dimension_semantics=sem,
                                vmem_limit_bytes=_VMEM_LIMIT)


def _round_up(x, m):
    return ((x + m - 1) // m) * m


def _row_tile(m):
    """Row tile <= TM (multiple of 16 for bf16 sublane packing) + padded M."""
    tm = min(TM, _round_up(m, 16))
    return tm, _round_up(m, tm)


def _col_tile(n):
    tn = min(TN_DEC, _round_up(n, 128))
    return tn, _round_up(n, tn)


def _pad_dim(a, axis, new_size):
    if a.shape[axis] == new_size:
        return a
    pads = [(0, 0)] * a.ndim
    pads[axis] = (0, new_size - a.shape[axis])
    return jnp.pad(a, pads)


def _gelu(y):
    # TODO(synk): HF BERT uses erf-based GELU; tanh approximation used here.
    return 0.5 * y * (1.0 + jnp.tanh(0.7978845608028654 *
                                     (y + 0.044715 * y * y * y)))


def _layernorm(y, g, b, eps):
    mu = jnp.mean(y, axis=-1, keepdims=True)
    var = jnp.mean(jnp.square(y - mu), axis=-1, keepdims=True)
    return (y - mu) * jax.lax.rsqrt(var + eps) * g + b


# ------------------------------ Pallas kernels -------------------------------
def _emb_ln_kernel(we_ref, pe_ref, te_ref, g_ref, b_ref, o_ref, *, eps):
    """word + position + type embedding sum fused with the embedding LayerNorm."""
    x = we_ref[...] + pe_ref[...] + te_ref[...]            # (S, H) f32
    o_ref[...] = _layernorm(x, g_ref[...], b_ref[...], eps).astype(o_ref.dtype)


def _qkv_kernel(x_ref, w_ref, b_ref, o_ref):
    """Per-head fused QKV projection: (tm, H) @ (H, 3*DH) -> (tm, 3*DH)."""
    y = jnp.dot(x_ref[...], w_ref[...], preferred_element_type=jnp.float32)
    o_ref[...] = (y + b_ref[...]).astype(o_ref.dtype)


def _attn_kernel(qkv_ref, m_ref, o_ref, *, head_dim, scale):
    """One (batch, head) per grid step; full-S softmax attention."""
    qkv = qkv_ref[...]                                     # (S, 3*DH) bf16
    q = qkv[:, :head_dim]
    # NOTE: K slice starts at lane offset DH (64 at bert-base) -> one small
    # in-VMEM relayout per step; Q/V slices are aligned.
    k = qkv[:, head_dim:2 * head_dim]
    v = qkv[:, 2 * head_dim:]
    s = jax.lax.dot_general(q, k, (((1,), (1,)), ((), ())),
                            preferred_element_type=jnp.float32) * scale
    s = s + (1.0 - m_ref[...]) * -10000.0                  # (1, S) key mask
    s = s - jnp.max(s, axis=-1, keepdims=True)
    p = jnp.exp(s)
    p = p * pl.reciprocal(jnp.sum(p, axis=-1, keepdims=True), approx=True)
    o_ref[...] = jnp.dot(p.astype(jnp.bfloat16), v,
                         preferred_element_type=jnp.float32).astype(o_ref.dtype)


def _attn_out_kernel(ctx_ref, wo_ref, bo_ref, res_ref, g_ref, beta_ref,
                     o_ref, acc_ref, *, eps):
    """Head-merging output projection + residual + LayerNorm.

    Grid axis 1 runs over heads (reduction): acc += ctx_h @ Wo_h, which is the
    concat-then-matmul of standard BERT written as a sum over heads.
    """
    h = pl.program_id(1)

    @pl.when(h == 0)
    def _():
        acc_ref[...] = jnp.zeros_like(acc_ref)

    acc_ref[...] += jnp.dot(ctx_ref[...], wo_ref[...],
                            preferred_element_type=jnp.float32)

    @pl.when(h == pl.num_programs(1) - 1)
    def _():
        y = acc_ref[...] + bo_ref[...] + res_ref[...].astype(jnp.float32)
        o_ref[...] = _layernorm(y, g_ref[...], beta_ref[...], eps).astype(o_ref.dtype)


def _ffn_kernel(x_ref, w1_ref, b1_ref, w2_ref, b2_ref, g_ref, beta_ref,
                o_ref, acc_ref, *, eps):
    """Fused FFN: per FFN chunk compute gelu(x@W1[:,c]+b1[c]) and accumulate
    chunk@W2[c,:]; residual + LayerNorm at the last chunk.  The (tm, FFN)
    intermediate never leaves VMEM."""
    k = pl.program_id(1)

    @pl.when(k == 0)
    def _():
        acc_ref[...] = jnp.zeros_like(acc_ref)

    hmid = jnp.dot(x_ref[...], w1_ref[...],
                   preferred_element_type=jnp.float32) + b1_ref[...]
    hmid = _gelu(hmid)
    acc_ref[...] += jnp.dot(hmid.astype(jnp.bfloat16), w2_ref[...],
                            preferred_element_type=jnp.float32)

    @pl.when(k == pl.num_programs(1) - 1)
    def _():
        y = acc_ref[...] + b2_ref[...] + x_ref[...].astype(jnp.float32)
        o_ref[...] = _layernorm(y, g_ref[...], beta_ref[...], eps).astype(o_ref.dtype)


def _transform_kernel(x_ref, w_ref, b_ref, g_ref, beta_ref, o_ref, *, eps):
    """MLM head transform: Linear + GELU + LayerNorm."""
    y = jnp.dot(x_ref[...], w_ref[...],
                preferred_element_type=jnp.float32) + b_ref[...]
    y = _gelu(y)
    o_ref[...] = _layernorm(y, g_ref[...], beta_ref[...], eps).astype(o_ref.dtype)


def _decoder_kernel(h_ref, w_ref, b_ref, o_ref):
    """Tied decoder over the entity slice: logits = h @ E_slice^T + b.
    Weight is passed untransposed (tn, H); contraction on H in-kernel."""
    y = jax.lax.dot_general(h_ref[...], w_ref[...], (((1,), (1,)), ((), ())),
                            preferred_element_type=jnp.float32)
    o_ref[...] = y + b_ref[...]


def _ce_rank_kernel(logits_ref, labels_ref, loss_ref, rank_ref):
    """Vectorized cross-entropy (label_smoothing=0) + rank of the gold label."""
    logits = logits_ref[...]                               # (Bn, E) f32
    lbl = labels_ref[...]                                  # (Bn, 1) int32
    col = jax.lax.broadcasted_iota(jnp.int32, logits.shape, 1)
    onehot = (col == lbl).astype(jnp.float32)
    label_logit = jnp.sum(logits * onehot, axis=-1, keepdims=True)
    m = jnp.max(logits, axis=-1, keepdims=True)
    lse = m + jnp.log(jnp.sum(jnp.exp(logits - m), axis=-1, keepdims=True))
    loss_ref[...] = lse - label_logit
    # rank = 1 + #{logits strictly greater}; ties resolve in favour of the label.
    rank_ref[...] = jnp.sum((logits > label_logit).astype(jnp.int32),
                            axis=-1, keepdims=True) + 1


# ------------------------------ kernel wrappers -------------------------------
def emb_layernorm(we, pe, te, gamma, beta):
    Bv, Sv, Hv = we.shape
    return pl.pallas_call(
        functools.partial(_emb_ln_kernel, eps=LN_EPS),
        out_shape=jax.ShapeDtypeStruct((Bv, Sv, Hv), jnp.bfloat16),
        grid=(Bv,),
        in_specs=[pl.BlockSpec((None, Sv, Hv), lambda b: (b, 0, 0)),
                  pl.BlockSpec((Sv, Hv), lambda b: (0, 0)),
                  pl.BlockSpec((None, Sv, Hv), lambda b: (b, 0, 0)),
                  pl.BlockSpec((1, Hv), lambda b: (0, 0)),
                  pl.BlockSpec((1, Hv), lambda b: (0, 0))],
        out_specs=pl.BlockSpec((None, Sv, Hv), lambda b: (b, 0, 0)),
        compiler_params=_cparams("parallel"),
    )(we, pe, te, gamma, beta)


def qkv_proj(x, w, b):
    # x: (M, H) bf16; w: (NH, H, 3*DH) bf16; b: (NH, 1, 3*DH) f32
    M = x.shape[0]
    tm, Mp = _row_tile(M)
    xp = _pad_dim(x, 0, Mp)
    out = pl.pallas_call(
        _qkv_kernel,
        out_shape=jax.ShapeDtypeStruct((NH, Mp, 3 * DH), jnp.bfloat16),
        grid=(Mp // tm, NH),
        in_specs=[pl.BlockSpec((tm, H), lambda i, h: (i, 0)),
                  pl.BlockSpec((None, H, 3 * DH), lambda i, h: (h, 0, 0)),
                  pl.BlockSpec((None, 1, 3 * DH), lambda i, h: (h, 0, 0))],
        out_specs=pl.BlockSpec((None, tm, 3 * DH), lambda i, h: (h, i, 0)),
        compiler_params=_cparams("parallel", "parallel"),
    )(xp, w, b)
    return out if Mp == M else out[:, :M]


def attention(qkv, mask):
    # qkv: (NH, B, S, 3*DH) bf16 (head-major); mask: (B, 1, S) f32 (1 keep, 0 pad)
    _, Bv, Sv, _ = qkv.shape
    return pl.pallas_call(
        functools.partial(_attn_kernel, head_dim=DH, scale=1.0 / (DH ** 0.5)),
        out_shape=jax.ShapeDtypeStruct((NH, Bv, Sv, DH), jnp.bfloat16),
        grid=(Bv, NH),
        in_specs=[pl.BlockSpec((None, None, Sv, 3 * DH), lambda b, h: (h, b, 0, 0)),
                  pl.BlockSpec((None, 1, Sv), lambda b, h: (b, 0, 0))],
        out_specs=pl.BlockSpec((None, None, Sv, DH), lambda b, h: (h, b, 0, 0)),
        compiler_params=_cparams("parallel", "parallel"),
    )(qkv, mask)


def attn_out_ln(ctx, wo, bo, residual, gamma, beta):
    # ctx: (NH, M, DH) bf16; wo: (NH, DH, H) bf16; residual: (M, H) bf16
    M = residual.shape[0]
    tm, Mp = _row_tile(M)
    ctxp = _pad_dim(ctx, 1, Mp)
    resp = _pad_dim(residual, 0, Mp)
    out = pl.pallas_call(
        functools.partial(_attn_out_kernel, eps=LN_EPS),
        out_shape=jax.ShapeDtypeStruct((Mp, H), jnp.bfloat16),
        grid=(Mp // tm, NH),
        in_specs=[pl.BlockSpec((None, tm, DH), lambda i, h: (h, i, 0)),
                  pl.BlockSpec((None, DH, H), lambda i, h: (h, 0, 0)),
                  pl.BlockSpec((1, H), lambda i, h: (0, 0)),
                  pl.BlockSpec((tm, H), lambda i, h: (i, 0)),
                  pl.BlockSpec((1, H), lambda i, h: (0, 0)),
                  pl.BlockSpec((1, H), lambda i, h: (0, 0))],
        out_specs=pl.BlockSpec((tm, H), lambda i, h: (i, 0)),
        scratch_shapes=[pltpu.VMEM((tm, H), jnp.float32)],
        compiler_params=_cparams("parallel", "arbitrary"),
    )(ctxp, wo, bo, resp, gamma, beta)
    return out if Mp == M else out[:M]


def ffn_ln(x, w1, b1, w2, b2, gamma, beta):
    # x: (M, H) bf16 (also the residual); w1: (H, FFN) bf16; w2: (FFN, H) bf16
    M = x.shape[0]
    tm, Mp = _row_tile(M)
    xp = _pad_dim(x, 0, Mp)
    tc = min(FFN_CHUNK, FFN)
    assert FFN % tc == 0
    out = pl.pallas_call(
        functools.partial(_ffn_kernel, eps=LN_EPS),
        out_shape=jax.ShapeDtypeStruct((Mp, H), jnp.bfloat16),
        grid=(Mp // tm, FFN // tc),
        in_specs=[pl.BlockSpec((tm, H), lambda i, k: (i, 0)),
                  pl.BlockSpec((H, tc), lambda i, k: (0, k)),
                  pl.BlockSpec((1, tc), lambda i, k: (0, k)),
                  pl.BlockSpec((tc, H), lambda i, k: (k, 0)),
                  pl.BlockSpec((1, H), lambda i, k: (0, 0)),
                  pl.BlockSpec((1, H), lambda i, k: (0, 0)),
                  pl.BlockSpec((1, H), lambda i, k: (0, 0))],
        out_specs=pl.BlockSpec((tm, H), lambda i, k: (i, 0)),
        scratch_shapes=[pltpu.VMEM((tm, H), jnp.float32)],
        compiler_params=_cparams("parallel", "arbitrary"),
    )(xp, w1, b1, w2, b2, gamma, beta)
    return out if Mp == M else out[:M]


def mlm_transform(x, w, b, gamma, beta):
    M, K = x.shape
    N = w.shape[1]
    tm, Mp = _row_tile(M)
    xp = _pad_dim(x, 0, Mp)
    out = pl.pallas_call(
        functools.partial(_transform_kernel, eps=LN_EPS),
        out_shape=jax.ShapeDtypeStruct((Mp, N), jnp.bfloat16),
        grid=(Mp // tm,),
        in_specs=[pl.BlockSpec((tm, K), lambda i: (i, 0)),
                  pl.BlockSpec((K, N), lambda i: (0, 0)),
                  pl.BlockSpec((1, N), lambda i: (0, 0)),
                  pl.BlockSpec((1, N), lambda i: (0, 0)),
                  pl.BlockSpec((1, N), lambda i: (0, 0))],
        out_specs=pl.BlockSpec((tm, N), lambda i: (i, 0)),
        compiler_params=_cparams("parallel"),
    )(xp, w, b, gamma, beta)
    return out if Mp == M else out[:M]


def entity_decoder(h, w_ent, b_ent):
    # h: (M, H) bf16; w_ent: (N_ent, H) bf16 untransposed; b_ent: (N_ent,) f32
    M = h.shape[0]
    Ne = w_ent.shape[0]
    tm, Mp = _row_tile(M)
    tn, Np = _col_tile(Ne)
    hp = _pad_dim(h, 0, Mp)
    wp = _pad_dim(w_ent, 0, Np)
    bp = _pad_dim(b_ent, 0, Np).reshape(1, Np)
    out = pl.pallas_call(
        _decoder_kernel,
        out_shape=jax.ShapeDtypeStruct((Mp, Np), jnp.float32),
        grid=(Mp // tm, Np // tn),
        in_specs=[pl.BlockSpec((tm, H), lambda i, j: (i, 0)),
                  pl.BlockSpec((tn, H), lambda i, j: (j, 0)),
                  pl.BlockSpec((1, tn), lambda i, j: (0, j))],
        out_specs=pl.BlockSpec((tm, tn), lambda i, j: (i, j)),
        compiler_params=_cparams("parallel", "parallel"),
    )(hp, wp, bp)
    if Mp != M or Np != Ne:
        out = out[:M, :Ne]
    return out


def ce_and_rank(logits, labels):
    Bn, E = logits.shape
    return pl.pallas_call(
        _ce_rank_kernel,
        out_shape=(jax.ShapeDtypeStruct((Bn, 1), jnp.float32),
                   jax.ShapeDtypeStruct((Bn, 1), jnp.int32)),
        grid=(1,),
        in_specs=[pl.BlockSpec((Bn, E), lambda i: (0, 0)),
                  pl.BlockSpec((Bn, 1), lambda i: (0, 0))],
        out_specs=(pl.BlockSpec((Bn, 1), lambda i: (0, 0)),
                   pl.BlockSpec((Bn, 1), lambda i: (0, 0))),
        compiler_params=_cparams("arbitrary"),
    )(logits, labels.reshape(Bn, 1).astype(jnp.int32))


# ------------------------------ model (glue) ---------------------------------
def init_params(key):
    keys = iter(jax.random.split(key, 32))

    def nrm(shape, dtype=jnp.bfloat16):
        return (0.02 * jax.random.normal(next(keys), shape, jnp.float32)).astype(dtype)

    params = {
        "word_emb": nrm((VOCAB, H), jnp.float32),   # tied embedding table (f32)
        "pos_emb": nrm((MAX_POS, H), jnp.float32),
        "type_emb": nrm((TYPE_VOCAB, H), jnp.float32),
        "emb_ln_g": jnp.ones((1, H), jnp.float32),
        "emb_ln_b": jnp.zeros((1, H), jnp.float32),
        "layers": [],
        # MLM head transform + tied-decoder bias
        "tr_w": nrm((H, H)), "tr_b": jnp.zeros((1, H), jnp.float32),
        "tr_ln_g": jnp.ones((1, H), jnp.float32),
        "tr_ln_b": jnp.zeros((1, H), jnp.float32),
        "dec_b": jnp.zeros((VOCAB,), jnp.float32),
    }
    for _ in range(L):
        params["layers"].append({
            # head-major fused QKV weight: per head h the slab [Wq_h | Wk_h | Wv_h]
            "w_qkv": nrm((NH, H, 3 * DH)),
            "b_qkv": jnp.zeros((NH, 1, 3 * DH), jnp.float32),
            # head-major output projection: rows of Wo split per head
            "wo": nrm((NH, DH, H)), "bo": jnp.zeros((1, H), jnp.float32),
            "ln1_g": jnp.ones((1, H), jnp.float32),
            "ln1_b": jnp.zeros((1, H), jnp.float32),
            "w1": nrm((H, FFN)), "b1": jnp.zeros((1, FFN), jnp.float32),
            "w2": nrm((FFN, H)), "b2": jnp.zeros((1, H), jnp.float32),
            "ln2_g": jnp.ones((1, H), jnp.float32),
            "ln2_b": jnp.zeros((1, H), jnp.float32),
        })
    return params


def bert_layer(x, lp, mask, Bv, Sv):
    # 4 pallas_calls per layer:
    #   qkv-proj | attention | head-merge out-proj+add+LN | fused FFN+add+LN
    qkv = qkv_proj(x, lp["w_qkv"], lp["b_qkv"])                 # (NH, B*S, 3DH)
    ctx = attention(qkv.reshape(NH, Bv, Sv, 3 * DH), mask)      # (NH, B, S, DH)
    x = attn_out_ln(ctx.reshape(NH, Bv * Sv, DH), lp["wo"], lp["bo"], x,
                    lp["ln1_g"], lp["ln1_b"])                   # (B*S, H) bf16
    x = ffn_ln(x, lp["w1"], lp["b1"], lp["w2"], lp["b2"],
               lp["ln2_g"], lp["ln2_b"])                        # (B*S, H) bf16
    return x


def nbert_pretrain_forward(params, input_ids, token_type_ids, attention_mask,
                           mask_pos, labels):
    Bv, Sv = input_ids.shape
    # --- embeddings: table gathers in XLA glue; sum + LayerNorm fused in Pallas
    we = jnp.take(params["word_emb"], input_ids, axis=0)        # (B, S, H) f32
    te = jnp.take(params["type_emb"], token_type_ids, axis=0)   # (B, S, H) f32
    pe = params["pos_emb"][:Sv]                                  # (S, H) f32
    x = emb_layernorm(we, pe, te, params["emb_ln_g"], params["emb_ln_b"])
    x = x.reshape(Bv * Sv, H)                                    # bf16 residual stream

    # key-padding mask, one row per batch element (never duplicated per head)
    mask = attention_mask.astype(jnp.float32).reshape(Bv, 1, Sv)

    for lp in params["layers"]:
        x = bert_layer(x, lp, mask, Bv, Sv)

    # --- MLM head only at the [MASK] positions, entity vocab slice only ---
    flat_idx = mask_pos[:, 0] * Sv + mask_pos[:, 1]              # (n_mask,)
    h = jnp.take(x, flat_idx, axis=0)                            # (n_mask, H) glue gather
    h = mlm_transform(h, params["tr_w"], params["tr_b"],
                      params["tr_ln_g"], params["tr_ln_b"])      # Linear+GELU+LN
    w_ent = params["word_emb"][ENT_BEGIN:ENT_END].astype(jnp.bfloat16)  # (N_ENT, H), NO transpose
    b_ent = params["dec_b"][ENT_BEGIN:ENT_END]
    ent_logits = entity_decoder(h, w_ent, b_ent)                 # (n_mask, N_ENT) f32

    loss_each, rank = ce_and_rank(ent_logits, labels)
    loss = jnp.mean(loss_each)          # CrossEntropyLoss(label_smoothing=0, mean)
    # pretrain branch of forward() returns (loss, loss_info=None, None, rank)
    return loss, None, None, rank.reshape(-1)


# ---------------------------------- main --------------------------------------
if __name__ == "__main__":
    key = jax.random.PRNGKey(0)
    kp, k1, k2 = jax.random.split(key, 3)
    params = init_params(kp)

    input_ids = jax.random.randint(k1, (B, S), 0, VOCAB, dtype=jnp.int32)
    token_type_ids = jnp.zeros((B, S), jnp.int32)
    attention_mask = jnp.ones((B, S), jnp.int32).at[1, S - 1].set(0)  # one pad token
    mask_pos = jnp.array([[0, 3], [1, 5]], jnp.int32)                 # (batch_idx, seq_idx)
    labels = jax.random.randint(k2, (B,), 0, N_ENT, dtype=jnp.int32)

    forward = jax.jit(nbert_pretrain_forward)
    loss, loss_info, logits, rank = forward(params, input_ids, token_type_ids,
                                            attention_mask, mask_pos, labels)
    jax.block_until_ready((loss, rank))
    print("KERNEL_OK")
</pallas_src>

<mosaic_0001>
module attributes {stable_mosaic.version = 11 : i64} {
  func.func @_emb_ln_kernel(%arg0: i32, %arg1: memref<1x8x128xf32, #tpu.memory_space<vmem>>, %arg2: memref<8x128xf32, #tpu.memory_space<vmem>>, %arg3: memref<1x8x128xf32, #tpu.memory_space<vmem>>, %arg4: memref<1x128xf32, #tpu.memory_space<vmem>>, %arg5: memref<1x128xf32, #tpu.memory_space<vmem>>, %arg6: memref<1x8x128xbf16, #tpu.memory_space<vmem>>) attributes {dimension_semantics = [#tpu.dimension_semantics<parallel>], iteration_bounds = array<i64: 2>, scalar_prefetch = 0 : i64, scratch_operands = 0 : i64, tpu.core_type = #tpu.core_type<tc>, window_params = [{transform_indices = @transform_0, window_bounds = array<i64: 1, 8, 128>}, {pipeline_mode = #tpu.pipeline_mode<synchronous>, transform_indices = @transform_1, window_bounds = array<i64: 8, 128>}, {transform_indices = @transform_2, window_bounds = array<i64: 1, 8, 128>}, {pipeline_mode = #tpu.pipeline_mode<synchronous>, transform_indices = @transform_3, window_bounds = array<i64: 1, 128>}, {pipeline_mode = #tpu.pipeline_mode<synchronous>, transform_indices = @transform_4, window_bounds = array<i64: 1, 128>}, {transform_indices = @transform_5, window_bounds = array<i64: 1, 8, 128>}]} {
    %c0 = arith.constant 0 : index
    %c0_0 = arith.constant 0 : index
    %c0_1 = arith.constant 0 : index
    %0 = vector.load %arg1[%c0, %c0_0, %c0_1] : memref<1x8x128xf32, #tpu.memory_space<vmem>>, vector<1x8x128xf32>
    %1 = vector.shape_cast %0 : vector<1x8x128xf32> to vector<8x128xf32>
    %c0_2 = arith.constant 0 : index
    %c0_3 = arith.constant 0 : index
    %2 = vector.load %arg2[%c0_2, %c0_3] : memref<8x128xf32, #tpu.memory_space<vmem>>, vector<8x128xf32>
    %3 = arith.addf %1, %2 : vector<8x128xf32>
    %c0_4 = arith.constant 0 : index
    %c0_5 = arith.constant 0 : index
    %c0_6 = arith.constant 0 : index
    %4 = vector.load %arg3[%c0_4, %c0_5, %c0_6] : memref<1x8x128xf32, #tpu.memory_space<vmem>>, vector<1x8x128xf32>
    %5 = vector.shape_cast %4 : vector<1x8x128xf32> to vector<8x128xf32>
    %6 = arith.addf %3, %5 : vector<8x128xf32>
    %c0_7 = arith.constant 0 : index
    %c0_8 = arith.constant 0 : index
    %7 = vector.load %arg4[%c0_7, %c0_8] : memref<1x128xf32, #tpu.memory_space<vmem>>, vector<1x128xf32>
    %c0_9 = arith.constant 0 : index
    %c0_10 = arith.constant 0 : index
    %8 = vector.load %arg5[%c0_9, %c0_10] : memref<1x128xf32, #tpu.memory_space<vmem>>, vector<1x128xf32>
    %cst = arith.constant dense<0.000000e+00> : vector<8xf32>
    %9 = vector.multi_reduction <add>, %6, %cst [1] : vector<8x128xf32> to vector<8xf32>
    %10 = vector.shape_cast %9 : vector<8xf32> to vector<8x1xf32>
    %cst_11 = arith.constant 1.280000e+02 : f32
    %11 = vector.broadcast %cst_11 : f32 to vector<8x1xf32>
    %12 = arith.divf %10, %11 : vector<8x1xf32>
    %13 = vector.broadcast %12 : vector<8x1xf32> to vector<8x128xf32>
    %14 = arith.subf %6, %13 : vector<8x128xf32>
    %15 = arith.mulf %14, %14 : vector<8x128xf32>
    %cst_12 = arith.constant dense<0.000000e+00> : vector<8xf32>
    %16 = vector.multi_reduction <add>, %15, %cst_12 [1] : vector<8x128xf32> to vector<8xf32>
    %17 = vector.shape_cast %16 : vector<8xf32> to vector<8x1xf32>
    %cst_13 = arith.constant 1.280000e+02 : f32
    %18 = vector.broadcast %cst_13 : f32 to vector<8x1xf32>
    %19 = arith.divf %17, %18 : vector<8x1xf32>
    %20 = vector.broadcast %12 : vector<8x1xf32> to vector<8x128xf32>
    %21 = arith.subf %6, %20 : vector<8x128xf32>
    %cst_14 = arith.constant 9.99999996E-13 : f32
    %22 = vector.broadcast %cst_14 : f32 to vector<8x1xf32>
    %23 = arith.addf %19, %22 : vector<8x1xf32>
    %24 = math.rsqrt %23 : vector<8x1xf32>
    %25 = vector.broadcast %24 : vector<8x1xf32> to vector<8x128xf32>
    %26 = arith.mulf %21, %25 : vector<8x128xf32>
    %27 = vector.broadcast %7 : vector<1x128xf32> to vector<8x128xf32>
    %28 = arith.mulf %26, %27 : vector<8x128xf32>
    %29 = vector.broadcast %8 : vector<1x128xf32> to vector<8x128xf32>
    %30 = arith.addf %28, %29 : vector<8x128xf32>
    %31 = arith.truncf %30 : vector<8x128xf32> to vector<8x128xbf16>
    %c0_15 = arith.constant 0 : index
    %c0_16 = arith.constant 0 : index
    %c0_17 = arith.constant 0 : index
    %32 = vector.load %arg6[%c0_15, %c0_16, %c0_17] : memref<1x8x128xbf16, #tpu.memory_space<vmem>>, vector<1x8x128xbf16>
    %33 = vector.shape_cast %32 : vector<1x8x128xbf16> to vector<8x128xbf16>
    %34 = vector.shape_cast %31 : vector<8x128xbf16> to vector<1x8x128xbf16>
    tpu.vector_store %arg6[%c0_15, %c0_16, %c0_17], %34 {strides = array<i32>} : memref<1x8x128xbf16, #tpu.memory_space<vmem>>, vector<1x8x128xbf16>,
    return
  }
  func.func @transform_0(%arg0: i32) -> (i32, i32, i32) {
    %c0_i32 = arith.constant 0 : i32
    %c0_i32_0 = arith.constant 0 : i32
    %c0_i32_1 = arith.constant 0 : i32
    return %arg0, %c0_i32, %c0_i32_0 : i32, i32, i32
  }
  func.func @transform_1(%arg0: i32) -> (i32, i32) {
    %c0_i32 = arith.constant 0 : i32
    %c0_i32_0 = arith.constant 0 : i32
    %c0_i32_1 = arith.constant 0 : i32
    return %c0_i32, %c0_i32_0 : i32, i32
  }
  func.func @transform_2(%arg0: i32) -> (i32, i32, i32) {
    %c0_i32 = arith.constant 0 : i32
    %c0_i32_0 = arith.constant 0 : i32
    %c0_i32_1 = arith.constant 0 : i32
    return %arg0, %c0_i32, %c0_i32_0 : i32, i32, i32
  }
  func.func @transform_3(%arg0: i32) -> (i32, i32) {
    %c0_i32 = arith.constant 0 : i32
    %c0_i32_0 = arith.constant 0 : i32
    %c0_i32_1 = arith.constant 0 : i32
    return %c0_i32, %c0_i32_0 : i32, i32
  }
  func.func @transform_4(%arg0: i32) -> (i32, i32) {
    %c0_i32 = arith.constant 0 : i32
    %c0_i32_0 = arith.constant 0 : i32
    %c0_i32_1 = arith.constant 0 : i32
    return %c0_i32, %c0_i32_0 : i32, i32
  }
  func.func @transform_5(%arg0: i32) -> (i32, i32, i32) {
    %c0_i32 = arith.constant 0 : i32
    %c0_i32_0 = arith.constant 0 : i32
    %c0_i32_1 = arith.constant 0 : i32
    return %arg0, %c0_i32, %c0_i32_0 : i32, i32, i32
  }
}

module attributes {stable_mosaic.version = 11 : i64} {
  func.func @_qkv_kernel(%arg0: i32, %arg1: i32, %arg2: memref<16x128xbf16, #tpu.memory_space<vmem>>, %arg3: memref<1x128x192xbf16, #tpu.memory_space<vmem>>, %arg4: memref<1x1x192xf32, #tpu.memory_space<vmem>>, %arg5: memref<1x16x192xbf16, #tpu.memory_space<vmem>>) attributes {dimension_semantics = [#tpu.dimension_semantics<parallel>, #tpu.dimension_semantics<parallel>], iteration_bounds = array<i64: 1, 2>, scalar_prefetch = 0 : i64, scratch_operands = 0 : i64, tpu.core_type = #tpu.core_type<tc>, window_params = [{transform_indices = @transform_0, window_bounds = array<i64: 16, 128>}, {transform_indices = @transform_1, window_bounds = array<i64: 1, 128, 192>}, {transform_indices = @transform_2, window_bounds = array<i64: 1, 1, 192>}, {transform_indices = @transform_3, window_bounds = array<i64: 1, 16, 192>}]} {
    %c0 = arith.constant 0 : index
    %c0_0 = arith.constant 0 : index
    %0 = vector.load %arg2[%c0, %c0_0] : memref<16x128xbf16, #tpu.memory_space<vmem>>, vector<16x128xbf16>
    %c0_1 = arith.constant 0 : index
    %c0_2 = arith.constant 0 : index
    %c0_3 = arith.constant 0 : index
    %1 = vector.load %arg3[%c0_1, %c0_2, %c0_3] : memref<1x128x192xbf16, #tpu.memory_space<vmem>>, vector<1x128x192xbf16>
    %2 = vector.shape_cast %1 : vector<1x128x192xbf16> to vector<128x192xbf16>
    %cst = arith.constant dense<0.000000e+00> : vector<16x192xf32>
    %3 = tpu.matmul %0, %2, %cst {dimension_numbers = #tpu.dot_dimension_numbers<[1], [0], [0], [1], [0, 0, 1, 1], [], []>} : vector<16x128xbf16>, vector<128x192xbf16>, vector<16x192xf32> -> vector<16x192xf32>
    %c0_4 = arith.constant 0 : index
    %c0_5 = arith.constant 0 : index
    %c0_6 = arith.constant 0 : index
    %4 = vector.load %arg4[%c0_4, %c0_5, %c0_6] : memref<1x1x192xf32, #tpu.memory_space<vmem>>, vector<1x1x192xf32>
    %5 = vector.shape_cast %4 : vector<1x1x192xf32> to vector<1x192xf32>
    %6 = vector.broadcast %5 : vector<1x192xf32> to vector<16x192xf32>
    %7 = arith.addf %3, %6 : vector<16x192xf32>
    %8 = arith.truncf %7 : vector<16x192xf32> to vector<16x192xbf16>
    %c0_7 = arith.constant 0 : index
    %c0_8 = arith.constant 0 : index
    %c0_9 = arith.constant 0 : index
    %9 = vector.load %arg5[%c0_7, %c0_8, %c0_9] : memref<1x16x192xbf16, #tpu.memory_space<vmem>>, vector<1x16x192xbf16>
    %10 = vector.shape_cast %9 : vector<1x16x192xbf16> to vector<16x192xbf16>
    %11 = vector.shape_cast %8 : vector<16x192xbf16> to vector<1x16x192xbf16>
    tpu.vector_store %arg5[%c0_7, %c0_8, %c0_9], %11 {strides = array<i32>} : memref<1x16x192xbf16, #tpu.memory_space<vmem>>, vector<1x16x192xbf16>,
    return
  }
  func.func @transform_0(%arg0: i32, %arg1: i32) -> (i32, i32) {
    %c0_i32 = arith.constant 0 : i32
    %c0_i32_0 = arith.constant 0 : i32
    return %arg0, %c0_i32 : i32, i32
  }
  func.func @transform_1(%arg0: i32, %arg1: i32) -> (i32, i32, i32) {
    %c0_i32 = arith.constant 0 : i32
    %c0_i32_0 = arith.constant 0 : i32
    %c0_i32_1 = arith.constant 0 : i32
    return %arg1, %c0_i32, %c0_i32_0 : i32, i32, i32
  }
  func.func @transform_2(%arg0: i32, %arg1: i32) -> (i32, i32, i32) {
    %c0_i32 = arith.constant 0 : i32
    %c0_i32_0 = arith.constant 0 : i32
    %c0_i32_1 = arith.constant 0 : i32
    return %arg1, %c0_i32, %c0_i32_0 : i32, i32, i32
  }
  func.func @transform_3(%arg0: i32, %arg1: i32) -> (i32, i32, i32) {
    %c0_i32 = arith.constant 0 : i32
    %c0_i32_0 = arith.constant 0 : i32
    return %arg1, %arg0, %c0_i32 : i32, i32, i32
  }
}

module attributes {stable_mosaic.version = 11 : i64} {
  func.func @_attn_kernel(%arg0: i32, %arg1: i32, %arg2: memref<1x1x8x192xbf16, #tpu.memory_space<vmem>>, %arg3: memref<1x1x8xf32, #tpu.memory_space<vmem>>, %arg4: memref<1x1x8x64xbf16, #tpu.memory_space<vmem>>) attributes {dimension_semantics = [#tpu.dimension_semantics<parallel>, #tpu.dimension_semantics<parallel>], iteration_bounds = array<i64: 2, 2>, scalar_prefetch = 0 : i64, scratch_operands = 0 : i64, tpu.core_type = #tpu.core_type<tc>, window_params = [{transform_indices = @transform_0, window_bounds = array<i64: 1, 1, 8, 192>}, {transform_indices = @transform_1, window_bounds = array<i64: 1, 1, 8>}, {transform_indices = @transform_2, window_bounds = array<i64: 1, 1, 8, 64>}]} {
    %c0 = arith.constant 0 : index
    %c0_0 = arith.constant 0 : index
    %c0_1 = arith.constant 0 : index
    %c0_2 = arith.constant 0 : index
    %0 = vector.load %arg2[%c0, %c0_0, %c0_1, %c0_2] : memref<1x1x8x192xbf16, #tpu.memory_space<vmem>>, vector<1x1x8x192xbf16>
    %1 = vector.shape_cast %0 : vector<1x1x8x192xbf16> to vector<8x192xbf16>
    %2 = vector.extract_strided_slice %1 {offsets = [0, 0], sizes = [8, 64], strides = [1, 1]} : vector<8x192xbf16> to vector<8x64xbf16>
    %3 = vector.extract_strided_slice %1 {offsets = [0, 64], sizes = [8, 64], strides = [1, 1]} : vector<8x192xbf16> to vector<8x64xbf16>
    %4 = vector.extract_strided_slice %1 {offsets = [0, 128], sizes = [8, 64], strides = [1, 1]} : vector<8x192xbf16> to vector<8x64xbf16>
    %cst = arith.constant dense<0.000000e+00> : vector<8x8xf32>
    %5 = tpu.matmul %2, %3, %cst {dimension_numbers = #tpu.dot_dimension_numbers<[1], [1], [0], [0], [0, 0, 1, 0], [], []>} : vector<8x64xbf16>, vector<8x64xbf16>, vector<8x8xf32> -> vector<8x8xf32>
    %cst_3 = arith.constant 1.250000e-01 : f32
    %6 = vector.broadcast %cst_3 : f32 to vector<8x8xf32>
    %7 = arith.mulf %5, %6 : vector<8x8xf32>
    %c0_4 = arith.constant 0 : index
    %c0_5 = arith.constant 0 : index
    %c0_6 = arith.constant 0 : index
    %8 = vector.load %arg3[%c0_4, %c0_5, %c0_6] : memref<1x1x8xf32, #tpu.memory_space<vmem>>, vector<1x1x8xf32>
    %9 = vector.shape_cast %8 : vector<1x1x8xf32> to vector<1x8xf32>
    %cst_7 = arith.constant 1.000000e+00 : f32
    %10 = vector.broadcast %cst_7 : f32 to vector<1x8xf32>
    %11 = arith.subf %10, %9 : vector<1x8xf32>
    %cst_8 = arith.constant -1.000000e+04 : f32
    %12 = vector.broadcast %cst_8 : f32 to vector<1x8xf32>
    %13 = arith.mulf %11, %12 : vector<1x8xf32>
    %14 = vector.broadcast %13 : vector<1x8xf32> to vector<8x8xf32>
    %15 = arith.addf %7, %14 : vector<8x8xf32>
    %cst_9 = arith.constant dense<0xFF800000> : vector<8xf32>
    %16 = vector.multi_reduction <maximumf>, %15, %cst_9 [1] : vector<8x8xf32> to vector<8xf32>
    %17 = vector.shape_cast %16 : vector<8xf32> to vector<8x1xf32>
    %18 = vector.broadcast %17 : vector<8x1xf32> to vector<8x8xf32>
    %19 = arith.subf %15, %18 : vector<8x8xf32>
    %20 = math.exp %19 : vector<8x8xf32>
    %cst_10 = arith.constant dense<0.000000e+00> : vector<8xf32>
    %21 = vector.multi_reduction <add>, %20, %cst_10 [1] : vector<8x8xf32> to vector<8xf32>
    %22 = vector.shape_cast %21 : vector<8xf32> to vector<8x1xf32>
    %23 = tpu.reciprocal %22 {approx = true} : vector<8x1xf32> -> vector<8x1xf32>
    %24 = vector.broadcast %23 : vector<8x1xf32> to vector<8x8xf32>
    %25 = arith.mulf %20, %24 : vector<8x8xf32>
    %26 = arith.truncf %25 : vector<8x8xf32> to vector<8x8xbf16>
    %cst_11 = arith.constant dense<0.000000e+00> : vector<8x64xf32>
    %27 = tpu.matmul %26, %4, %cst_11 {dimension_numbers = #tpu.dot_dimension_numbers<[1], [0], [0], [1], [0, 0, 1, 1], [], []>} : vector<8x8xbf16>, vector<8x64xbf16>, vector<8x64xf32> -> vector<8x64xf32>
    %28 = arith.truncf %27 : vector<8x64xf32> to vector<8x64xbf16>
    %c0_12 = arith.constant 0 : index
    %c0_13 = arith.constant 0 : index
    %c0_14 = arith.constant 0 : index
    %c0_15 = arith.constant 0 : index
    %29 = vector.load %arg4[%c0_12, %c0_13, %c0_14, %c0_15] : memref<1x1x8x64xbf16, #tpu.memory_space<vmem>>, vector<1x1x8x64xbf16>
    %30 = vector.shape_cast %29 : vector<1x1x8x64xbf16> to vector<8x64xbf16>
    %31 = vector.shape_cast %28 : vector<8x64xbf16> to vector<1x1x8x64xbf16>
    tpu.vector_store %arg4[%c0_12, %c0_13, %c0_14, %c0_15], %31 {strides = array<i32>} : memref<1x1x8x64xbf16, #tpu.memory_space<vmem>>, vector<1x1x8x64xbf16>,
    return
  }
  func.func @transform_0(%arg0: i32, %arg1: i32) -> (i32, i32, i32, i32) {
    %c0_i32 = arith.constant 0 : i32
    %c0_i32_0 = arith.constant 0 : i32
    %c0_i32_1 = arith.constant 0 : i32
    return %arg1, %arg0, %c0_i32, %c0_i32_0 : i32, i32, i32, i32
  }
  func.func @transform_1(%arg0: i32, %arg1: i32) -> (i32, i32, i32) {
    %c0_i32 = arith.constant 0 : i32
    %c0_i32_0 = arith.constant 0 : i32
    %c0_i32_1 = arith.constant 0 : i32
    return %arg0, %c0_i32, %c0_i32_0 : i32, i32, i32
  }
  func.func @transform_2(%arg0: i32, %arg1: i32) -> (i32, i32, i32, i32) {
    %c0_i32 = arith.constant 0 : i32
    %c0_i32_0 = arith.constant 0 : i32
    %c0_i32_1 = arith.constant 0 : i32
    return %arg1, %arg0, %c0_i32, %c0_i32_0 : i32, i32, i32, i32
  }
}

module attributes {stable_mosaic.version = 11 : i64} {
  func.func @_attn_out_kernel(%arg0: i32, %arg1: i32, %arg2: memref<1x16x64xbf16, #tpu.memory_space<vmem>>, %arg3: memref<1x64x128xbf16, #tpu.memory_space<vmem>>, %arg4: memref<1x128xf32, #tpu.memory_space<vmem>>, %arg5: memref<16x128xbf16, #tpu.memory_space<vmem>>, %arg6: memref<1x128xf32, #tpu.memory_space<vmem>>, %arg7: memref<1x128xf32, #tpu.memory_space<vmem>>, %arg8: memref<16x128xbf16, #tpu.memory_space<vmem>>, %arg9: memref<16x128xf32, #tpu.memory_space<vmem>>) attributes {dimension_semantics = [#tpu.dimension_semantics<parallel>, #tpu.dimension_semantics<arbitrary>], iteration_bounds = array<i64: 1, 2>, scalar_prefetch = 0 : i64, scratch_operands = 1 : i64, tpu.core_type = #tpu.core_type<tc>, window_params = [{transform_indices = @transform_0, window_bounds = array<i64: 1, 16, 64>}, {transform_indices = @transform_1, window_bounds = array<i64: 1, 64, 128>}, {pipeline_mode = #tpu.pipeline_mode<synchronous>, transform_indices = @transform_2, window_bounds = array<i64: 1, 128>}, {transform_indices = @transform_3, window_bounds = array<i64: 16, 128>}, {pipeline_mode = #tpu.pipeline_mode<synchronous>, transform_indices = @transform_4, window_bounds = array<i64: 1, 128>}, {pipeline_mode = #tpu.pipeline_mode<synchronous>, transform_indices = @transform_5, window_bounds = array<i64: 1, 128>}, {transform_indices = @transform_6, window_bounds = array<i64: 16, 128>}]} {
    %c0_i32 = arith.constant 0 : i32
    %0 = arith.cmpi eq, %arg1, %c0_i32 : i32
    %1 = arith.extui %0 : i1 to i32
    %c0_i32_0 = arith.constant 0 : i32
    %2 = arith.cmpi ne, %1, %c0_i32_0 : i32
    scf.if %2 {
      %cst_11 = arith.constant 0.000000e+00 : f32
      %14 = vector.broadcast %cst_11 : f32 to vector<16x128xf32>
      %c0_12 = arith.constant 0 : index
      %c0_13 = arith.constant 0 : index
      %15 = vector.load %arg9[%c0_12, %c0_13] : memref<16x128xf32, #tpu.memory_space<vmem>>, vector<16x128xf32>
      tpu.vector_store %arg9[%c0_12, %c0_13], %14 {strides = array<i32>} : memref<16x128xf32, #tpu.memory_space<vmem>>, vector<16x128xf32>,
    } else {
    }
    %c0 = arith.constant 0 : index
    %c0_1 = arith.constant 0 : index
    %3 = vector.load %arg9[%c0, %c0_1] : memref<16x128xf32, #tpu.memory_space<vmem>>, vector<16x128xf32>
    %c0_2 = arith.constant 0 : index
    %c0_3 = arith.constant 0 : index
    %c0_4 = arith.constant 0 : index
    %4 = vector.load %arg2[%c0_2, %c0_3, %c0_4] : memref<1x16x64xbf16, #tpu.memory_space<vmem>>, vector<1x16x64xbf16>
    %5 = vector.shape_cast %4 : vector<1x16x64xbf16> to vector<16x64xbf16>
    %c0_5 = arith.constant 0 : index
    %c0_6 = arith.constant 0 : index
    %c0_7 = arith.constant 0 : index
    %6 = vector.load %arg3[%c0_5, %c0_6, %c0_7] : memref<1x64x128xbf16, #tpu.memory_space<vmem>>, vector<1x64x128xbf16>
    %7 = vector.shape_cast %6 : vector<1x64x128xbf16> to vector<64x128xbf16>
    %cst = arith.constant dense<0.000000e+00> : vector<16x128xf32>
    %8 = tpu.matmul %5, %7, %cst {dimension_numbers = #tpu.dot_dimension_numbers<[1], [0], [0], [1], [0, 0, 1, 1], [], []>} : vector<16x64xbf16>, vector<64x128xbf16>, vector<16x128xf32> -> vector<16x128xf32>
    %9 = arith.addf %3, %8 : vector<16x128xf32>
    %c0_8 = arith.constant 0 : index
    %c0_9 = arith.constant 0 : index
    %10 = vector.load %arg9[%c0_8, %c0_9] : memref<16x128xf32, #tpu.memory_space<vmem>>, vector<16x128xf32>
    tpu.vector_store %arg9[%c0_8, %c0_9], %9 {strides = array<i32>} : memref<16x128xf32, #tpu.memory_space<vmem>>, vector<16x128xf32>,
    %c1_i32 = arith.constant 1 : i32
    %11 = arith.cmpi eq, %arg1, %c1_i32 : i32
    %12 = arith.extui %11 : i1 to i32
    %c0_i32_10 = arith.constant 0 : i32
    %13 = arith.cmpi ne, %12, %c0_i32_10 : i32
    scf.if %13 {
      %c0_11 = arith.constant 0 : index
      %c0_12 = arith.constant 0 : index
      %14 = vector.load %arg9[%c0_11, %c0_12] : memref<16x128xf32, #tpu.memory_space<vmem>>, vector<16x128xf32>
      %c0_13 = arith.constant 0 : index
      %c0_14 = arith.constant 0 : index
      %15 = vector.load %arg4[%c0_13, %c0_14] : memref<1x128xf32, #tpu.memory_space<vmem>>, vector<1x128xf32>
      %16 = vector.broadcast %15 : vector<1x128xf32> to vector<16x128xf32>
      %17 = arith.addf %14, %16 : vector<16x128xf32>
      %c0_15 = arith.constant 0 : index
      %c0_16 = arith.constant 0 : index
      %18 = vector.load %arg5[%c0_15, %c0_16] : memref<16x128xbf16, #tpu.memory_space<vmem>>, vector<16x128xbf16>
      %19 = arith.extf %18 : vector<16x128xbf16> to vector<16x128xf32>
      %20 = arith.addf %17, %19 : vector<16x128xf32>
      %c0_17 = arith.constant 0 : index
      %c0_18 = arith.constant 0 : index
      %21 = vector.load %arg6[%c0_17, %c0_18] : memref<1x128xf32, #tpu.memory_space<vmem>>, vector<1x128xf32>
      %c0_19 = arith.constant 0 : index
      %c0_20 = arith.constant 0 : index
      %22 = vector.load %arg7[%c0_19, %c0_20] : memref<1x128xf32, #tpu.memory_space<vmem>>, vector<1x128xf32>
      %cst_21 = arith.constant dense<0.000000e+00> : vector<16xf32>
      %23 = vector.multi_reduction <add>, %20, %cst_21 [1] : vector<16x128xf32> to vector<16xf32>
      %24 = vector.shape_cast %23 : vector<16xf32> to vector<16x1xf32>
      %cst_22 = arith.constant 1.280000e+02 : f32
      %25 = vector.broadcast %cst_22 : f32 to vector<16x1xf32>
      %26 = arith.divf %24, %25 : vector<16x1xf32>
      %27 = vector.broadcast %26 : vector<16x1xf32> to vector<16x128xf32>
      %28 = arith.subf %20, %27 : vector<16x128xf32>
      %29 = arith.mulf %28, %28 : vector<16x128xf32>
      %cst_23 = arith.constant dense<0.000000e+00> : vector<16xf32>
      %30 = vector.multi_reduction <add>, %29, %cst_23 [1] : vector<16x128xf32> to vector<16xf32>
      %31 = vector.shape_cast %30 : vector<16xf32> to vector<16x1xf32>
      %cst_24 = arith.constant 1.280000e+02 : f32
      %32 = vector.broadcast %cst_24 : f32 to vector<16x1xf32>
      %33 = arith.divf %31, %32 : vector<16x1xf32>
      %34 = vector.broadcast %26 : vector<16x1xf32> to vector<16x128xf32>
      %35 = arith.subf %20, %34 : vector<16x128xf32>
      %cst_25 = arith.constant 9.99999996E-13 : f32
      %36 = vector.broadcast %cst_25 : f32 to vector<16x1xf32>
      %37 = arith.addf %33, %36 : vector<16x1xf32>
      %38 = math.rsqrt %37 : vector<16x1xf32>
      %39 = vector.broadcast %38 : vector<16x1xf32> to vector<16x128xf32>
      %40 = arith.mulf %35, %39 : vector<16x128xf32>
      %41 = vector.broadcast %21 : vector<1x128xf32> to vector<16x128xf32>
      %42 = arith.mulf %40, %41 : vector<16x128xf32>
      %43 = vector.broadcast %22 : vector<1x128xf32> to vector<16x128xf32>
      %44 = arith.addf %42, %43 : vector<16x128xf32>
      %45 = arith.truncf %44 : vector<16x128xf32> to vector<16x128xbf16>
      %c0_26 = arith.constant 0 : index
      %c0_27 = arith.constant 0 : index
      %46 = vector.load %arg8[%c0_26, %c0_27] : memref<16x128xbf16, #tpu.memory_space<vmem>>, vector<16x128xbf16>
      tpu.vector_store %arg8[%c0_26, %c0_27], %45 {strides = array<i32>} : memref<16x128xbf16, #tpu.memory_space<vmem>>, vector<16x128xbf16>,
    } else {
    }
    return
  }
  func.func @transform_0(%arg0: i32, %arg1: i32) -> (i32, i32, i32) {
    %c0_i32 = arith.constant 0 : i32
    %c0_i32_0 = arith.constant 0 : i32
    return %arg1, %arg0, %c0_i32 : i32, i32, i32
  }
  func.func @transform_1(%arg0: i32, %arg1: i32) -> (i32, i32, i32) {
    %c0_i32 = arith.constant 0 : i32
    %c0_i32_0 = arith.constant 0 : i32
    %c0_i32_1 = arith.constant 0 : i32
    return %arg1, %c0_i32, %c0_i32_0 : i32, i32, i32
  }
  func.func @transform_2(%arg0: i32, %arg1: i32) -> (i32, i32) {
    %c0_i32 = arith.constant 0 : i32
    %c0_i32_0 = arith.constant 0 : i32
    %c0_i32_1 = arith.constant 0 : i32
    return %c0_i32, %c0_i32_0 : i32, i32
  }
  func.func @transform_3(%arg0: i32, %arg1: i32) -> (i32, i32) {
    %c0_i32 = arith.constant 0 : i32
    %c0_i32_0 = arith.constant 0 : i32
    return %arg0, %c0_i32 : i32, i32
  }
  func.func @transform_4(%arg0: i32, %arg1: i32) -> (i32, i32) {
    %c0_i32 = arith.constant 0 : i32
    %c0_i32_0 = arith.constant 0 : i32
    %c0_i32_1 = arith.constant 0 : i32
    return %c0_i32, %c0_i32_0 : i32, i32
  }
  func.func @transform_5(%arg0: i32, %arg1: i32) -> (i32, i32) {
    %c0_i32 = arith.constant 0 : i32
    %c0_i32_0 = arith.constant 0 : i32
    %c0_i32_1 = arith.constant 0 : i32
    return %c0_i32, %c0_i32_0 : i32, i32
  }
  func.func @transform_6(%arg0: i32, %arg1: i32) -> (i32, i32) {
    %c0_i32 = arith.constant 0 : i32
    %c0_i32_0 = arith.constant 0 : i32
    return %arg0, %c0_i32 : i32, i32
  }
}

module attributes {stable_mosaic.version = 11 : i64} {
  func.func @_ffn_kernel(%arg0: i32, %arg1: i32, %arg2: memref<16x128xbf16, #tpu.memory_space<vmem>>, %arg3: memref<128x128xbf16, #tpu.memory_space<vmem>>, %arg4: memref<1x128xf32, #tpu.memory_space<vmem>>, %arg5: memref<128x128xbf16, #tpu.memory_space<vmem>>, %arg6: memref<1x128xf32, #tpu.memory_space<vmem>>, %arg7: memref<1x128xf32, #tpu.memory_space<vmem>>, %arg8: memref<1x128xf32, #tpu.memory_space<vmem>>, %arg9: memref<16x128xbf16, #tpu.memory_space<vmem>>, %arg10: memref<16x128xf32, #tpu.memory_space<vmem>>) attributes {dimension_semantics = [#tpu.dimension_semantics<parallel>, #tpu.dimension_semantics<arbitrary>], iteration_bounds = array<i64: 1, 2>, scalar_prefetch = 0 : i64, scratch_operands = 1 : i64, tpu.core_type = #tpu.core_type<tc>, window_params = [{transform_indices = @transform_0, window_bounds = array<i64: 16, 128>}, {transform_indices = @transform_1, window_bounds = array<i64: 128, 128>}, {transform_indices = @transform_2, window_bounds = array<i64: 1, 128>}, {transform_indices = @transform_3, window_bounds = array<i64: 128, 128>}, {pipeline_mode = #tpu.pipeline_mode<synchronous>, transform_indices = @transform_4, window_bounds = array<i64: 1, 128>}, {pipeline_mode = #tpu.pipeline_mode<synchronous>, transform_indices = @transform_5, window_bounds = array<i64: 1, 128>}, {pipeline_mode = #tpu.pipeline_mode<synchronous>, transform_indices = @transform_6, window_bounds = array<i64: 1, 128>}, {transform_indices = @transform_7, window_bounds = array<i64: 16, 128>}]} {
    %c0_i32 = arith.constant 0 : i32
    %0 = arith.cmpi eq, %arg1, %c0_i32 : i32
    %1 = arith.extui %0 : i1 to i32
    %c0_i32_0 = arith.constant 0 : i32
    %2 = arith.cmpi ne, %1, %c0_i32_0 : i32
    scf.if %2 {
      %cst_18 = arith.constant 0.000000e+00 : f32
      %31 = vector.broadcast %cst_18 : f32 to vector<16x128xf32>
      %c0_19 = arith.constant 0 : index
      %c0_20 = arith.constant 0 : index
      %32 = vector.load %arg10[%c0_19, %c0_20] : memref<16x128xf32, #tpu.memory_space<vmem>>, vector<16x128xf32>
      tpu.vector_store %arg10[%c0_19, %c0_20], %31 {strides = array<i32>} : memref<16x128xf32, #tpu.memory_space<vmem>>, vector<16x128xf32>,
    } else {
    }
    %c0 = arith.constant 0 : index
    %c0_1 = arith.constant 0 : index
    %3 = vector.load %arg2[%c0, %c0_1] : memref<16x128xbf16, #tpu.memory_space<vmem>>, vector<16x128xbf16>
    %c0_2 = arith.constant 0 : index
    %c0_3 = arith.constant 0 : index
    %4 = vector.load %arg3[%c0_2, %c0_3] : memref<128x128xbf16, #tpu.memory_space<vmem>>, vector<128x128xbf16>
    %cst = arith.constant dense<0.000000e+00> : vector<16x128xf32>
    %5 = tpu.matmul %3, %4, %cst {dimension_numbers = #tpu.dot_dimension_numbers<[1], [0], [0], [1], [0, 0, 1, 1], [], []>} : vector<16x128xbf16>, vector<128x128xbf16>, vector<16x128xf32> -> vector<16x128xf32>
    %c0_4 = arith.constant 0 : index
    %c0_5 = arith.constant 0 : index
    %6 = vector.load %arg4[%c0_4, %c0_5] : memref<1x128xf32, #tpu.memory_space<vmem>>, vector<1x128xf32>
    %7 = vector.broadcast %6 : vector<1x128xf32> to vector<16x128xf32>
    %8 = arith.addf %5, %7 : vector<16x128xf32>
    %cst_6 = arith.constant 5.000000e-01 : f32
    %9 = vector.broadcast %cst_6 : f32 to vector<16x128xf32>
    %10 = arith.mulf %9, %8 : vector<16x128xf32>
    %cst_7 = arith.constant 4.471500e-02 : f32
    %11 = vector.broadcast %cst_7 : f32 to vector<16x128xf32>
    %12 = arith.mulf %11, %8 : vector<16x128xf32>
    %13 = arith.mulf %12, %8 : vector<16x128xf32>
    %14 = arith.mulf %13, %8 : vector<16x128xf32>
    %15 = arith.addf %8, %14 : vector<16x128xf32>
    %cst_8 = arith.constant 0.797884583 : f32
    %16 = vector.broadcast %cst_8 : f32 to vector<16x128xf32>
    %17 = arith.mulf %16, %15 : vector<16x128xf32>
    %18 = math.tanh %17 : vector<16x128xf32>
    %cst_9 = arith.constant 1.000000e+00 : f32
    %19 = vector.broadcast %cst_9 : f32 to vector<16x128xf32>
    %20 = arith.addf %19, %18 : vector<16x128xf32>
    %21 = arith.mulf %10, %20 : vector<16x128xf32>
    %c0_10 = arith.constant 0 : index
    %c0_11 = arith.constant 0 : index
    %22 = vector.load %arg10[%c0_10, %c0_11] : memref<16x128xf32, #tpu.memory_space<vmem>>, vector<16x128xf32>
    %23 = arith.truncf %21 : vector<16x128xf32> to vector<16x128xbf16>
    %c0_12 = arith.constant 0 : index
    %c0_13 = arith.constant 0 : index
    %24 = vector.load %arg5[%c0_12, %c0_13] : memref<128x128xbf16, #tpu.memory_space<vmem>>, vector<128x128xbf16>
    %cst_14 = arith.constant dense<0.000000e+00> : vector<16x128xf32>
    %25 = tpu.matmul %23, %24, %cst_14 {dimension_numbers = #tpu.dot_dimension_numbers<[1], [0], [0], [1], [0, 0, 1, 1], [], []>} : vector<16x128xbf16>, vector<128x128xbf16>, vector<16x128xf32> -> vector<16x128xf32>
    %26 = arith.addf %22, %25 : vector<16x128xf32>
    %c0_15 = arith.constant 0 : index
    %c0_16 = arith.constant 0 : index
    %27 = vector.load %arg10[%c0_15, %c0_16] : memref<16x128xf32, #tpu.memory_space<vmem>>, vector<16x128xf32>
    tpu.vector_store %arg10[%c0_15, %c0_16], %26 {strides = array<i32>} : memref<16x128xf32, #tpu.memory_space<vmem>>, vector<16x128xf32>,
    %c1_i32 = arith.constant 1 : i32
    %28 = arith.cmpi eq, %arg1, %c1_i32 : i32
    %29 = arith.extui %28 : i1 to i32
    %c0_i32_17 = arith.constant 0 : i32
    %30 = arith.cmpi ne, %29, %c0_i32_17 : i32
    scf.if %30 {
      %c0_18 = arith.constant 0 : index
      %c0_19 = arith.constant 0 : index
      %31 = vector.load %arg10[%c0_18, %c0_19] : memref<16x128xf32, #tpu.memory_space<vmem>>, vector<16x128xf32>
      %c0_20 = arith.constant 0 : index
      %c0_21 = arith.constant 0 : index
      %32 = vector.load %arg6[%c0_20, %c0_21] : memref<1x128xf32, #tpu.memory_space<vmem>>, vector<1x128xf32>
      %33 = vector.broadcast %32 : vector<1x128xf32> to vector<16x128xf32>
      %34 = arith.addf %31, %33 : vector<16x128xf32>
      %c0_22 = arith.constant 0 : index
      %c0_23 = arith.constant 0 : index
      %35 = vector.load %arg2[%c0_22, %c0_23] : memref<16x128xbf16, #tpu.memory_space<vmem>>, vector<16x128xbf16>
      %36 = arith.extf %35 : vector<16x128xbf16> to vector<16x128xf32>
      %37 = arith.addf %34, %36 : vector<16x128xf32>
      %c0_24 = arith.constant 0 : index
      %c0_25 = arith.constant 0 : index
      %38 = vector.load %arg7[%c0_24, %c0_25] : memref<1x128xf32, #tpu.memory_space<vmem>>, vector<1x128xf32>
      %c0_26 = arith.constant 0 : index
      %c0_27 = arith.constant 0 : index
      %39 = vector.load %arg8[%c0_26, %c0_27] : memref<1x128xf32, #tpu.memory_space<vmem>>, vector<1x128xf32>
      %cst_28 = arith.constant dense<0.000000e+00> : vector<16xf32>
      %40 = vector.multi_reduction <add>, %37, %cst_28 [1] : vector<16x128xf32> to vector<16xf32>
      %41 = vector.shape_cast %40 : vector<16xf32> to vector<16x1xf32>
      %cst_29 = arith.constant 1.280000e+02 : f32
      %42 = vector.broadcast %cst_29 : f32 to vector<16x1xf32>
      %43 = arith.divf %41, %42 : vector<16x1xf32>
      %44 = vector.broadcast %43 : vector<16x1xf32> to vector<16x128xf32>
      %45 = arith.subf %37, %44 : vector<16x128xf32>
      %46 = arith.mulf %45, %45 : vector<16x128xf32>
      %cst_30 = arith.constant dense<0.000000e+00> : vector<16xf32>
      %47 = vector.multi_reduction <add>, %46, %cst_30 [1] : vector<16x128xf32> to vector<16xf32>
      %48 = vector.shape_cast %47 : vector<16xf32> to vector<16x1xf32>
      %cst_31 = arith.constant 1.280000e+02 : f32
      %49 = vector.broadcast %cst_31 : f32 to vector<16x1xf32>
      %50 = arith.divf %48, %49 : vector<16x1xf32>
      %51 = vector.broadcast %43 : vector<16x1xf32> to vector<16x128xf32>
      %52 = arith.subf %37, %51 : vector<16x128xf32>
      %cst_32 = arith.constant 9.99999996E-13 : f32
      %53 = vector.broadcast %cst_32 : f32 to vector<16x1xf32>
      %54 = arith.addf %50, %53 : vector<16x1xf32>
      %55 = math.rsqrt %54 : vector<16x1xf32>
      %56 = vector.broadcast %55 : vector<16x1xf32> to vector<16x128xf32>
      %57 = arith.mulf %52, %56 : vector<16x128xf32>
      %58 = vector.broadcast %38 : vector<1x128xf32> to vector<16x128xf32>
      %59 = arith.mulf %57, %58 : vector<16x128xf32>
      %60 = vector.broadcast %39 : vector<1x128xf32> to vector<16x128xf32>
      %61 = arith.addf %59, %60 : vector<16x128xf32>
      %62 = arith.truncf %61 : vector<16x128xf32> to vector<16x128xbf16>
      %c0_33 = arith.constant 0 : index
      %c0_34 = arith.constant 0 : index
      %63 = vector.load %arg9[%c0_33, %c0_34] : memref<16x128xbf16, #tpu.memory_space<vmem>>, vector<16x128xbf16>
      tpu.vector_store %arg9[%c0_33, %c0_34], %62 {strides = array<i32>} : memref<16x128xbf16, #tpu.memory_space<vmem>>, vector<16x128xbf16>,
    } else {
    }
    return
  }
  func.func @transform_0(%arg0: i32, %arg1: i32) -> (i32, i32) {
    %c0_i32 = arith.constant 0 : i32
    %c0_i32_0 = arith.constant 0 : i32
    return %arg0, %c0_i32 : i32, i32
  }
  func.func @transform_1(%arg0: i32, %arg1: i32) -> (i32, i32) {
    %c0_i32 = arith.constant 0 : i32
    %c0_i32_0 = arith.constant 0 : i32
    return %c0_i32, %arg1 : i32, i32
  }
  func.func @transform_2(%arg0: i32, %arg1: i32) -> (i32, i32) {
    %c0_i32 = arith.constant 0 : i32
    %c0_i32_0 = arith.constant 0 : i32
    return %c0_i32, %arg1 : i32, i32
  }
  func.func @transform_3(%arg0: i32, %arg1: i32) -> (i32, i32) {
    %c0_i32 = arith.constant 0 : i32
    %c0_i32_0 = arith.constant 0 : i32
    return %arg1, %c0_i32 : i32, i32
  }
  func.func @transform_4(%arg0: i32, %arg1: i32) -> (i32, i32) {
    %c0_i32 = arith.constant 0 : i32
    %c0_i32_0 = arith.constant 0 : i32
    %c0_i32_1 = arith.constant 0 : i32
    return %c0_i32, %c0_i32_0 : i32, i32
  }
  func.func @transform_5(%arg0: i32, %arg1: i32) -> (i32, i32) {
    %c0_i32 = arith.constant 0 : i32
    %c0_i32_0 = arith.constant 0 : i32
    %c0_i32_1 = arith.constant 0 : i32
    return %c0_i32, %c0_i32_0 : i32, i32
  }
  func.func @transform_6(%arg0: i32, %arg1: i32) -> (i32, i32) {
    %c0_i32 = arith.constant 0 : i32
    %c0_i32_0 = arith.constant 0 : i32
    %c0_i32_1 = arith.constant 0 : i32
    return %c0_i32, %c0_i32_0 : i32, i32
  }
  func.func @transform_7(%arg0: i32, %arg1: i32) -> (i32, i32) {
    %c0_i32 = arith.constant 0 : i32
    %c0_i32_0 = arith.constant 0 : i32
    return %arg0, %c0_i32 : i32, i32
  }
}

module attributes {stable_mosaic.version = 11 : i64} {
  func.func @_transform_kernel(%arg0: i32, %arg1: memref<16x128xbf16, #tpu.memory_space<vmem>>, %arg2: memref<128x128xbf16, #tpu.memory_space<vmem>>, %arg3: memref<1x128xf32, #tpu.memory_space<vmem>>, %arg4: memref<1x128xf32, #tpu.memory_space<vmem>>, %arg5: memref<1x128xf32, #tpu.memory_space<vmem>>, %arg6: memref<16x128xbf16, #tpu.memory_space<vmem>>) attributes {dimension_semantics = [#tpu.dimension_semantics<parallel>], iteration_bounds = array<i64: 1>, scalar_prefetch = 0 : i64, scratch_operands = 0 : i64, tpu.core_type = #tpu.core_type<tc>, window_params = [{transform_indices = @transform_0, window_bounds = array<i64: 16, 128>}, {pipeline_mode = #tpu.pipeline_mode<synchronous>, transform_indices = @transform_1, window_bounds = array<i64: 128, 128>}, {pipeline_mode = #tpu.pipeline_mode<synchronous>, transform_indices = @transform_2, window_bounds = array<i64: 1, 128>}, {pipeline_mode = #tpu.pipeline_mode<synchronous>, transform_indices = @transform_3, window_bounds = array<i64: 1, 128>}, {pipeline_mode = #tpu.pipeline_mode<synchronous>, transform_indices = @transform_4, window_bounds = array<i64: 1, 128>}, {transform_indices = @transform_5, window_bounds = array<i64: 16, 128>}]} {
    %c0 = arith.constant 0 : index
    %c0_0 = arith.constant 0 : index
    %0 = vector.load %arg1[%c0, %c0_0] : memref<16x128xbf16, #tpu.memory_space<vmem>>, vector<16x128xbf16>
    %c0_1 = arith.constant 0 : index
    %c0_2 = arith.constant 0 : index
    %1 = vector.load %arg2[%c0_1, %c0_2] : memref<128x128xbf16, #tpu.memory_space<vmem>>, vector<128x128xbf16>
    %cst = arith.constant dense<0.000000e+00> : vector<16x128xf32>
    %2 = tpu.matmul %0, %1, %cst {dimension_numbers = #tpu.dot_dimension_numbers<[1], [0], [0], [1], [0, 0, 1, 1], [], []>} : vector<16x128xbf16>, vector<128x128xbf16>, vector<16x128xf32> -> vector<16x128xf32>
    %c0_3 = arith.constant 0 : index
    %c0_4 = arith.constant 0 : index
    %3 = vector.load %arg3[%c0_3, %c0_4] : memref<1x128xf32, #tpu.memory_space<vmem>>, vector<1x128xf32>
    %4 = vector.broadcast %3 : vector<1x128xf32> to vector<16x128xf32>
    %5 = arith.addf %2, %4 : vector<16x128xf32>
    %cst_5 = arith.constant 5.000000e-01 : f32
    %6 = vector.broadcast %cst_5 : f32 to vector<16x128xf32>
    %7 = arith.mulf %6, %5 : vector<16x128xf32>
    %cst_6 = arith.constant 4.471500e-02 : f32
    %8 = vector.broadcast %cst_6 : f32 to vector<16x128xf32>
    %9 = arith.mulf %8, %5 : vector<16x128xf32>
    %10 = arith.mulf %9, %5 : vector<16x128xf32>
    %11 = arith.mulf %10, %5 : vector<16x128xf32>
    %12 = arith.addf %5, %11 : vector<16x128xf32>
    %cst_7 = arith.constant 0.797884583 : f32
    %13 = vector.broadcast %cst_7 : f32 to vector<16x128xf32>
    %14 = arith.mulf %13, %12 : vector<16x128xf32>
    %15 = math.tanh %14 : vector<16x128xf32>
    %cst_8 = arith.constant 1.000000e+00 : f32
    %16 = vector.broadcast %cst_8 : f32 to vector<16x128xf32>
    %17 = arith.addf %16, %15 : vector<16x128xf32>
    %18 = arith.mulf %7, %17 : vector<16x128xf32>
    %c0_9 = arith.constant 0 : index
    %c0_10 = arith.constant 0 : index
    %19 = vector.load %arg4[%c0_9, %c0_10] : memref<1x128xf32, #tpu.memory_space<vmem>>, vector<1x128xf32>
    %c0_11 = arith.constant 0 : index
    %c0_12 = arith.constant 0 : index
    %20 = vector.load %arg5[%c0_11, %c0_12] : memref<1x128xf32, #tpu.memory_space<vmem>>, vector<1x128xf32>
    %cst_13 = arith.constant dense<0.000000e+00> : vector<16xf32>
    %21 = vector.multi_reduction <add>, %18, %cst_13 [1] : vector<16x128xf32> to vector<16xf32>
    %22 = vector.shape_cast %21 : vector<16xf32> to vector<16x1xf32>
    %cst_14 = arith.constant 1.280000e+02 : f32
    %23 = vector.broadcast %cst_14 : f32 to vector<16x1xf32>
    %24 = arith.divf %22, %23 : vector<16x1xf32>
    %25 = vector.broadcast %24 : vector<16x1xf32> to vector<16x128xf32>
    %26 = arith.subf %18, %25 : vector<16x128xf32>
    %27 = arith.mulf %26, %26 : vector<16x128xf32>
    %cst_15 = arith.constant dense<0.000000e+00> : vector<16xf32>
    %28 = vector.multi_reduction <add>, %27, %cst_15 [1] : vector<16x128xf32> to vector<16xf32>
    %29 = vector.shape_cast %28 : vector<16xf32> to vector<16x1xf32>
    %cst_16 = arith.constant 1.280000e+02 : f32
    %30 = vector.broadcast %cst_16 : f32 to vector<16x1xf32>
    %31 = arith.divf %29, %30 : vector<16x1xf32>
    %32 = vector.broadcast %24 : vector<16x1xf32> to vector<16x128xf32>
    %33 = arith.subf %18, %32 : vector<16x128xf32>
    %cst_17 = arith.constant 9.99999996E-13 : f32
    %34 = vector.broadcast %cst_17 : f32 to vector<16x1xf32>
    %35 = arith.addf %31, %34 : vector<16x1xf32>
    %36 = math.rsqrt %35 : vector<16x1xf32>
    %37 = vector.broadcast %36 : vector<16x1xf32> to vector<16x128xf32>
    %38 = arith.mulf %33, %37 : vector<16x128xf32>
    %39 = vector.broadcast %19 : vector<1x128xf32> to vector<16x128xf32>
    %40 = arith.mulf %38, %39 : vector<16x128xf32>
    %41 = vector.broadcast %20 : vector<1x128xf32> to vector<16x128xf32>
    %42 = arith.addf %40, %41 : vector<16x128xf32>
    %43 = arith.truncf %42 : vector<16x128xf32> to vector<16x128xbf16>
    %c0_18 = arith.constant 0 : index
    %c0_19 = arith.constant 0 : index
    %44 = vector.load %arg6[%c0_18, %c0_19] : memref<16x128xbf16, #tpu.memory_space<vmem>>, vector<16x128xbf16>
    tpu.vector_store %arg6[%c0_18, %c0_19], %43 {strides = array<i32>} : memref<16x128xbf16, #tpu.memory_space<vmem>>, vector<16x128xbf16>,
    return
  }
  func.func @transform_0(%arg0: i32) -> (i32, i32) {
    %c0_i32 = arith.constant 0 : i32
    %c0_i32_0 = arith.constant 0 : i32
    return %arg0, %c0_i32 : i32, i32
  }
  func.func @transform_1(%arg0: i32) -> (i32, i32) {
    %c0_i32 = arith.constant 0 : i32
    %c0_i32_0 = arith.constant 0 : i32
    %c0_i32_1 = arith.constant 0 : i32
    return %c0_i32, %c0_i32_0 : i32, i32
  }
  func.func @transform_2(%arg0: i32) -> (i32, i32) {
    %c0_i32 = arith.constant 0 : i32
    %c0_i32_0 = arith.constant 0 : i32
    %c0_i32_1 = arith.constant 0 : i32
    return %c0_i32, %c0_i32_0 : i32, i32
  }
  func.func @transform_3(%arg0: i32) -> (i32, i32) {
    %c0_i32 = arith.constant 0 : i32
    %c0_i32_0 = arith.constant 0 : i32
    %c0_i32_1 = arith.constant 0 : i32
    return %c0_i32, %c0_i32_0 : i32, i32
  }
  func.func @transform_4(%arg0: i32) -> (i32, i32) {
    %c0_i32 = arith.constant 0 : i32
    %c0_i32_0 = arith.constant 0 : i32
    %c0_i32_1 = arith.constant 0 : i32
    return %c0_i32, %c0_i32_0 : i32, i32
  }
  func.func @transform_5(%arg0: i32) -> (i32, i32) {
    %c0_i32 = arith.constant 0 : i32
    %c0_i32_0 = arith.constant 0 : i32
    return %arg0, %c0_i32 : i32, i32
  }
}

module attributes {stable_mosaic.version = 11 : i64} {
  func.func @_decoder_kernel(%arg0: i32, %arg1: i32, %arg2: memref<16x128xbf16, #tpu.memory_space<vmem>>, %arg3: memref<128x128xbf16, #tpu.memory_space<vmem>>, %arg4: memref<1x128xf32, #tpu.memory_space<vmem>>, %arg5: memref<16x128xf32, #tpu.memory_space<vmem>>) attributes {dimension_semantics = [#tpu.dimension_semantics<parallel>, #tpu.dimension_semantics<parallel>], iteration_bounds = array<i64: 1, 1>, scalar_prefetch = 0 : i64, scratch_operands = 0 : i64, tpu.core_type = #tpu.core_type<tc>, window_params = [{transform_indices = @transform_0, window_bounds = array<i64: 16, 128>}, {transform_indices = @transform_1, window_bounds = array<i64: 128, 128>}, {transform_indices = @transform_2, window_bounds = array<i64: 1, 128>}, {transform_indices = @transform_3, window_bounds = array<i64: 16, 128>}]} {
    %c0 = arith.constant 0 : index
    %c0_0 = arith.constant 0 : index
    %0 = vector.load %arg2[%c0, %c0_0] : memref<16x128xbf16, #tpu.memory_space<vmem>>, vector<16x128xbf16>
    %c0_1 = arith.constant 0 : index
    %c0_2 = arith.constant 0 : index
    %1 = vector.load %arg3[%c0_1, %c0_2] : memref<128x128xbf16, #tpu.memory_space<vmem>>, vector<128x128xbf16>
    %cst = arith.constant dense<0.000000e+00> : vector<16x128xf32>
    %2 = tpu.matmul %0, %1, %cst {dimension_numbers = #tpu.dot_dimension_numbers<[1], [1], [0], [0], [0, 0, 1, 0], [], []>} : vector<16x128xbf16>, vector<128x128xbf16>, vector<16x128xf32> -> vector<16x128xf32>
    %c0_3 = arith.constant 0 : index
    %c0_4 = arith.constant 0 : index
    %3 = vector.load %arg4[%c0_3, %c0_4] : memref<1x128xf32, #tpu.memory_space<vmem>>, vector<1x128xf32>
    %4 = vector.broadcast %3 : vector<1x128xf32> to vector<16x128xf32>
    %5 = arith.addf %2, %4 : vector<16x128xf32>
    %c0_5 = arith.constant 0 : index
    %c0_6 = arith.constant 0 : index
    %6 = vector.load %arg5[%c0_5, %c0_6] : memref<16x128xf32, #tpu.memory_space<vmem>>, vector<16x128xf32>
    tpu.vector_store %arg5[%c0_5, %c0_6], %5 {strides = array<i32>} : memref<16x128xf32, #tpu.memory_space<vmem>>, vector<16x128xf32>,
    return
  }
  func.func @transform_0(%arg0: i32, %arg1: i32) -> (i32, i32) {
    %c0_i32 = arith.constant 0 : i32
    %c0_i32_0 = arith.constant 0 : i32
    return %arg0, %c0_i32 : i32, i32
  }
  func.func @transform_1(%arg0: i32, %arg1: i32) -> (i32, i32) {
    %c0_i32 = arith.constant 0 : i32
    %c0_i32_0 = arith.constant 0 : i32
    return %arg1, %c0_i32 : i32, i32
  }
  func.func @transform_2(%arg0: i32, %arg1: i32) -> (i32, i32) {
    %c0_i32 = arith.constant 0 : i32
    %c0_i32_0 = arith.constant 0 : i32
    return %c0_i32, %arg1 : i32, i32
  }
  func.func @transform_3(%arg0: i32, %arg1: i32) -> (i32, i32) {
    %c0_i32 = arith.constant 0 : i32
    return %arg0, %arg1 : i32, i32
  }
}

module attributes {stable_mosaic.version = 11 : i64} {
  func.func @_ce_rank_kernel(%arg0: i32, %arg1: memref<2x128xf32, #tpu.memory_space<vmem>>, %arg2: memref<2x1xi32, #tpu.memory_space<vmem>>, %arg3: memref<2x1xf32, #tpu.memory_space<vmem>>, %arg4: memref<2x1xi32, #tpu.memory_space<vmem>>) attributes {dimension_semantics = [#tpu.dimension_semantics<arbitrary>], iteration_bounds = array<i64: 1>, scalar_prefetch = 0 : i64, scratch_operands = 0 : i64, tpu.core_type = #tpu.core_type<tc>, window_params = [{pipeline_mode = #tpu.pipeline_mode<synchronous>, transform_indices = @transform_0, window_bounds = array<i64: 2, 128>}, {pipeline_mode = #tpu.pipeline_mode<synchronous>, transform_indices = @transform_1, window_bounds = array<i64: 2, 1>}, {pipeline_mode = #tpu.pipeline_mode<synchronous>, transform_indices = @transform_2, window_bounds = array<i64: 2, 1>}, {pipeline_mode = #tpu.pipeline_mode<synchronous>, transform_indices = @transform_3, window_bounds = array<i64: 2, 1>}]} {
    %c0 = arith.constant 0 : index
    %c0_0 = arith.constant 0 : index
    %0 = vector.load %arg1[%c0, %c0_0] : memref<2x128xf32, #tpu.memory_space<vmem>>, vector<2x128xf32>
    %c0_1 = arith.constant 0 : index
    %c0_2 = arith.constant 0 : index
    %1 = vector.load %arg2[%c0_1, %c0_2] : memref<2x1xi32, #tpu.memory_space<vmem>>, vector<2x1xi32>
    %2 = tpu.iota {dimensions = array<i32: 1>} : vector<2x128xi32>
    %3 = vector.broadcast %1 : vector<2x1xi32> to vector<2x128xi32>
    %4 = arith.cmpi eq, %2, %3 : vector<2x128xi32>
    %5 = arith.extui %4 : vector<2x128xi1> to vector<2x128xi32>
    %6 = arith.sitofp %5 : vector<2x128xi32> to vector<2x128xf32>
    %7 = arith.mulf %0, %6 : vector<2x128xf32>
    %cst = arith.constant dense<0.000000e+00> : vector<2xf32>
    %8 = vector.multi_reduction <add>, %7, %cst [1] : vector<2x128xf32> to vector<2xf32>
    %9 = vector.shape_cast %8 : vector<2xf32> to vector<2x1xf32>
    %cst_3 = arith.constant dense<0xFF800000> : vector<2xf32>
    %10 = vector.multi_reduction <maximumf>, %0, %cst_3 [1] : vector<2x128xf32> to vector<2xf32>
    %11 = vector.shape_cast %10 : vector<2xf32> to vector<2x1xf32>
    %12 = vector.broadcast %11 : vector<2x1xf32> to vector<2x128xf32>
    %13 = arith.subf %0, %12 : vector<2x128xf32>
    %14 = math.exp %13 : vector<2x128xf32>
    %cst_4 = arith.constant dense<0.000000e+00> : vector<2xf32>
    %15 = vector.multi_reduction <add>, %14, %cst_4 [1] : vector<2x128xf32> to vector<2xf32>
    %16 = vector.shape_cast %15 : vector<2xf32> to vector<2x1xf32>
    %17 = math.log %16 : vector<2x1xf32>
    %18 = arith.addf %11, %17 : vector<2x1xf32>
    %19 = arith.subf %18, %9 : vector<2x1xf32>
    %c0_5 = arith.constant 0 : index
    %c0_6 = arith.constant 0 : index
    %20 = vector.load %arg3[%c0_5, %c0_6] : memref<2x1xf32, #tpu.memory_space<vmem>>, vector<2x1xf32>
    tpu.vector_store %arg3[%c0_5, %c0_6], %19 {strides = array<i32>} : memref<2x1xf32, #tpu.memory_space<vmem>>, vector<2x1xf32>,
    %21 = vector.broadcast %9 : vector<2x1xf32> to vector<2x128xf32>
    %22 = arith.cmpf ogt, %0, %21 : vector<2x128xf32>
    %23 = arith.extui %22 : vector<2x128xi1> to vector<2x128xi32>
    %cst_7 = arith.constant dense<0> : vector<2xi32>
    %24 = vector.multi_reduction <add>, %23, %cst_7 [1] : vector<2x128xi32> to vector<2xi32>
    %25 = vector.shape_cast %24 : vector<2xi32> to vector<2x1xi32>
    %c1_i32 = arith.constant 1 : i32
    %26 = vector.broadcast %c1_i32 : i32 to vector<2x1xi32>
    %27 = arith.addi %25, %26 : vector<2x1xi32>
    %c0_8 = arith.constant 0 : index
    %c0_9 = arith.constant 0 : index
    %28 = vector.load %arg4[%c0_8, %c0_9] : memref<2x1xi32, #tpu.memory_space<vmem>>, vector<2x1xi32>
    tpu.vector_store %arg4[%c0_8, %c0_9], %27 {strides = array<i32>} : memref<2x1xi32, #tpu.memory_space<vmem>>, vector<2x1xi32>,
    return
  }
  func.func @transform_0(%arg0: i32) -> (i32, i32) {
    %c0_i32 = arith.constant 0 : i32
    %c0_i32_0 = arith.constant 0 : i32
    %c0_i32_1 = arith.constant 0 : i32
    return %c0_i32, %c0_i32_0 : i32, i32
  }
  func.func @transform_1(%arg0: i32) -> (i32, i32) {
    %c0_i32 = arith.constant 0 : i32
    %c0_i32_0 = arith.constant 0 : i32
    %c0_i32_1 = arith.constant 0 : i32
    return %c0_i32, %c0_i32_0 : i32, i32
  }
  func.func @transform_2(%arg0: i32) -> (i32, i32) {
    %c0_i32 = arith.constant 0 : i32
    %c0_i32_0 = arith.constant 0 : i32
    %c0_i32_1 = arith.constant 0 : i32
    return %c0_i32, %c0_i32_0 : i32, i32
  }
  func.func @transform_3(%arg0: i32) -> (i32, i32) {
    %c0_i32 = arith.constant 0 : i32
    %c0_i32_0 = arith.constant 0 : i32
    %c0_i32_1 = arith.constant 0 : i32
    return %c0_i32, %c0_i32_0 : i32, i32
  }
}

</mosaic_0001>

<bundles_post_ra>
// kernel: nbert_pretrain_forward.13
= control target key start
LH: loop header
LB: loop body
LE: loop exit
PB: predicated region body
PF: predicated region fallthrough
CT: control target
= control target key end

     0   :  { %s1214_s0 = inlined_call_operand.hbm [shape: bf16[16,128], index: 0, kind: input, shape index: {}]   ;;  %s1215_s1 = inlined_call_operand.hbm [shape: bf16[2,128,192], index: 1, kind: input, shape index: {}]   ;;  %s1216_s2 = inlined_call_operand.hbm [shape: f32[2,1,192], index: 2, kind: input, shape index: {}]   ;;  %s1217_s3 = inlined_call_operand.hbm [shape: bf16[2,16,192], index: 3, kind: output, shape index: {}]  }
   0x1   :  { %1226 = sst [smem:[#allocation13_spill]] %s1215_s1 }
   0x2   :  { %8 = vsyncpa [#allocation3], 0 }
   0x3   :  { %9 = vsyncpa [#allocation6], 0 }
   0x4   :  { %11 = vsyncpa [#allocation6 + $0x1], 0 }
   0x5   :  { %12 = vsyncpa [#allocation4], 0 }
   0x6   :  { %14 = vsyncpa [#allocation4 + $0x1], 0  ;;  %s937_s12 = smov 0   ;;  %s939_s13 = smov 0  }
   0x7   :  { %s941_s14 = smov 0   ;;  %s943_s15 = smov 0  }
   0x8   :  { %s945_s16 = smov 0   ;;  %s947_s17 = smov 0  }
   0x9 LB: > { %s29_s18 = sadd.s32 1, %s900_s16  ;;  %s65_s19 = sadd.s32 1, %s892_s14  ;;  %s904_s17 = sphi %s947_s17, %s20_s17   ;;  %s900_s16 = sphi %s945_s16, %s1250_s16   ;;  %s896_s15 = sphi %s943_s15, %s1249_s15   ;;  %s892_s14 = sphi %s941_s14, %s1248_s14   ;;  %s888_s13 = sphi %s939_s13, %s1247_s13   ;;  %s884_s12 = sphi %s937_s12, %s1246_s12  }
   0xa   : > { %p30_p0 = scmp.ge.s32.totalorder %s29_s18, 2  ;;  %p72_p1 = scmp.ne.s32.totalorder %s892_s14, %s888_s13 }
   0xb   : > { %p73_p2 = scmp.eq.s32.totalorder %s904_s17, 0  ;;  %p646_p5 = scmp.lt.s32.totalorder %s904_s17, 2 }
   0xc   : > { %s1252_s18 = smov (%p30_p0, %s29_s18), 0  ;;  %s172_s21 = sand.u32 1, %s904_s17  }
   0xd   : > { %1227 = sst [smem:[#allocation12_spill]] %s1252_s18  ;;  %p74_p4 = por %p73_p2, %p72_p1 }
   0xe   : > { %s62_s20 = ssub.s32 %s900_s16, %s1252_s18  ;;  %s174_s22 = sand.u32 1, %s892_s14  }
   0xf   : > { %p63_p6 = scmp.eq.s32.totalorder %s62_s20, 0  ;;  %s615_s23 = sshll.u32 %s900_s16, 11 }
  0x10   : > { %s580_s25 = sshll.u32 %s174_s22, 7  ;;  %s1228_s1 = sld [smem:[#allocation13_spill]] }
  0x11   : > { %s985_s24 = scalar_select %p63_p6, %s892_s14, %s65_s19  }
  0x12   : > { %p994_p7 = pnand %p646_p5, %p74_p4  ;;  %s176_s30 = scalar_lea.vmem [#allocation5], %s580_s25 }
  0x13   : > { %s183_s4 = sshll.u32 %s176_s30, 4  ;;  %s1000_s5 = scalar_lea.sflag [#allocation6], %s172_s21  ;;  %s998_s4 = int_to_ptr.vmem [resolvable:$true] %s183_s4 }
  0x14   : > { %s1229_s29 = scalar_select %p994_p7, 1, 0 }
  0x15   : > { %p1220_p9 = pneg %p994_p7 }
  0x16   : > { %s992_s28 = scalar_lea.hbm %s1228_s1, %s615_s23  ;;  %s735_s9 = scalar_lea.hbm %s1228_s1, 4096 }
  0x17   : > { %s730_s6 = scalar_lea.hbm %s992_s28, 2048  ;;  %p736_p12 = scmp.lt.u32.totalorder %s992_s28, %s1228_s1 }
  0x18   : > { %p731_p8 = scmp.ne.s32.totalorder %s992_s28, %s730_s6  ;;  %p737_p13 = scmp.lt.u32.totalorder %s735_s9, %s730_s6 }
  0x19   : > { %p739_p2 = scmp.lt.u32.totalorder %s730_s6, %s992_s28 }
  0x1a   : > { %p733_p10 = pnand %p1220_p9, %p731_p8  ;;  %p738_p0 = por %p737_p13, %p736_p12 }
  0x1c   : > { %p734_p11 = pneg %p733_p10  ;;  %p740_p4 = por %p739_p2, %p738_p0 }
  0x1e   : > { %p741_p5 = pnand %p740_p4, %p734_p11 }
  0x20   : > { %744 = shalt.err (!%p741_p5)
}
  0x21   : > { %s745_s19 = scalar_lea.vmem %s998_s4, 2048  ;;  %s906_s20 = smov [#allocation5]  }
  0x22   : > { %p746_p6 = scmp.ne.s32.totalorder %s998_s4, %s745_s19  ;;  %s750_s21 = sshll.u32 %s906_s20, 4  ;;  %s751_s21 = int_to_ptr.vmem [resolvable:$false] %s750_s21 }
  0x23   : > { %s752_s23 = scalar_lea.vmem %s751_s21, 4096  ;;  %p753_p3 = scmp.lt.s32.totalorder %s998_s4, %s751_s21 }
  0x24   : > { %p748_p8 = pnand %p746_p6, %p1220_p9  ;;  %p754_p12 = scmp.lt.s32.totalorder %s752_s23, %s745_s19 }
  0x26   : > { %p749_p10 = pneg %p748_p8  ;;  %p755_p13 = por %p754_p12, %p753_p3 }
  0x28   : > { %p756_p0 = pnand %p755_p13, %p749_p10 }
  0x2a   : > { %759 = shalt.err (!%p756_p0)
}
  0x2b   : > { %s907_s25 = smov 128   ;;  %s908_s26 = smov 8  }
  0x2c   : > { %637 = dma.hbm_to_vmem [thread:$0]  (!%p994_p7), %s992_s28, 2048, %s998_s4, %s1000_s5, %s907_s25, %s907_s25, %s908_s26  }
  0x2d   : > { %s1029_s27 = sadd.s32 4294967295, %s904_s17   ;;  %s576_s30 = sadd.s32 4294967294, %s904_s17  }
  0x2e   : > { %p78_p3 = scmp.ne.s32.totalorder %s888_s13, %s884_s12  ;;  %p1219_p11 = scmp.eq.s32.totalorder %s1029_s27, 0 }
  0x2f   : > { %p130_p2 = scmp.eq.s32.totalorder %s1029_s27, 1  ;;  %p136_p4 = scmp.eq.s32.totalorder %s576_s30, 1 }
  0x30   : > { %p577_p5 = scmp.ge.s32.totalorder %s904_s17, 1  ;;  %p1039_p6 = por %p1219_p11, %p78_p3 }
  0x31   : > { %p1046_p8 = por %p130_p2, %p72_p1  ;;  %p1050_p10 = por %p136_p4, %p78_p3 }
  0x32   : > { %s1230_s6 = scalar_select %p1039_p6, 1, 0 }
  0x33   : > { %s1231_s28 = scalar_select %p1046_p8, 1, 0 }
  0x34   : > { %s1232_s4 = scalar_select %p1050_p10, 1, 0 }
  0x35   : > { %p143_p12 = scmp.lt.s32.totalorder %s904_s17, 3  ;;  %s909_s8 = smov [#allocation2]  }
  0x36   : > { %s158_s9 = sshll.u32 %s909_s8, 4  ;;  %s583_s10 = sshll.u32 %s174_s22, 1  ;;  %s1059_s9 = int_to_ptr.vmem [resolvable:$true] %s158_s9 }
  0x37   : > { %p1055_p13 = pnand %p577_p5, %p143_p12  ;;  %s616_s11 = sshll.u32 %s900_s16, 5 }
  0x38   : > { %s1075_s23 = scalar_lea.hbm %s1216_s2, %s616_s11  ;;  %s197_s25 = scalar_lea.vmem [#allocation7], %s583_s10 }
  0x39   : > { %s1233_s7 = scalar_select %p1055_p13, 1, 0 }
  0x3a   : > { %p630_p0 = pneg %p1055_p13  ;;  %s205_s26 = sshll.u32 %s197_s25, 4  ;;  %s1077_s26 = int_to_ptr.vmem [resolvable:$true] %s205_s26 }
  0x3b   : > { %s760_s22 = scalar_lea.hbm %s1214_s0, 128 }
  0x3c   : > { %p1068_p1 = pnand %p630_p0, %p1219_p11  ;;  %p761_p3 = scmp.ne.s32.totalorder %s1214_s0, %s760_s22 }
  0x3d   : > { %p767_p12 = scmp.lt.u32.totalorder %s760_s22, %s1214_s0 }
  0x3e   : > { %p762_p2 = pneg %p1068_p1 }
  0x40   : > { %p763_p4 = pnand %p762_p2, %p761_p3 }
  0x42   : > { %p764_p5 = pneg %p763_p4 }
  0x44   : > { %p769_p0 = pnand %p767_p12, %p764_p5 }
  0x46   : > { %772 = shalt.err (!%p769_p0)
}
  0x47   : > { %s773_s10 = scalar_lea.vmem %s1059_s9, 128  ;;  %p781_p8 = scmp.lt.s32.totalorder %s1059_s9, %s1059_s9 }
  0x48   : > { %p774_p11 = scmp.ne.s32.totalorder %s1059_s9, %s773_s10  ;;  %p782_p6 = scmp.lt.s32.totalorder %s773_s10, %s773_s10 }
  0x4a   : > { %p776_p9 = pnand %p774_p11, %p762_p2  ;;  %p783_p13 = por %p782_p6, %p781_p8 }
  0x4c   : > { %p777_p10 = pneg %p776_p9 }
  0x4e   : > { %p784_p7 = pnand %p783_p13, %p777_p10 }
  0x50   : > { %787 = shalt.err (!%p784_p7)
}
  0x51   : > { %s910_s1 = smov 64   ;;  %s911_s18 = smov 4  }
  0x52   : > { %633 = dma.hbm_to_vmem [thread:$0]  (!%p1068_p1), %s1214_s0, 128, %s1059_s9, [#allocation3], %s910_s1, %s910_s1, %s911_s18  }
  0x53   : > { %s788_s30 = scalar_lea.hbm %s1075_s23, 32  ;;  %p1235_p11 = scmp.ne.s32.totalorder %s1229_s29, 0 }
  0x54   : > { %p789_p9 = scmp.ne.s32.totalorder %s1075_s23, %s788_s30  ;;  %s793_s20 = scalar_lea.hbm %s1216_s2, 64 }
  0x55   : > { %p1236_p6 = pneg %p1235_p11  ;;  %p794_p10 = scmp.lt.u32.totalorder %s1075_s23, %s1216_s2 }
  0x56   : > { %p795_p13 = scmp.lt.u32.totalorder %s793_s20, %s788_s30  ;;  %p797_p2 = scmp.lt.u32.totalorder %s788_s30, %s1075_s23 }
  0x57   : > { %p791_p8 = pnand %p789_p9, %p1236_p6 }
  0x58   : > { %p796_p3 = por %p795_p13, %p794_p10 }
  0x59   : > { %p792_p7 = pneg %p791_p8 }
  0x5a   : > { %p798_p4 = por %p797_p2, %p796_p3 }
  0x5c   : > { %p799_p5 = pnand %p798_p4, %p792_p7 }
  0x5e   : > { %802 = shalt.err (!%p799_p5)
}
  0x5f   : > { %s803_s9 = scalar_lea.vmem %s1077_s26, 32  ;;  %p1237_p12 = pmov %p1236_p6 }
  0x60   : > { %p804_p1 = scmp.ne.s32.totalorder %s1077_s26, %s803_s9  ;;  %s912_s19 = smov [#allocation7]  }
  0x61   : > { %s808_s1 = sshll.u32 %s912_s19, 4  ;;  %s809_s1 = int_to_ptr.vmem [resolvable:$false] %s808_s1 }
  0x62   : > { %p806_p0 = pnand %p804_p1, %p1237_p12  ;;  %s810_s18 = scalar_lea.vmem %s809_s1, 64 }
  0x63   : > { %p811_p6 = scmp.lt.s32.totalorder %s1077_s26, %s809_s1  ;;  %p812_p8 = scmp.lt.s32.totalorder %s810_s18, %s803_s9 }
  0x64   : > { %p807_p9 = pneg %p806_p0 }
  0x65   : > { %p813_p10 = por %p812_p8, %p811_p6 }
  0x67   : > { %p814_p13 = pnand %p813_p10, %p807_p9 }
  0x69   : > { %817 = shalt.err (!%p814_p13)
}
  0x6a   : > { %640 = dma.hbm_to_vmem [thread:$0]  (!%p1235_p11), %s1075_s23, 32, %s1077_s26, %s1000_s5  }
  0x6b   : > { %p1238_p7 = scmp.ne.s32.totalorder %s1233_s7, 0 }
  0x6c   : > { %p1239_p3 = scmp.eq.s32.totalorder (!%p1238_p7), %s1029_s27, 0 }
  0x6d   : > { %214 = sbr.rel (%p1238_p7) target bundleno = 389 (0x185), region = 32 }
  0x74   : > { %871 = dma.done.wait (%p1239_p3), [#allocation3], 128   ;;  %p1240_p2 = pmov %p1239_p3 }
  0x75   : > { %s220_s11 = sand.u32 1, %s1029_s27   ;;  %s1132_s25 = sand.u32 1, %s888_s13  }
  0x76   : > { %873 = vsyncadd (%p1240_p2), [#allocation3], 4294967168  ;;  %s588_s29 = sshll.u32 %s1132_s25, 7  ;;  %s221_s30 = scalar_lea.sflag [#allocation6], %s220_s11 }
  0x77   : > { %s1135_s8 = scalar_lea.vmem [#allocation5], %s588_s29  ;;  %p1241_p11 = scmp.ne.s32.totalorder %s1230_s6, 0 }
  0x79   : > { %875 = dma.done.wait (%p1241_p11), %s221_s30, 2080  }
  0x7a   : > { %877 = vsyncadd (%p1241_p11), %s221_s30, 4294965216  ;;  %v913_v0 = vmov 0   ;;  %v705_v1 = vld [vmem:[%s1135_s8 + $0x4] ss:$8 sps:$4 sm:$0xff]   ;;  %v707_v2 = vld [vmem:[%s1135_s8] ss:$8 sps:$4 sm:$0xff]   ;;  %v284_v18 = vlaneseq }
  0x7b   : > { %412 = vmatprep.mubr.bf16.mxu0 %v913_v0  ;;  %380 = vmatprep.subr.bf16.mxu0 %v705_v1  ;;  %v708_v3 = vld [vmem:[%s1135_s8 + $0x14] ss:$8 sps:$4 sm:$0xff]   ;;  %v710_v4 = vld [vmem:[%s1135_s8 + $0x10] ss:$8 sps:$4 sm:$0xff]   ;;  %v711_v5 = vld [vmem:[%s1135_s8 + $0x24] ss:$8 sps:$4 sm:$0xff]  }
  0x7c   : > { %381 = vmatpush1.bf16.msra.mxu0 %v707_v2  ;;  %v713_v6 = vld [vmem:[%s1135_s8 + $0x20] ss:$8 sps:$4 sm:$0xff]   ;;  %v714_v7 = vld [vmem:[%s1135_s8 + $0x34] ss:$8 sps:$4 sm:$0xff]   ;;  %v716_v8 = vld [vmem:[%s1135_s8 + $0x30] ss:$8 sps:$4 sm:$0xff]  }
  0x7d   : > { %382 = vmatprep.subr.bf16.mxu0 %v708_v3  ;;  %v717_v9 = vld [vmem:[%s1135_s8 + $0x44] ss:$8 sps:$4 sm:$0xff]   ;;  %v719_v10 = vld [vmem:[%s1135_s8 + $0x40] ss:$8 sps:$4 sm:$0xff]   ;;  %v720_v11 = vld [vmem:[%s1135_s8 + $0x54] ss:$8 sps:$4 sm:$0xff]  }
  0x7e   : > { %v722_v12 = vld [vmem:[%s1135_s8 + $0x50] ss:$8 sps:$4 sm:$0xff]   ;;  %v723_v13 = vld [vmem:[%s1135_s8 + $0x64] ss:$8 sps:$4 sm:$0xff]   ;;  %v725_v14 = vld [vmem:[%s1135_s8 + $0x60] ss:$8 sps:$4 sm:$0xff]  }
  0x7f   : > { %v726_v15 = vld [vmem:[%s1135_s8 + $0x74] ss:$8 sps:$4 sm:$0xff]   ;;  %v728_v16 = vld [vmem:[%s1135_s8 + $0x70] ss:$8 sps:$4 sm:$0xff]   ;;  %s589_s5 = sshll.u32 %s1132_s25, 1  ;;  %v285_v19 = vshrl.u32 %v284_v18, 7 }
  0x80   : > { %383 = vmatpush1.bf16.msra.mxu0 %v710_v4  ;;  %v729_v17 = vld [vmem:[#allocation2] sm:$0xff]   ;;  %s233_s27 = scalar_lea.vmem [#allocation7], %s589_s5  ;;  %s590_s6 = sshll.u32 %s1132_s25, 4  ;;  %vm435_vm0 = vcmask 1043456   ;;  %vm436_vm1 = vcmask 523268  }
  0x81   : > { %384 = vmatprep.subr.bf16.mxu0 %v711_v5  ;;  %v286_v20 = vsub.s32 0, %v285_v19  ;;  %v282_v21 = vld [vmem:[%s233_s27] sm:$0x3]  ;;  %v290_v22 = vsub.s32 1, %v285_v19  ;;  %s619_s7 = sshll.u32 %s896_s15, 8  ;;  %s260_s23 = scalar_lea.vmem [#allocation8], %s590_s6  ;;  %vm437_vm2 = vmor %vm436_vm1, %vm435_vm0 }
  0x82   : > { %s457_s26 = sshll.u32 %s260_s23, 4  ;;  %s1163_s21 = scalar_lea.hbm %s1217_s3, %s619_s7  ;;  %s1165_s26 = int_to_ptr.vmem [resolvable:$true] %s457_s26 }
  0x83   : > { %v287_v23 = vrot.slane %v282_v21, %v286_v20  ;;  %v291_v24 = vrot.slane %v282_v21, %v290_v22  ;;  %s441_s15 = scalar_lea.sflag [#allocation4], %s1132_s25  ;;  %s818_s10 = scalar_lea.vmem %s1165_s26, 256 }
  0x84   : > { %385 = vmatpush1.bf16.msra.mxu0 %v713_v6  ;;  %p819_p4 = scmp.ne.s32.totalorder %s1165_s26, %s818_s10  ;;  %p1242_p5 = scmp.ne.s32.totalorder %s1231_s28, 0 }
  0x85   : > { %386 = vmatprep.subr.bf16.mxu0 %v714_v7  ;;  %s914_s9 = smov [#allocation8]  }
  0x86   : > { %p820_p1 = pnand %p819_p4, %p1242_p5  ;;  %s822_s19 = sshll.u32 %s914_s9, 4  ;;  %s823_s19 = int_to_ptr.vmem [resolvable:$false] %s822_s19 }
  0x87   : > { %s824_s1 = scalar_lea.vmem %s823_s19, 512  ;;  %p825_p0 = scmp.lt.s32.totalorder %s1165_s26, %s823_s19 }
  0x88   : > { %387 = vmatpush1.bf16.msra.mxu0 %v716_v8  ;;  %p821_p12 = pneg %p820_p1  ;;  %p826_p9 = scmp.lt.s32.totalorder %s824_s1, %s818_s10 }
  0x89   : > { %388 = vmatprep.subr.bf16.mxu0 %v717_v9 }
  0x8a   : > { %p827_p6 = por %p826_p9, %p825_p0 }
  0x8c   : > { %389 = vmatpush1.bf16.msra.mxu0 %v719_v10  ;;  %p828_p8 = pnand %p827_p6, %p821_p12 }
  0x8d   : > { %390 = vmatprep.subr.bf16.mxu0 %v720_v11 }
  0x90   : > { %391 = vmatpush1.bf16.msra.mxu0 %v722_v12 }
  0x91   : > { %392 = vmatprep.subr.bf16.mxu0 %v723_v13 }
  0x94   : > { %393 = vmatpush1.bf16.msra.mxu0 %v725_v14 }
  0x95   : > { %394 = vmatprep.subr.bf16.mxu0 %v726_v15 }
  0x98   : > { %395 = vmatpush1.bf16.msra.mxu0 %v728_v16 }
  0x9b   : > { %413 = vmatmul.mubr.bf16.vlgmr.msra.gmra.mrb[0].mxu0 %v729_v17 }
 0x16e   : > { %v414_v25 = vpop.f32.mrb[0].mxu0 }
 0x16f   : > { %v415_v26 = vadd.f32 %v414_v25, %v287_v23  ;;  %v416_v27 = vpop.f32.mrb[1].mxu0 }
 0x170   : > { %v417_v28 = vadd.f32 %v416_v27, %v291_v24  ;;  %v418_v29 = vpop.f32.mrb[2].mxu0 }
 0x171   : > { %v419_v30 = vadd.f32 %v418_v29, %v287_v23  ;;  %v420_v31 = vpop.f32.mrb[3].mxu0 }
 0x172   : > { %v617_v32 = vpack.c.bf16 %v417_v28, %v415_v26  ;;  %v421_v33 = vadd.f32 %v420_v31, %v291_v24 }
 0x174   : > { %438 = vst.msk [vmem:[%s260_s23] sm:$0xff] %vm437_vm2, %v617_v32  ;;  %v618_v34 = vpack.c.bf16 %v421_v33, %v419_v30 }
 0x176   : > { %439 = vst.msk [vmem:[%s260_s23 + $0x8] sm:$0xff] %vm437_vm2, %v618_v34 }
 0x177   : > { %831 = shalt.err (!%p828_p8)
}
 0x178   : > { %s832_s18 = scalar_lea.hbm %s1163_s21, 256  ;;  %s836_s30 = scalar_lea.hbm %s1217_s3, 512 }
 0x179   : > { %p833_p10 = scmp.ne.s32.totalorder %s1163_s21, %s832_s18  ;;  %p837_p3 = scmp.lt.u32.totalorder %s1163_s21, %s1217_s3 }
 0x17a   : > { %p838_p2 = scmp.lt.u32.totalorder %s836_s30, %s832_s18  ;;  %p840_p4 = scmp.lt.u32.totalorder %s832_s18, %s1163_s21 }
 0x17b   : > { %p834_p13 = pnand %p833_p10, %p1242_p5 }
 0x17c   : > { %p839_p11 = por %p838_p2, %p837_p3 }
 0x17d   : > { %p835_p7 = pneg %p834_p13 }
 0x17e   : > { %p841_p1 = por %p840_p4, %p839_p11 }
 0x180   : > { %p842_p12 = pnand %p841_p1, %p835_p7 }
 0x182   : > { %845 = shalt.err (!%p842_p12)
}
 0x183   : > { %s915_s27 = smov 128   ;;  %s916_s6 = smov 8  }
 0x184   : > { %628 = dma.vmem_to_hbm [thread:$0]  (%p1242_p5), %s1165_s26, 256, %s1163_s21, %s441_s15, %s915_s27, %s915_s27, %s916_s6  }
 0x185 PF: > { %s472_s7 = sand.u32 1, %s884_s12   ;;  %p1243_p0 = scmp.ne.s32.totalorder %s1232_s4, 0 }
 0x186   : > { %p1244_p9 = scmp.ge.s32.totalorder %s904_s17, 2  ;;  %s473_s23 = scalar_lea.sflag [#allocation4], %s472_s7 }
 0x188   : > { %p642_p6 = pnand %p1244_p9, %p1243_p0 }
 0x18a   : > { %879 = dma.done.wait (!%p642_p6), %s473_s23, 256  }
 0x18b   : > { %881 = vsyncadd (!%p642_p6), %s473_s23, 4294967040  ;;  %s20_s17 = sadd.s32 1, %s904_s17   ;;  %s1245_s28 = sld [smem:[#allocation12_spill]] }
 0x18c   : > { %p17_p8 = scmp.ge.s32.totalorder %s20_s17, 4   ;;  %s1246_s12 = smov %s888_s13 }
 0x18d   : > { %s1247_s13 = smov %s892_s14  ;;  %s1248_s14 = smov %s985_s24 }
 0x18e   : > { %s1249_s15 = smov %s900_s16  ;;  %19 = sbr.rel (!%p17_p8) target bundleno = 9 (0x9), region = 94 }
 0x191   : > { %s1250_s16 = smov %s1245_s28 }
 0x195   :  { %478 = vsyncpa [#allocation3], 1 }
 0x196   :  { %480 = vsyncpa [#allocation3 + $0x1], 1 }
 0x197   :  { %481 = vsyncpa [#allocation6], 1 }
 0x198   :  { %483 = vsyncpa [#allocation6 + $0x1], 1 }
 0x199   :  { %484 = vsyncpa [#allocation4], 1 }
 0x19a   :  { %486 = vsyncpa [#allocation4 + $0x1], 1 }

// kernel: nbert_pretrain_forward.12
= control target key start
LH: loop header
LB: loop body
LE: loop exit
PB: predicated region body
PF: predicated region fallthrough
CT: control target
= control target key end

     0   :  { %s1146_s0 = inlined_call_operand.hbm [shape: f32[2,8,128], index: 0, kind: input, shape index: {}]   ;;  %s1147_s1 = inlined_call_operand.hbm [shape: f32[8,128], index: 1, kind: input, shape index: {}]   ;;  %s1148_s2 = inlined_call_operand.hbm [shape: f32[2,8,128], index: 2, kind: input, shape index: {}]   ;;  %s1149_s3 = inlined_call_operand.hbm [shape: f32[1,128], index: 3, kind: input, shape index: {}]   ;;  %s1150_s4 = inlined_call_operand.hbm [shape: f32[1,128], index: 4, kind: input, shape index: {}]   ;;  %s1151_s5 = inlined_call_operand.hbm [shape: bf16[2,8,128], index: 5, kind: output, shape index: {}]  }
   0x1   :  { %1166 = sst [smem:[#allocation22_spill]] %s1146_s0 }
   0x2   :  { %1167 = sst [smem:[#allocation23_spill]] %s1147_s1 }
   0x3   :  { %10 = vsyncpa [#allocation3], 0 }
   0x4   :  { %12 = vsyncpa [#allocation3 + $0x1], 0 }
   0x5   :  { %13 = vsyncpa [#allocation6], 0 }
   0x6   :  { %14 = vsyncpa [#allocation10], 0 }
   0x7   :  { %15 = vsyncpa [#allocation4], 0 }
   0x8   :  { %17 = vsyncpa [#allocation4 + $0x1], 0  ;;  %s851_s18 = smov 0   ;;  %s853_s19 = smov 0  }
   0x9   :  { %s855_s20 = smov 0   ;;  %s857_s21 = smov 0  }
   0xa LB: > { %1168 = sst [smem:[#allocation18_spill]] %s809_s20  ;;  %s872_s22 = sadd.s32 4294967295, %s813_s21   ;;  %s813_s21 = sphi %s857_s21, %s1203_s21   ;;  %s809_s20 = sphi %s855_s20, %s1205_s20   ;;  %s805_s19 = sphi %s853_s19, %s1207_s19   ;;  %s801_s18 = sphi %s851_s18, %s1206_s18  }
   0xb   : > { %s480_s23 = sadd.s32 4294967294, %s813_s21   ;;  %p43_p0 = scmp.ne.s32.totalorder %s805_s19, %s801_s18 }
   0xc   : > { %p1152_p1 = scmp.eq.s32.totalorder %s872_s22, 0  ;;  %p162_p3 = scmp.eq.s32.totalorder %s480_s23, 1 }
   0xd   : > { %p481_p5 = scmp.ge.s32.totalorder %s813_s21, 1  ;;  %p169_p7 = scmp.lt.s32.totalorder %s813_s21, 3 }
   0xe   : > { %p881_p4 = por %p1152_p1, %p43_p0  ;;  %p886_p6 = por %p162_p3, %p43_p0 }
   0xf   : > { %p891_p8 = pnand %p481_p5, %p169_p7  ;;  %s815_s27 = smov [#allocation5]  }
  0x10   : > { %s1169_s24 = scalar_select %p881_p4, 1, 0 }
  0x11   : > { %s1170_s25 = scalar_select %p886_p6, 1, 0 }
  0x12   : > { %s1172_s26 = scalar_select %p891_p8, 1, 0 }
  0x13   : > { %1171 = sst [smem:[#allocation19_spill]] %s1170_s25  ;;  %s182_s28 = sshll.u32 %s815_s27, 4  ;;  %s183_s28 = int_to_ptr.vmem [resolvable:$true] %s182_s28 }
  0x14   : > { %p521_p10 = pneg %p891_p8  ;;  %s899_s29 = sadd.s32 1, %s813_s21  }
  0x15   : > { %1173 = sst [smem:[#allocation20_spill]] %s899_s29  ;;  %s27_s6 = ssub.s32 %s813_s21, %s899_s29 }
  0x16   : > { %p903_p11 = pnand %p521_p10, %p1152_p1  ;;  %p909_p12 = scmp.eq.s32.totalorder %s27_s6, 0 }
  0x17   : > { %s30_s8 = sadd.s32 1, %s809_s20  ;;  %s1176_s1 = sld [smem:[#allocation23_spill]] }
  0x18   : > { %s1174_s30 = scalar_select %p903_p11, 1, 0 }
  0x19   : > { %s1175_s7 = scalar_select %p909_p12, 1, 0 }
  0x1a   : > { %p924_p3 = pneg %p903_p11 }
  0x1d   : > { %s587_s11 = scalar_lea.hbm %s1176_s1, 128 }
  0x1e   : > { %p588_p0 = scmp.ne.s32.totalorder %s1176_s1, %s587_s11  ;;  %p594_p10 = scmp.lt.u32.totalorder %s587_s11, %s1176_s1 }
  0x20   : > { %p590_p5 = pnand %p924_p3, %p588_p0 }
  0x22   : > { %p591_p7 = pneg %p590_p5 }
  0x24   : > { %p596_p9 = pnand %p594_p10, %p591_p7 }
  0x26   : > { %599 = shalt.err (!%p596_p9)
}
  0x27   : > { %s600_s17 = scalar_lea.vmem %s183_s28, 128  ;;  %p608_p6 = scmp.lt.s32.totalorder %s183_s28, %s183_s28 }
  0x28   : > { %p601_p1 = scmp.ne.s32.totalorder %s183_s28, %s600_s17  ;;  %p609_p4 = scmp.lt.s32.totalorder %s600_s17, %s600_s17 }
  0x2a   : > { %p603_p2 = pnand %p601_p1, %p924_p3  ;;  %p610_p8 = por %p609_p4, %p608_p6 }
  0x2c   : > { %p604_p13 = pneg %p603_p2 }
  0x2e   : > { %p611_p12 = pnand %p610_p8, %p604_p13 }
  0x30   : > { %614 = shalt.err (!%p611_p12)
}
  0x31   : > { %524 = dma.hbm_to_vmem [thread:$0]  (!%p903_p11), %s1176_s1, 128, %s183_s28, [#allocation6]  }
  0x32   : > { %p1178_p1 = scmp.ne.s32.totalorder %s1175_s7, 0  ;;  %p38_p2 = scmp.eq.s32.totalorder %s813_s21, 0 }
  0x33   : > { %p1180_p4 = scmp.ne.s32.totalorder %s809_s20, %s805_s19  ;;  %p1181_p6 = scmp.eq.s32.totalorder %s872_s22, 1 }
  0x34   : > { %s943_s6 = scalar_select %p1178_p1, %s809_s20, %s30_s8  }
  0x35   : > { %p951_p8 = por %p1181_p6, %p1180_p4  ;;  %p545_p9 = scmp.lt.s32.totalorder %s813_s21, 2 }
  0x36   : > { %1179 = sst [smem:[#allocation21_spill]] %s943_s6  ;;  %s215_s10 = sand.u32 1, %s813_s21  }
  0x37   : > { %s1182_s9 = scalar_select %p951_p8, 1, 0 }
  0x38   : > { %p1183_p12 = pmov %p1180_p4  ;;  %s217_s11 = sand.u32 1, %s809_s20  }
  0x39   : > { %s1155_s12 = sshll.u32 %s813_s21, 7  ;;  %s962_s13 = sshll.u32 %s217_s11, 3 }
  0x3a   : > { %p39_p13 = por %p38_p2, %p1183_p12  ;;  %s1184_s0 = sld [smem:[#allocation22_spill]] }
  0x3b   : > { %s219_s16 = scalar_lea.vmem [#allocation2], %s962_s13  ;;  %s978_s23 = scalar_lea.sflag [#allocation3], %s215_s10 }
  0x3c   : > { %p971_p0 = pnand %p545_p9, %p39_p13  ;;  %s226_s17 = sshll.u32 %s219_s16, 4  ;;  %s976_s17 = int_to_ptr.vmem [resolvable:$true] %s226_s17 }
  0x3e   : > { %s1185_s15 = scalar_select %p971_p0, 1, 0 }
  0x3f   : > { %p1163_p7 = pneg %p971_p0 }
  0x40   : > { %s969_s8 = scalar_lea.hbm %s1184_s0, %s1155_s12  ;;  %s620_s7 = scalar_lea.hbm %s1184_s0, 256 }
  0x41   : > { %s615_s27 = scalar_lea.hbm %s969_s8, 128  ;;  %p621_p2 = scmp.lt.u32.totalorder %s969_s8, %s1184_s0 }
  0x42   : > { %p616_p5 = scmp.ne.s32.totalorder %s969_s8, %s615_s27  ;;  %p622_p4 = scmp.lt.u32.totalorder %s620_s7, %s615_s27 }
  0x43   : > { %p624_p9 = scmp.lt.u32.totalorder %s615_s27, %s969_s8 }
  0x44   : > { %p618_p10 = pnand %p1163_p7, %p616_p5  ;;  %p623_p6 = por %p622_p4, %p621_p2 }
  0x46   : > { %p619_p1 = pneg %p618_p10  ;;  %p625_p12 = por %p624_p9, %p623_p6 }
  0x48   : > { %p626_p13 = pnand %p625_p12, %p619_p1 }
  0x4a   : > { %629 = shalt.err (!%p626_p13)
}
  0x4b   : > { %s630_s10 = scalar_lea.vmem %s976_s17, 128  ;;  %s816_s16 = smov [#allocation2]  }
  0x4c   : > { %p631_p5 = scmp.ne.s32.totalorder %s976_s17, %s630_s10  ;;  %s635_s11 = sshll.u32 %s816_s16, 4  ;;  %s636_s11 = int_to_ptr.vmem [resolvable:$false] %s635_s11 }
  0x4d   : > { %s637_s1 = scalar_lea.vmem %s636_s11, 256  ;;  %p638_p11 = scmp.lt.s32.totalorder %s976_s17, %s636_s11 }
  0x4e   : > { %p633_p10 = pnand %p631_p5, %p1163_p7  ;;  %p639_p2 = scmp.lt.s32.totalorder %s637_s1, %s630_s10 }
  0x50   : > { %p634_p8 = pneg %p633_p10  ;;  %p640_p4 = por %p639_p2, %p638_p11 }
  0x52   : > { %p641_p6 = pnand %p640_p4, %p634_p8 }
  0x54   : > { %644 = shalt.err (!%p641_p6)
}
  0x55   : > { %534 = dma.hbm_to_vmem [thread:$0]  (!%p971_p0), %s969_s8, 128, %s976_s17, %s978_s23  }
  0x56   : > { %s1186_s12 = sshll.u32 %s813_s21, 7  ;;  %s817_s16 = smov [#allocation8]  }
  0x57   : > { %s1011_s7 = scalar_lea.hbm %s1148_s2, %s1186_s12  ;;  %s193_s11 = sshll.u32 %s817_s16, 4  ;;  %s194_s11 = int_to_ptr.vmem [resolvable:$true] %s193_s11 }
  0x58   : > { %s818_s10 = smov [#allocation9]   ;;  %s645_s20 = scalar_lea.hbm %s1149_s3, 16 }
  0x59   : > { %s204_s1 = sshll.u32 %s818_s10, 4  ;;  %p646_p11 = scmp.ne.s32.totalorder %s1149_s3, %s645_s20  ;;  %s205_s1 = int_to_ptr.vmem [resolvable:$true] %s204_s1 }
  0x5a   : > { %p652_p9 = scmp.lt.u32.totalorder %s645_s20, %s1149_s3 }
  0x5b   : > { %p648_p8 = pnand %p646_p11, %p924_p3 }
  0x5d   : > { %p649_p1 = pneg %p648_p8 }
  0x5f   : > { %p654_p12 = pnand %p652_p9, %p649_p1 }
  0x61   : > { %657 = shalt.err (!%p654_p12)
}
  0x62   : > { %s658_s12 = scalar_lea.vmem %s194_s11, 16  ;;  %s665_s0 = scalar_lea.vmem %s194_s11, 32 }
  0x63   : > { %p659_p13 = scmp.ne.s32.totalorder %s194_s11, %s658_s12  ;;  %p666_p2 = scmp.lt.s32.totalorder %s194_s11, %s194_s11 }
  0x64   : > { %p667_p4 = scmp.lt.s32.totalorder %s665_s0, %s658_s12 }
  0x65   : > { %p661_p5 = pnand %p659_p13, %p924_p3 }
  0x66   : > { %p668_p6 = por %p667_p4, %p666_p2 }
  0x67   : > { %p662_p10 = pneg %p661_p5 }
  0x69   : > { %p669_p7 = pnand %p668_p6, %p662_p10 }
  0x6b   : > { %672 = shalt.err (!%p669_p7)
}
  0x6c   : > { %p1187_p11 = scmp.ne.s32.totalorder %s1174_s30, 0  ;;  %s237_s20 = scalar_lea.vmem [#allocation7], %s962_s13 }
  0x6d   : > { %s244_s6 = sshll.u32 %s237_s20, 4  ;;  %s673_s16 = scalar_lea.hbm %s1150_s4, 16  ;;  %s245_s6 = int_to_ptr.vmem [resolvable:$true] %s244_s6 }
  0x6e   : > { %527 = dma.hbm_to_vmem [thread:$0]  (!%p1187_p11), %s1149_s3, 16, %s194_s11, [#allocation6]  }
  0x6f   : > { %p674_p8 = scmp.ne.s32.totalorder %s1150_s4, %s673_s16  ;;  %p680_p9 = scmp.lt.u32.totalorder %s673_s16, %s1150_s4 }
  0x71   : > { %p676_p7 = pnand %p674_p8, %p924_p3 }
  0x73   : > { %p677_p1 = pneg %p676_p7 }
  0x75   : > { %p682_p12 = pnand %p680_p9, %p677_p1 }
  0x77   : > { %685 = shalt.err (!%p682_p12)
}
  0x78   : > { %s686_s11 = scalar_lea.vmem %s205_s1, 16  ;;  %s693_s13 = scalar_lea.vmem %s205_s1, 32 }
  0x79   : > { %p687_p13 = scmp.ne.s32.totalorder %s205_s1, %s686_s11  ;;  %p694_p2 = scmp.lt.s32.totalorder %s205_s1, %s205_s1 }
  0x7a   : > { %p695_p4 = scmp.lt.s32.totalorder %s693_s13, %s686_s11 }
  0x7b   : > { %p689_p5 = pnand %p687_p13, %p924_p3 }
  0x7c   : > { %p696_p6 = por %p695_p4, %p694_p2 }
  0x7d   : > { %p690_p10 = pneg %p689_p5 }
  0x7f   : > { %p697_p0 = pnand %p696_p6, %p690_p10 }
  0x81   : > { %700 = shalt.err (!%p697_p0)
}
  0x82   : > { %530 = dma.hbm_to_vmem [thread:$0]  (!%p1187_p11), %s1150_s4, 16, %s205_s1, [#allocation10]  }
  0x83   : > { %s701_s14 = scalar_lea.hbm %s1011_s7, 128  ;;  %p1188_p8 = scmp.ne.s32.totalorder %s1185_s15, 0 }
  0x84   : > { %p702_p3 = scmp.ne.s32.totalorder %s1011_s7, %s701_s14  ;;  %s706_s30 = scalar_lea.hbm %s1148_s2, 256 }
  0x85   : > { %p1189_p7 = pneg %p1188_p8  ;;  %p707_p0 = scmp.lt.u32.totalorder %s1011_s7, %s1148_s2 }
  0x86   : > { %p708_p12 = scmp.lt.u32.totalorder %s706_s30, %s701_s14  ;;  %p710_p5 = scmp.lt.u32.totalorder %s701_s14, %s1011_s7 }
  0x87   : > { %p704_p1 = pnand %p702_p3, %p1189_p7 }
  0x88   : > { %p709_p13 = por %p708_p12, %p707_p0 }
  0x89   : > { %p705_p9 = pneg %p704_p1 }
  0x8a   : > { %p711_p10 = por %p710_p5, %p709_p13 }
  0x8c   : > { %p712_p11 = pnand %p711_p10, %p705_p9 }
  0x8e   : > { %715 = shalt.err (!%p712_p11)
}
  0x8f   : > { %s716_s1 = scalar_lea.vmem %s245_s6, 128  ;;  %p1190_p4 = pmov %p1189_p7 }
  0x90   : > { %p717_p2 = scmp.ne.s32.totalorder %s245_s6, %s716_s1  ;;  %s819_s16 = smov [#allocation7]  }
  0x91   : > { %s721_s10 = sshll.u32 %s819_s16, 4  ;;  %s722_s10 = int_to_ptr.vmem [resolvable:$false] %s721_s10 }
  0x92   : > { %p719_p6 = pnand %p717_p2, %p1190_p4  ;;  %s723_s8 = scalar_lea.vmem %s722_s10, 256 }
  0x93   : > { %p724_p7 = scmp.lt.s32.totalorder %s245_s6, %s722_s10  ;;  %p725_p1 = scmp.lt.s32.totalorder %s723_s8, %s716_s1 }
  0x94   : > { %p720_p3 = pneg %p719_p6 }
  0x95   : > { %p726_p0 = por %p725_p1, %p724_p7 }
  0x97   : > { %p727_p12 = pnand %p726_p0, %p720_p3 }
  0x99   : > { %730 = shalt.err (!%p727_p12)
}
  0x9a   : > { %537 = dma.hbm_to_vmem [thread:$0]  (!%p1188_p8), %s1011_s7, 128, %s245_s6, %s978_s23  }
  0x9b   : > { %p1191_p9 = scmp.ne.s32.totalorder %s1172_s26, 0 }
  0x9c   : > { %s255_s17 = sand.u32 (!%p1191_p9), 1, %s872_s22   ;;  %s1074_s12 = sand.u32 (!%p1191_p9), 1, %s805_s19  }
  0x9d   : > { %253 = sbr.rel (%p1191_p9) target bundleno = 509 (0x1fd), region = 40  ;;  %s491_s11 = sshll.u32 (!%p1191_p9), %s1074_s12, 3 }
  0x9e   : > { %s256_s13 = scalar_lea.sflag (!%p1191_p9), [#allocation3], %s255_s17  ;;  %s259_s0 = scalar_lea.vmem (!%p1191_p9), [#allocation2], %s491_s11 }
  0x9f   : > { %p1192_p13 = scmp.ne.s32.totalorder (!%p1191_p9), %s1169_s24, 0 }
  0xa4   : > { %776 = dma.done.wait (%p1192_p13), %s256_s13, 128  }
  0xa5   : > { %778 = vsyncadd (%p1192_p13), %s256_s13, 4294967168  ;;  %p1193_p8 = scmp.eq.s32.totalorder %s872_s22, 0 }
  0xa7   : > { %780 = dma.done.wait (%p1193_p8), [#allocation6], 128   ;;  %p1194_p5 = pmov %p1193_p8 }
  0xa8   : > { %s272_s26 = scalar_lea.vmem [#allocation7], %s491_s11 }
  0xa9   : > { %782 = vsyncadd (%p1194_p5), [#allocation6], 4294967168 }
  0xaa   : > { %784 = dma.done.wait (%p1192_p13), %s256_s13, 128  }
  0xab   : > { %786 = vsyncadd (%p1192_p13), %s256_s13, 4294967168  ;;  %p1195_p10 = pmov %p1194_p5 }
  0xac   : > { %p1196_p11 = pmov %p1194_p5 }
  0xad   : > { %788 = dma.done.wait (%p1195_p10), [#allocation6], 16  }
  0xae   : > { %790 = vsyncadd (%p1196_p11), [#allocation6], 4294967280  ;;  %p1197_p2 = pmov %p1194_p5 }
  0xb0   : > { %792 = dma.done.wait (%p1197_p2), [#allocation10], 16   ;;  %p1198_p4 = pmov %p1197_p2 }
  0xb1   : > { %v312_v0 = vld [vmem:[%s259_s0] sm:$0xff]  ;;  %v313_v1 = vld [vmem:[#allocation5] sm:$0xff]  ;;  %v315_v2 = vld [vmem:[%s272_s26] sm:$0xff]  ;;  %s496_s24 = sshll.u32 %s1074_s12, 2  ;;  %s500_s15 = sshll.u32 %s872_s22, 6 }
  0xb2   : > { %794 = vsyncadd (%p1198_p4), [#allocation10], 4294967280  ;;  %v314_v3 = vadd.f32 %v313_v1, %v312_v0  ;;  %v497_v13 = vld [vmem:[#allocation8] ss:$0 sm:$0xff]  ;;  %v498_v15 = vld [vmem:[#allocation9] ss:$0 sm:$0xff]  ;;  %s1102_s14 = scalar_lea.hbm %s1151_s5, %s500_s15 }
  0xb3   : > { %s311_s23 = scalar_lea.vmem [#allocation11], %s496_s24  ;;  %s348_s29 = scalar_lea.sflag [#allocation4], %s1074_s12 }
  0xb4   : > { %v316_v4 = vadd.f32 %v315_v2, %v314_v3  ;;  %s361_s7 = sshll.u32 %s311_s23, 4  ;;  %p1199_p3 = scmp.ne.s32.totalorder %s1182_s9, 0  ;;  %s1104_s7 = int_to_ptr.vmem [resolvable:$true] %s361_s7 }
  0xb5   : > { %s731_s20 = scalar_lea.vmem %s1104_s7, 64  ;;  %s820_s22 = smov [#allocation11]  }
  0xb6   : > { %319 = vadd.xlane.f32.xlu0 %v316_v4  ;;  %p732_p6 = scmp.ne.s32.totalorder %s1104_s7, %s731_s20  ;;  %s735_s30 = sshll.u32 %s820_s22, 4  ;;  %s736_s30 = int_to_ptr.vmem [resolvable:$false] %s735_s30 }
  0xb7   : > { %s737_s27 = scalar_lea.vmem %s736_s30, 128  ;;  %p738_p0 = scmp.lt.s32.totalorder %s1104_s7, %s736_s30 }
  0xb8   : > { %p733_p7 = pnand %p732_p6, %p1199_p3  ;;  %p739_p12 = scmp.lt.s32.totalorder %s737_s27, %s731_s20 }
  0xba   : > { %p734_p1 = pneg %p733_p7  ;;  %p740_p9 = por %p739_p12, %p738_p0 }
  0xbc   : > { %p741_p13 = pnand %p740_p9, %p734_p1 }
 0x143   : > { %v320_v5 = vpop.xlane.xlu0 %319 }
 0x144   : > { %v322_v6 = vmul.f32 0.0078125, %v320_v5 }
 0x146   : > { %v323_v7 = vsub.f32 %v316_v4, %v322_v6 }
 0x148   : > { %v324_v8 = vmul.f32 %v323_v7, %v323_v7 }
 0x14a   : > { %325 = vadd.xlane.f32.xlu0 %v324_v8 }
 0x1d7   : > { %v326_v9 = vpop.xlane.xlu0 %325 }
 0x1d8   : > { %v327_v10 = vmul.f32 0.0078125, %v326_v9 }
 0x1da   : > { %v328_v11 = vadd.f32 1e-12, %v327_v10 }
 0x1dc   : > { %585 = vrsqrt.f32 %v328_v11 }
 0x1e6   : > { %v586_v12 = vpop.eup %585 }
 0x1e7   : > { %v330_v14 = vmul.f32 %v586_v12, %v323_v7 }
 0x1e9   : > { %v337_v16 = vmul.f32 %v497_v13, %v330_v14 }
 0x1eb   : > { %v344_v17 = vadd.f32 %v498_v15, %v337_v16 }
 0x1ed   : > { %v345_v18 = vpack.c.bf16 %v344_v17, %v344_v17 }
 0x1ef   : > { %346 = vst [vmem:[%s311_s23] sm:$0xf] %v345_v18 }
 0x1f0   : > { %744 = shalt.err (!%p741_p13)
}
 0x1f1   : > { %s745_s28 = scalar_lea.hbm %s1102_s14, 64  ;;  %s749_s10 = scalar_lea.hbm %s1151_s5, 128 }
 0x1f2   : > { %p746_p8 = scmp.ne.s32.totalorder %s1102_s14, %s745_s28  ;;  %p750_p11 = scmp.lt.u32.totalorder %s1102_s14, %s1151_s5 }
 0x1f3   : > { %p751_p2 = scmp.lt.u32.totalorder %s749_s10, %s745_s28  ;;  %p753_p6 = scmp.lt.u32.totalorder %s745_s28, %s1102_s14 }
 0x1f4   : > { %p747_p5 = pnand %p746_p8, %p1199_p3 }
 0x1f5   : > { %p752_p4 = por %p751_p2, %p750_p11 }
 0x1f6   : > { %p748_p10 = pneg %p747_p5 }
 0x1f7   : > { %p754_p7 = por %p753_p6, %p752_p4 }
 0x1f9   : > { %p755_p1 = pnand %p754_p7, %p748_p10 }
 0x1fb   : > { %758 = shalt.err (!%p755_p1)
}
 0x1fc   : > { %519 = dma.vmem_to_hbm [thread:$0]  (%p1199_p3), %s1104_s7, 64, %s1102_s14, %s348_s29  }
 0x1fd PF: > { %s1200_s12 = sld [smem:[#allocation19_spill]]  ;;  %s373_s11 = sand.u32 1, %s801_s18  }
 0x1fe   : > { %p1202_p12 = scmp.ge.s32.totalorder %s813_s21, 2  ;;  %s374_s13 = scalar_lea.sflag [#allocation4], %s373_s11 }
 0x203   : > { %p1201_p0 = scmp.ne.s32.totalorder %s1200_s12, 0 }
 0x205   : > { %p539_p9 = pnand %p1202_p12, %p1201_p0 }
 0x207   : > { %796 = dma.done.wait (!%p539_p9), %s374_s13, 64  }
 0x208   : > { %798 = vsyncadd (!%p539_p9), %s374_s13, 4294967232  ;;  %s1203_s21 = sld [smem:[#allocation20_spill]]  ;;  %s1204_s0 = sld [smem:[#allocation18_spill]] }
 0x209   : > { %s1205_s20 = sld [smem:[#allocation21_spill]]  ;;  %s1206_s18 = smov %s805_s19 }
 0x20e   : > { %p20_p13 = scmp.ge.s32.totalorder %s1203_s21, 4   ;;  %s1207_s19 = smov %s1204_s0 }
 0x210   :  { %22 = sbr.rel (!%p20_p13) target bundleno = 10 (0xa), region = 108 }
 0x217   :  { %379 = vsyncpa [#allocation3], 1 }
 0x218   :  { %381 = vsyncpa [#allocation3 + $0x1], 1 }
 0x219   :  { %382 = vsyncpa [#allocation6], 1 }
 0x21a   :  { %383 = vsyncpa [#allocation10], 1 }
 0x21b   :  { %384 = vsyncpa [#allocation4], 1 }
 0x21c   :  { %386 = vsyncpa [#allocation4 + $0x1], 1 }

// kernel: nbert_pretrain_forward.14
= control target key start
LH: loop header
LB: loop body
LE: loop exit
PB: predicated region body
PF: predicated region fallthrough
CT: control target
= control target key end

     0   :  { %s1131_s0 = inlined_call_operand.hbm [shape: bf16[2,2,8,192], index: 0, kind: input, shape index: {}]   ;;  %s1132_s1 = inlined_call_operand.hbm [shape: f32[2,1,8], index: 1, kind: input, shape index: {}]   ;;  %s1133_s2 = inlined_call_operand.hbm [shape: bf16[2,2,8,64], index: 2, kind: output, shape index: {}]  }
   0x1   :  { %1143 = sst [smem:[#allocation14_spill]] %s1133_s2 }
   0x2   :  { %7 = vsyncpa [#allocation3], 0 }
   0x3   :  { %9 = vsyncpa [#allocation3 + $0x1], 0 }
   0x4   :  { %10 = vsyncpa [#allocation6], 0 }
   0x5   :  { %12 = vsyncpa [#allocation6 + $0x1], 0 }
   0x6   :  { %13 = vsyncpa [#allocation4], 0 }
   0x7   :  { %15 = vsyncpa [#allocation4 + $0x1], 0  ;;  %s826_s9 = smov 0   ;;  %s828_s10 = smov 0  }
   0x8   :  { %s830_s11 = smov 0   ;;  %s832_s12 = smov 0  }
   0x9   :  { %s834_s13 = smov 0   ;;  %s836_s14 = smov 0  }
   0xa   :  { %s838_s15 = smov 0   ;;  %s840_s16 = smov 0  }
   0xb   :  { %s842_s17 = smov 0   ;;  %s844_s18 = smov 0  }
   0xc   :  { %s846_s19 = smov 0  }
   0xd LB: > { %1144 = sst [smem:[#allocation11_spill]] %s775_s12  ;;  %s464_s20 = sadd.s32 4294967295, %s803_s19   ;;  %s803_s19 = sphi %s846_s19, %s21_s19   ;;  %s799_s18 = sphi %s844_s18, %s1179_s18   ;;  %s795_s17 = sphi %s842_s17, %s1178_s17   ;;  %s791_s16 = sphi %s840_s16, %s1177_s16   ;;  %s787_s15 = sphi %s838_s15, %s1176_s15   ;;  %s783_s14 = sphi %s836_s14, %s1175_s14   ;;  %s779_s13 = sphi %s834_s13, %s1174_s13   ;;  %s775_s12 = sphi %s832_s12, %s1173_s12   ;;  %s771_s11 = sphi %s830_s11, %s1172_s11   ;;  %s767_s10 = sphi %s828_s10, %s1171_s10   ;;  %s763_s9 = sphi %s826_s9, %s1170_s9  }
   0xe   : > { %s465_s21 = sadd.s32 4294967294, %s803_s19   ;;  %s30_s22 = sadd.s32 1, %s795_s17 }
   0xf   : > { %s33_s23 = sadd.s32 1, %s799_s18  ;;  %p31_p0 = scmp.ge.s32.totalorder %s30_s22, 2 }
  0x10   : > { %s42_s24 = sadd.s32 1, %s783_s14  ;;  %p49_p1 = scmp.ne.s32.totalorder %s783_s14, %s779_s13 }
  0x11   : > { %p1138_p2 = scmp.eq.s32.totalorder %s803_s19, 0  ;;  %s1181_s22 = smov (%p31_p0, %s30_s22), 0 }
  0x12   : > { %1145 = sst [smem:[#allocation12_spill]] %s1181_s22  ;;  %s1183_s23 = smov (!%p31_p0, %s33_s23), %s799_s18 }
  0x13   : > { %s37_s25 = ssub.s32 %s795_s17, %s1181_s22  ;;  %p896_p3 = por %p1138_p2, %p49_p1 }
  0x14   : > { %p35_p4 = scmp.ge.s32.totalorder %s1183_s23, 2  ;;  %p55_p5 = scmp.ne.s32.totalorder %s779_s13, %s775_s12 }
  0x15   : > { %p902_p6 = scmp.eq.s32.totalorder %s464_s20, 0  ;;  %p107_p7 = scmp.eq.s32.totalorder %s464_s20, 3 }
  0x16   : > { %s1185_s23 = smov (%p35_p4, %s1183_s23), 0  ;;  %p113_p10 = scmp.eq.s32.totalorder %s465_s21, 3 }
  0x17   : > { %1148 = sst [smem:[#allocation13_spill]] %s1185_s23  ;;  %p910_p8 = por %p902_p6, %p55_p5 }
  0x18   : > { %p914_p9 = por %p107_p7, %p49_p1  ;;  %s920_s30 = ssub.s32 %s799_s18, %s1185_s23 }
  0x19   : > { %s1149_s28 = scalar_select %p910_p8, 1, 0 }
  0x1a   : > { %s1150_s29 = scalar_select %p914_p9, 1, 0 }
  0x1b   : > { %s39_s3 = sor.u32 %s920_s30, %s37_s25  ;;  %p924_p13 = por %p113_p10, %p55_p5 }
  0x1c   : > { %p40_p12 = scmp.eq.s32.totalorder %s39_s3, 0  ;;  %p1139_p0 = scmp.lt.s32.totalorder %s803_s19, 4 }
  0x1d   : > { %s1151_s4 = scalar_select %p924_p13, 1, 0 }
  0x1e   : > { %s930_s5 = scalar_select %p40_p12, %s783_s14, %s42_s24  }
  0x1f   : > { %s133_s6 = sand.u32 1, %s783_s14   ;;  %s469_s7 = sshll.u32 %s799_s18, 1 }
  0x20   : > { %s468_s8 = sshll.u32 %s133_s6, 3  ;;  %s470_s20 = sshll.u32 %s795_s17, 2 }
  0x21   : > { %s143_s23 = sadd.s32 %s470_s20, %s469_s7  ;;  %s137_s21 = scalar_lea.vmem [#allocation2], %s468_s8 }
  0x22   : > { %s147_s25 = sshll.u32 %s137_s21, 4  ;;  %s471_s22 = sshll.u32 %s143_s23, 6  ;;  %s935_s25 = int_to_ptr.vmem [resolvable:$true] %s147_s25 }
  0x23   : > { %s940_s2 = scalar_lea.hbm %s1131_s0, %s471_s22  ;;  %p946_p1 = pnand %p1139_p0, %p896_p3 }
  0x24   : > { %s134_s23 = scalar_lea.sflag [#allocation3], %s133_s6  ;;  %s617_s7 = scalar_lea.hbm %s940_s2, 128 }
  0x25   : > { %p618_p7 = scmp.ne.s32.totalorder %s940_s2, %s617_s7  ;;  %p619_p10 = pneg %p946_p1 }
  0x26   : > { %s622_s26 = scalar_lea.hbm %s1131_s0, 512  ;;  %p623_p3 = scmp.lt.u32.totalorder %s940_s2, %s1131_s0 }
  0x27   : > { %p620_p12 = pnand %p619_p10, %p618_p7  ;;  %p624_p0 = scmp.lt.u32.totalorder %s622_s26, %s617_s7 }
  0x28   : > { %p626_p4 = scmp.lt.u32.totalorder %s617_s7, %s940_s2 }
  0x29   : > { %p621_p2 = pneg %p620_p12  ;;  %p625_p11 = por %p624_p0, %p623_p3 }
  0x2b   : > { %p627_p5 = por %p626_p4, %p625_p11 }
  0x2d   : > { %p628_p13 = pnand %p627_p5, %p621_p2 }
  0x2f   : > { %631 = shalt.err (!%p628_p13)
}
  0x30   : > { %s632_s6 = scalar_lea.vmem %s935_s25, 128  ;;  %s805_s21 = smov [#allocation2]  }
  0x31   : > { %p633_p7 = scmp.ne.s32.totalorder %s935_s25, %s632_s6  ;;  %s637_s3 = sshll.u32 %s805_s21, 4  ;;  %s638_s3 = int_to_ptr.vmem [resolvable:$false] %s637_s3 }
  0x32   : > { %s639_s12 = scalar_lea.vmem %s638_s3, 256  ;;  %p640_p8 = scmp.lt.s32.totalorder %s935_s25, %s638_s3 }
  0x33   : > { %p635_p12 = pnand %p633_p7, %p619_p10  ;;  %p641_p0 = scmp.lt.s32.totalorder %s639_s12, %s632_s6 }
  0x35   : > { %p636_p9 = pneg %p635_p12  ;;  %p642_p3 = por %p641_p0, %p640_p8 }
  0x37   : > { %p643_p11 = pnand %p642_p3, %p636_p9 }
  0x39   : > { %646 = shalt.err (!%p643_p11)
}
  0x3a   : > { %510 = dma.hbm_to_vmem [thread:$0]  (!%p946_p1), %s940_s2, 128, %s935_s25, %s134_s23  }
  0x3b   : > { %p1153_p2 = scmp.lt.s32.totalorder %s803_s19, 5  ;;  %p1154_p8 = scmp.ge.s32.totalorder %s803_s19, 1 }
  0x3c   : > { %s68_s7 = sadd.s32 1, %s771_s11  ;;  %p75_p13 = scmp.ne.s32.totalorder %s771_s11, %s767_s10 }
  0x3d   : > { %p981_p9 = pnand %p1154_p8, %p1153_p2  ;;  %p1156_p4 = scmp.eq.s32.totalorder %s920_s30, 0 }
  0x3e   : > { %p1157_p5 = scmp.eq.s32.totalorder %s803_s19, 0  ;;  %p81_p7 = scmp.ne.s32.totalorder %s767_s10, %s763_s9 }
  0x3f   : > { %s991_s22 = scalar_select %p1156_p4, %s771_s11, %s68_s7  }
  0x40   : > { %p77_p10 = por %p75_p13, %p1157_p5  ;;  %s154_s26 = sand.u32 1, %s771_s11  }
  0x41   : > { %s472_s8 = sshll.u32 %s799_s18, 4  ;;  %p1001_p12 = por %p81_p7, %p902_p6 }
  0x42   : > { %s1008_s23 = scalar_lea.hbm %s1132_s1, %s472_s8  ;;  %s157_s30 = scalar_lea.vmem [#allocation5], %s154_s26 }
  0x43   : > { %s1158_s20 = scalar_select %p1001_p12, 1, 0 }
  0x44   : > { %s164_s6 = sshll.u32 %s157_s30, 4  ;;  %p1159_p1 = scmp.lt.s32.totalorder %s803_s19, 4  ;;  %s1016_s6 = int_to_ptr.vmem [resolvable:$true] %s164_s6 }
  0x45   : > { %s155_s27 = scalar_lea.sflag [#allocation6], %s154_s26  ;;  %s647_s21 = scalar_lea.hbm %s1008_s23, 16 }
  0x46   : > { %p1012_p0 = pnand %p1159_p1, %p77_p10  ;;  %p648_p6 = scmp.ne.s32.totalorder %s1008_s23, %s647_s21 }
  0x47   : > { %s652_s7 = scalar_lea.hbm %s1132_s1, 32  ;;  %p653_p8 = scmp.lt.u32.totalorder %s1008_s23, %s1132_s1 }
  0x48   : > { %p649_p3 = pneg %p1012_p0  ;;  %p654_p13 = scmp.lt.u32.totalorder %s652_s7, %s647_s21 }
  0x49   : > { %p656_p5 = scmp.lt.u32.totalorder %s647_s21, %s1008_s23 }
  0x4a   : > { %p650_p11 = pnand %p649_p3, %p648_p6  ;;  %p655_p4 = por %p654_p13, %p653_p8 }
  0x4c   : > { %p651_p2 = pneg %p650_p11  ;;  %p657_p10 = por %p656_p5, %p655_p4 }
  0x4e   : > { %p658_p7 = pnand %p657_p10, %p651_p2 }
  0x50   : > { %661 = shalt.err (!%p658_p7)
}
  0x51   : > { %s662_s26 = scalar_lea.vmem %s1016_s6, 16  ;;  %s806_s25 = smov [#allocation5]  }
  0x52   : > { %p663_p1 = scmp.ne.s32.totalorder %s1016_s6, %s662_s26  ;;  %s667_s30 = sshll.u32 %s806_s25, 4  ;;  %s668_s30 = int_to_ptr.vmem [resolvable:$false] %s667_s30 }
  0x53   : > { %s669_s3 = scalar_lea.vmem %s668_s30, 32  ;;  %p670_p12 = scmp.lt.s32.totalorder %s1016_s6, %s668_s30 }
  0x54   : > { %p665_p6 = pnand %p663_p1, %p649_p3  ;;  %p671_p8 = scmp.lt.s32.totalorder %s669_s3, %s662_s26 }
  0x56   : > { %p666_p11 = pneg %p665_p6  ;;  %p672_p13 = por %p671_p8, %p670_p12 }
  0x58   : > { %p673_p4 = pnand %p672_p13, %p666_p11 }
  0x5a   : > { %676 = shalt.err (!%p673_p4)
}
  0x5b   : > { %513 = dma.hbm_to_vmem [thread:$0]  (!%p1012_p0), %s1008_s23, 16, %s1016_s6, %s155_s27  }
  0x5c   : > { %173 = sbr.rel (%p981_p9) target bundleno = 989 (0x3dd), region = 28  ;;  %s1046_s21 = sand.u32 (!%p981_p9), 1, %s779_s13  }
  0x5d   : > { %s474_s12 = sshll.u32 (!%p981_p9), %s1046_s21, 3  ;;  %s176_s7 = scalar_lea.sflag (!%p981_p9), [#allocation3], %s1046_s21 }
  0x5e   : > { %s179_s8 = scalar_lea.vmem (!%p981_p9), [#allocation2], %s474_s12  ;;  %p1161_p12 = scmp.ne.s32.totalorder (!%p981_p9), %s1149_s28, 0 }
  0x63   : > { %750 = dma.done.wait (%p1161_p12), %s176_s7, 128  }
  0x64   : > { %752 = vsyncadd (%p1161_p12), %s176_s7, 4294967168  ;;  %s184_s23 = sand.u32 1, %s767_s10   ;;  %p1162_p9 = scmp.ne.s32.totalorder %s1158_s20, 0 }
  0x65   : > { %s185_s6 = scalar_lea.sflag [#allocation6], %s184_s23  ;;  %s187_s24 = scalar_lea.vmem [#allocation5], %s184_s23 }
  0x66   : > { %754 = dma.done.wait (%p1162_p9), %s185_s6, 16  }
  0x67   : > { %756 = vsyncadd (%p1162_p9), %s185_s6, 4294967280  ;;  %v807_v0 = vmov 0.0   ;;  %vm808_vm0 = vmmov 0   ;;  %v213_v1 = vld [vmem:[%s179_s8] sm:$0xff]  ;;  %s809_s28 = smov 64   ;;  %vm219_vm1 = vcmask 523264   ;;  %v271_v5 = vlaneseq }
  0x68   : > { %489 = vmatprep.subr.bf16.mxu0 %v807_v0  ;;  %491 = vmatprep.mubr.msk.bf16.mxu0 %vm808_vm0, %v807_v0  ;;  %v476_v2 = vcombine.low %v213_v1, %v213_v1  ;;  %v267_v6 = vld [vmem:[%s187_s24] sm:$0x1]  ;;  %vm277_vm2 = vcmask 64512   ;;  %v478_v24 = vcombine.high %v213_v1, %v213_v1  ;;  %vm295_vm3 = vcmask 1043456   ;;  %s475_s20 = sshll.u32 %s1046_s21, 2  ;;  %s481_s9 = sshll.u32 %s787_s15, 1 }
  0x69   : > { %495 = vmatprep.subr.bf16.mxu1 %v807_v0  ;;  %497 = vmatprep.mubr.msk.bf16.mxu1 %vm808_vm0, %v807_v0  ;;  %v268_v7 = vsub.f32 1.0, %v267_v6  ;;  %v272_v8 = vshrl.u32 %v271_v5, 7  ;;  %s354_s27 = sadd.s32 %s791_s16, %s481_s9  ;;  %s211_s26 = scalar_lea.vmem [#allocation7], %s475_s20  ;;  %vm340_vm4 = vcmask 519168  }
  0x6a   : > { %217 = vrot.lane.b32.xlu0 %v476_v2, %s809_s28  ;;  %v297_v25 = vsel %vm295_vm3, %v478_v24, 0  ;;  %s482_s2 = sshll.u32 %s354_s27, 6  ;;  %s358_s25 = sshll.u32 %s211_s26, 4  ;;  %s1070_s25 = int_to_ptr.vmem [resolvable:$true] %s358_s25 }
  0x6b   : > { %v269_v9 = vmul.f32 -10000.0, %v268_v7  ;;  %v273_v10 = vsub.s32 0, %v272_v8  ;;  %496 = vmatpush3.bf16.msra.mxu1 %v297_v25  ;;  %s1163_s12 = sld [smem:[#allocation14_spill]]  ;;  %s343_s15 = scalar_lea.sflag [#allocation4], %s1046_s21 }
  0x6c   : > { %s677_s16 = scalar_lea.vmem %s1070_s25, 64  ;;  %p1165_p3 = scmp.ne.s32.totalorder %s1150_s29, 0 }
  0x6d   : > { %v274_v11 = vrot.slane %v269_v9, %v273_v10  ;;  %p678_p0 = scmp.ne.s32.totalorder %s1070_s25, %s677_s16  ;;  %s810_s23 = smov [#allocation7]  }
  0x6e   : > { %s681_s6 = sshll.u32 %s810_s23, 4  ;;  %s682_s6 = int_to_ptr.vmem [resolvable:$false] %s681_s6 }
  0x6f   : > { %p679_p2 = pnand %p678_p0, %p1165_p3  ;;  %s683_s24 = scalar_lea.vmem %s682_s6, 128 }
  0x70   : > { %p684_p10 = scmp.lt.s32.totalorder %s1070_s25, %s682_s6  ;;  %p685_p7 = scmp.lt.s32.totalorder %s683_s24, %s677_s16 }
  0x71   : > { %s1164_s7 = smov %s1163_s12  ;;  %s1068_s8 = scalar_lea.hbm %s1163_s12, %s482_s2 }
  0x72   : > { %p680_p5 = pneg %p679_p2  ;;  %p686_p1 = por %p685_p7, %p684_p10 }
  0x74   : > { %p687_p6 = pnand %p686_p1, %p680_p5 }
  0xdc   : > { %v218_v3 = vpop.permute.xlu0 %217 }
  0xdd   : > { %v224_v4 = vsel %vm219_vm1, %v218_v3, 0 }
  0xde   : > { %490 = vmatpush3.bf16.xpose.msra.mxu0 %v224_v4 }
  0xe5   : > { %492 = vmatmul.mubr.msk.bf16.vlgmr.msra.gmra.mrb[0].mxu0 %vm219_vm1, %v213_v1 }
 0x1b8   : > { %v260_v12 = vpop.f32.mrb[0].mxu0 }
 0x1b9   : > { %v266_v13 = vmul.f32 0.125, %v260_v12  ;;  %v493_v14 = vpop.f32.mrb[1].mxu0 }
 0x1ba   : > { %v263_v15 = vpop.f32.mrb[2].mxu0 }
 0x1bb   : > { %v494_v16 = vpop.f32.mrb[3].mxu0  ;;  %v276_v17 = vadd.f32 %v274_v11, %v266_v13 }
 0x1bd   : > { %v278_v18 = vsel %vm277_vm2, %v276_v17, -inf }
 0x1be   : > { %279 = vmax.xlane.f32.xlu0 %v278_v18 }
 0x24b   : > { %v280_v19 = vpop.xlane.xlu0 %279 }
 0x24c   : > { %v281_v20 = vsub.f32 %v276_v17, %v280_v19 }
 0x24e   : > { %v282_v21 = vmul.f32 1.442695, %v281_v20 }
 0x250   : > { %613 = vpow2.f32 %v282_v21 }
 0x25a   : > { %v614_v22 = vpop.eup %613 }
 0x25b   : > { %v284_v23 = vsel %vm277_vm2, %v614_v22, 0.0 }
 0x25c   : > { %285 = vadd.xlane.f32.xlu1 %v284_v23 }
 0x2e9   : > { %v286_v26 = vpop.xlane.xlu1 %285 }
 0x2ea   : > { %615 = vrcp.f32 %v286_v26 }
 0x2f4   : > { %v616_v27 = vpop.eup %615 }
 0x2f5   : > { %v288_v28 = vmul.f32 %v616_v27, %v614_v22 }
 0x2f7   : > { %v289_v29 = vpack.c.bf16 %v288_v28, %v288_v28 }
 0x2f9   : > { %498 = vmatmul.mubr.msk.bf16.vlgmr.msra.gmra.mrb[0].mxu1 %vm277_vm2, %v289_v29 }
 0x3cc   : > { %v333_v30 = vpop.f32.mrb[0].mxu1 }
 0x3cd   : > { %v339_v31 = vpack.c.bf16 %v333_v30, %v333_v30  ;;  %v499_v32 = vpop.f32.mrb[1].mxu1 }
 0x3ce   : > { %v336_v33 = vpop.f32.mrb[2].mxu1 }
 0x3cf   : > { %v500_v34 = vpop.f32.mrb[3].mxu1  ;;  %341 = vst.msk [vmem:[%s211_s26] sm:$0xf] %vm340_vm4, %v339_v31 }
 0x3d0   : > { %690 = shalt.err (!%p687_p6)
}
 0x3d1   : > { %s691_s21 = scalar_lea.hbm %s1068_s8, 64  ;;  %s695_s9 = scalar_lea.hbm %s1164_s7, 256 }
 0x3d2   : > { %p692_p11 = scmp.ne.s32.totalorder %s1068_s8, %s691_s21  ;;  %p696_p4 = scmp.lt.u32.totalorder %s1068_s8, %s1164_s7 }
 0x3d3   : > { %p697_p12 = scmp.lt.u32.totalorder %s695_s9, %s691_s21  ;;  %p699_p0 = scmp.lt.u32.totalorder %s691_s21, %s1068_s8 }
 0x3d4   : > { %p693_p8 = pnand %p692_p11, %p1165_p3 }
 0x3d5   : > { %p698_p9 = por %p697_p12, %p696_p4 }
 0x3d6   : > { %p694_p13 = pneg %p693_p8 }
 0x3d7   : > { %p700_p2 = por %p699_p0, %p698_p9 }
 0x3d9   : > { %p701_p5 = pnand %p700_p2, %p694_p13 }
 0x3db   : > { %704 = shalt.err (!%p701_p5)
}
 0x3dc   : > { %505 = dma.vmem_to_hbm [thread:$0]  (%p1165_p3), %s1070_s25, 64, %s1068_s8, %s343_s15  }
 0x3dd PF: > { %s1166_s26 = sld [smem:[#allocation11_spill]]  ;;  %p519_p10 = scmp.ge.s32.totalorder %s803_s19, 2 }
 0x3de   : > { %p1167_p7 = scmp.ne.s32.totalorder %s1151_s4, 0 }
 0x3e0   : > { %p515_p1 = pnand %p519_p10, %p1167_p7 }
 0x3e3   : > { %s370_s30 = sand.u32 1, %s1166_s26  }
 0x3e4   : > { %s371_s3 = scalar_lea.sflag [#allocation4], %s370_s30 }
 0x3e5   : > { %758 = dma.done.wait (!%p515_p1), %s371_s3, 64  }
 0x3e6   : > { %760 = vsyncadd (!%p515_p1), %s371_s3, 4294967232  ;;  %s21_s19 = sadd.s32 1, %s803_s19   ;;  %s1168_s29 = sld [smem:[#allocation12_spill]] }
 0x3e7   : > { %p18_p6 = scmp.ge.s32.totalorder %s21_s19, 6   ;;  %s1169_s25 = sld [smem:[#allocation13_spill]] }
 0x3e8   : > { %s1170_s9 = smov %s767_s10  ;;  %s1171_s10 = smov %s771_s11 }
 0x3e9   : > { %s1172_s11 = smov %s991_s22  ;;  %s1173_s12 = smov %s779_s13 }
 0x3ea   : > { %s1174_s13 = smov %s783_s14  ;;  %s1175_s14 = smov %s930_s5 }
 0x3eb   : > { %s1176_s15 = smov %s795_s17  ;;  %s1177_s16 = smov %s799_s18 }
 0x3ec   : > { %s1178_s17 = smov %s1168_s29  ;;  %20 = sbr.rel (!%p18_p6) target bundleno = 13 (0xd), region = 86 }
 0x3ed   : > { %s1179_s18 = smov %s1169_s25 }
 0x3f3   :  { %376 = vsyncpa [#allocation3], 1 }
 0x3f4   :  { %378 = vsyncpa [#allocation3 + $0x1], 1 }
 0x3f5   :  { %379 = vsyncpa [#allocation6], 1 }
 0x3f6   :  { %381 = vsyncpa [#allocation6 + $0x1], 1 }
 0x3f7   :  { %382 = vsyncpa [#allocation4], 1 }
 0x3f8   :  { %384 = vsyncpa [#allocation4 + $0x1], 1 }

// kernel: nbert_pretrain_forward.15
= control target key start
LH: loop header
LB: loop body
LE: loop exit
PB: predicated region body
PF: predicated region fallthrough
CT: control target
= control target key end

     0   :  { %s1519_s0 = inlined_call_operand.hbm [shape: bf16[2,16,64], index: 0, kind: input, shape index: {}]   ;;  %s1520_s1 = inlined_call_operand.hbm [shape: bf16[2,64,128], index: 1, kind: input, shape index: {}]   ;;  %s1521_s2 = inlined_call_operand.hbm [shape: f32[1,128], index: 2, kind: input, shape index: {}]   ;;  %s1522_s3 = inlined_call_operand.hbm [shape: bf16[16,128], index: 3, kind: input, shape index: {}]   ;;  %s1523_s4 = inlined_call_operand.hbm [shape: f32[1,128], index: 4, kind: input, shape index: {}]   ;;  %s1524_s5 = inlined_call_operand.hbm [shape: f32[1,128], index: 5, kind: input, shape index: {}]   ;;  %s1525_s6 = inlined_call_operand.hbm [shape: bf16[16,128], index: 6, kind: output, shape index: {}]  }
   0x1   :  { %1531 = sst [smem:[#allocation21_spill]] %s1519_s0 }
   0x2   :  { %1532 = sst [smem:[#allocation22_spill]] %s1521_s2 }
   0x3   :  { %1533 = sst [smem:[#allocation23_spill]] %s1522_s3 }
   0x4   :  { %11 = vsyncpa [#allocation4], 0 }
   0x5   :  { %13 = vsyncpa [#allocation4 + $0x1], 0 }
   0x6   :  { %14 = vsyncpa [#allocation7], 0 }
   0x7   :  { %16 = vsyncpa [#allocation7 + $0x1], 0 }
   0x8   :  { %17 = vsyncpa [#allocation10], 0 }
   0x9   :  { %18 = vsyncpa [#allocation13], 0 }
   0xa   :  { %19 = vsyncpa [#allocation5], 0  ;;  %s1200_s21 = smov 0   ;;  %s1202_s22 = smov 0  }
   0xb   :  { %s1204_s23 = smov 0   ;;  %s1206_s24 = smov 0  }
   0xc   :  { %s1208_s25 = smov 0   ;;  %s1210_s26 = smov 0  }
   0xd LB: > { %s1229_s27 = sadd.s32 4294967295, %s1149_s26   ;;  %p59_p0 = scmp.ne.s32.totalorder %s1133_s22, %s1129_s21  ;;  %s1149_s26 = sphi %s1210_s26, %s25_s26   ;;  %s1145_s25 = sphi %s1208_s25, %s1556_s25   ;;  %s1141_s24 = sphi %s1206_s24, %s1555_s24   ;;  %s1137_s23 = sphi %s1204_s23, %s1554_s23   ;;  %s1133_s22 = sphi %s1202_s22, %s1553_s22   ;;  %s1129_s21 = sphi %s1200_s21, %s1552_s21  }
   0xe   : > { %p1526_p1 = scmp.eq.s32.totalorder %s1229_s27, 0  ;;  %p691_p2 = scmp.ge.s32.totalorder %s1149_s26, 1 }
   0xf   : > { %p211_p3 = scmp.lt.s32.totalorder %s1149_s26, 3  ;;  %s1151_s30 = smov [#allocation8]  }
  0x10   : > { %p1237_p4 = por %p1526_p1, %p59_p0  ;;  %s224_s7 = sshll.u32 %s1151_s30, 4  ;;  %s225_s7 = int_to_ptr.vmem [resolvable:$true] %s224_s7 }
  0x11   : > { %p1241_p5 = pnand %p691_p2, %p211_p3  ;;  %s1152_s8 = smov [#allocation9]  }
  0x12   : > { %s1534_s28 = scalar_select %p1237_p4, 1, 0 }
  0x13   : > { %s1535_s29 = scalar_select %p1241_p5, 1, 0 }
  0x14   : > { %p781_p6 = pneg %p1241_p5  ;;  %s237_s9 = sshll.u32 %s1152_s8, 4  ;;  %s1253_s9 = int_to_ptr.vmem [resolvable:$true] %s237_s9 }
  0x15   : > { %s1153_s11 = smov [#allocation11]   ;;  %s1537_s2 = sld [smem:[#allocation22_spill]] }
  0x16   : > { %p1249_p7 = pnand %p781_p6, %p1526_p1  ;;  %s1255_s12 = sshll.u32 %s1153_s11, 4  ;;  %s252_s12 = int_to_ptr.vmem [resolvable:$true] %s1255_s12 }
  0x18   : > { %p1265_p9 = pneg %p1249_p7 }
  0x1b   : > { %s881_s15 = scalar_lea.hbm %s1537_s2, 16 }
  0x1c   : > { %p882_p8 = scmp.ne.s32.totalorder %s1537_s2, %s881_s15  ;;  %p888_p12 = scmp.lt.u32.totalorder %s881_s15, %s1537_s2 }
  0x1e   : > { %p884_p10 = pnand %p1265_p9, %p882_p8 }
  0x20   : > { %p885_p11 = pneg %p884_p10 }
  0x22   : > { %p890_p13 = pnand %p888_p12, %p885_p11 }
  0x24   : > { %893 = shalt.err (!%p890_p13)
}
  0x25   : > { %s894_s21 = scalar_lea.vmem %s225_s7, 16  ;;  %s901_s30 = scalar_lea.vmem %s225_s7, 32 }
  0x26   : > { %p895_p0 = scmp.ne.s32.totalorder %s225_s7, %s894_s21  ;;  %p902_p6 = scmp.lt.s32.totalorder %s225_s7, %s225_s7 }
  0x27   : > { %p903_p1 = scmp.lt.s32.totalorder %s901_s30, %s894_s21 }
  0x28   : > { %p897_p2 = pnand %p895_p0, %p1265_p9 }
  0x29   : > { %p904_p4 = por %p903_p1, %p902_p6 }
  0x2a   : > { %p898_p3 = pneg %p897_p2 }
  0x2c   : > { %p905_p5 = pnand %p904_p4, %p898_p3 }
  0x2e   : > { %908 = shalt.err (!%p905_p5)
}
  0x2f   : > { %784 = dma.hbm_to_vmem [thread:$0]  (!%p1249_p7), %s1537_s2, 16, %s225_s7, [#allocation7]  }
  0x30   : > { %s1539_s3 = sld [smem:[#allocation23_spill]] }
  0x36   : > { %s909_s15 = scalar_lea.hbm %s1539_s3, 128 }
  0x37   : > { %p910_p8 = scmp.ne.s32.totalorder %s1539_s3, %s909_s15  ;;  %p916_p4 = scmp.lt.u32.totalorder %s909_s15, %s1539_s3 }
  0x39   : > { %p912_p10 = pnand %p910_p8, %p1265_p9 }
  0x3b   : > { %p913_p1 = pneg %p912_p10 }
  0x3d   : > { %p918_p5 = pnand %p916_p4, %p913_p1 }
  0x3f   : > { %921 = shalt.err (!%p918_p5)
}
  0x40   : > { %s922_s7 = scalar_lea.vmem %s1253_s9, 128  ;;  %p930_p0 = scmp.lt.s32.totalorder %s1253_s9, %s1253_s9 }
  0x41   : > { %p923_p11 = scmp.ne.s32.totalorder %s1253_s9, %s922_s7  ;;  %p931_p2 = scmp.lt.s32.totalorder %s922_s7, %s922_s7 }
  0x43   : > { %p925_p12 = pnand %p923_p11, %p1265_p9  ;;  %p932_p3 = por %p931_p2, %p930_p0 }
  0x45   : > { %p926_p13 = pneg %p925_p12 }
  0x47   : > { %p933_p6 = pnand %p932_p3, %p926_p13 }
  0x49   : > { %936 = shalt.err (!%p933_p6)
}
  0x4a   : > { %s1529_s21 = smov 64   ;;  %s1155_s30 = smov 4  }
  0x4b   : > { %787 = dma.hbm_to_vmem [thread:$0]  (!%p1249_p7), %s1539_s3, 128, %s1253_s9, [#allocation10], %s1529_s21, %s1529_s21, %s1155_s30  }
  0x4c   : > { %s937_s15 = scalar_lea.hbm %s1523_s4, 16 }
  0x4d   : > { %p938_p8 = scmp.ne.s32.totalorder %s1523_s4, %s937_s15  ;;  %p944_p4 = scmp.lt.u32.totalorder %s937_s15, %s1523_s4 }
  0x4f   : > { %p940_p10 = pnand %p938_p8, %p1265_p9 }
  0x51   : > { %p941_p1 = pneg %p940_p10 }
  0x53   : > { %p946_p5 = pnand %p944_p4, %p941_p1 }
  0x55   : > { %949 = shalt.err (!%p946_p5)
}
  0x56   : > { %s950_s7 = scalar_lea.vmem %s252_s12, 16  ;;  %s957_s9 = scalar_lea.vmem %s252_s12, 32 }
  0x57   : > { %p951_p11 = scmp.ne.s32.totalorder %s252_s12, %s950_s7  ;;  %p958_p0 = scmp.lt.s32.totalorder %s252_s12, %s252_s12 }
  0x58   : > { %p959_p2 = scmp.lt.s32.totalorder %s957_s9, %s950_s7 }
  0x59   : > { %p953_p12 = pnand %p951_p11, %p1265_p9 }
  0x5a   : > { %p960_p3 = por %p959_p2, %p958_p0 }
  0x5b   : > { %p954_p13 = pneg %p953_p12 }
  0x5d   : > { %p961_p6 = pnand %p960_p3, %p954_p13 }
  0x5f   : > { %964 = shalt.err (!%p961_p6)
}
  0x60   : > { %790 = dma.hbm_to_vmem [thread:$0]  (!%p1249_p7), %s1523_s4, 16, %s252_s12, [#allocation10]  }
  0x61   : > { %s1156_s13 = smov [#allocation12]   ;;  %s965_s17 = scalar_lea.hbm %s1524_s5, 16 }
  0x62   : > { %s262_s14 = sshll.u32 %s1156_s13, 4  ;;  %p966_p8 = scmp.ne.s32.totalorder %s1524_s5, %s965_s17  ;;  %s263_s14 = int_to_ptr.vmem [resolvable:$true] %s262_s14 }
  0x63   : > { %p972_p4 = scmp.lt.u32.totalorder %s965_s17, %s1524_s5 }
  0x64   : > { %p968_p10 = pnand %p966_p8, %p1265_p9 }
  0x66   : > { %p969_p1 = pneg %p968_p10 }
  0x68   : > { %p974_p5 = pnand %p972_p4, %p969_p1 }
  0x6a   : > { %977 = shalt.err (!%p974_p5)
}
  0x6b   : > { %s978_s12 = scalar_lea.vmem %s263_s14, 16  ;;  %s985_s8 = scalar_lea.vmem %s263_s14, 32 }
  0x6c   : > { %p979_p11 = scmp.ne.s32.totalorder %s263_s14, %s978_s12  ;;  %p986_p0 = scmp.lt.s32.totalorder %s263_s14, %s263_s14 }
  0x6d   : > { %p987_p2 = scmp.lt.s32.totalorder %s985_s8, %s978_s12 }
  0x6e   : > { %p981_p12 = pnand %p979_p11, %p1265_p9 }
  0x6f   : > { %p988_p3 = por %p987_p2, %p986_p0 }
  0x70   : > { %p982_p13 = pneg %p981_p12 }
  0x72   : > { %p989_p6 = pnand %p988_p3, %p982_p13 }
  0x74   : > { %992 = shalt.err (!%p989_p6)
}
  0x75   : > { %793 = dma.hbm_to_vmem [thread:$0]  (!%p1249_p7), %s1524_s5, 16, %s263_s14, [#allocation13]  }
  0x76   : > { %s34_s18 = sadd.s32 1, %s1145_s25  ;;  %s46_s15 = sadd.s32 1, %s1137_s23 }
  0x77   : > { %p35_p9 = scmp.ge.s32.totalorder %s34_s18, 2  ;;  %p53_p8 = scmp.ne.s32.totalorder %s1137_s23, %s1133_s22 }
  0x78   : > { %p54_p10 = scmp.eq.s32.totalorder %s1149_s26, 0  ;;  %p805_p1 = scmp.lt.s32.totalorder %s1149_s26, 2 }
  0x79   : > { %s1558_s18 = smov (%p35_p9, %s34_s18), 0  ;;  %s1353_s10 = sand.u32 1, %s1137_s23  }
  0x7a   : > { %p55_p4 = por %p54_p10, %p53_p8  ;;  %s41_s16 = ssub.s32 %s1145_s25, %s1558_s18 }
  0x7b   : > { %p44_p5 = scmp.eq.s32.totalorder %s41_s16, 0  ;;  %s697_s14 = sshll.u32 %s1353_s10, 3 }
  0x7c   : > { %s727_s17 = sshll.u32 %s1145_s25, 7  ;;  %s1540_s0 = sld [smem:[#allocation21_spill]] }
  0x7d   : > { %s1360_s19 = scalar_select %p44_p5, %s1137_s23, %s46_s15  }
  0x7e   : > { %s277_s12 = scalar_lea.vmem [#allocation3], %s697_s14  ;;  %p1371_p7 = pnand %p805_p1, %p55_p4 }
  0x7f   : > { %s286_s8 = sshll.u32 %s277_s12, 4  ;;  %s700_s15 = sshll.u32 %s1353_s10, 5  ;;  %s1367_s8 = int_to_ptr.vmem [resolvable:$true] %s286_s8 }
  0x80   : > { %s274_s16 = scalar_lea.sflag [#allocation4], %s1353_s10  ;;  %p995_p12 = pneg %p1371_p7 }
  0x82   : > { %s1365_s9 = scalar_lea.hbm %s1540_s0, %s727_s17  ;;  %s998_s7 = scalar_lea.hbm %s1540_s0, 256 }
  0x83   : > { %s993_s17 = scalar_lea.hbm %s1365_s9, 128  ;;  %p999_p2 = scmp.lt.u32.totalorder %s1365_s9, %s1540_s0 }
  0x84   : > { %p994_p11 = scmp.ne.s32.totalorder %s1365_s9, %s993_s17  ;;  %p1000_p3 = scmp.lt.u32.totalorder %s998_s7, %s993_s17 }
  0x85   : > { %p1002_p9 = scmp.lt.u32.totalorder %s993_s17, %s1365_s9 }
  0x86   : > { %p996_p13 = pnand %p995_p12, %p994_p11  ;;  %p1001_p6 = por %p1000_p3, %p999_p2 }
  0x88   : > { %p997_p0 = pneg %p996_p13  ;;  %p1003_p8 = por %p1002_p9, %p1001_p6 }
  0x8a   : > { %p1004_p10 = pnand %p1003_p8, %p997_p0 }
  0x8c   : > { %1007 = shalt.err (!%p1004_p10)
}
  0x8d   : > { %s1008_s13 = scalar_lea.vmem %s1367_s8, 128  ;;  %s1157_s14 = smov [#allocation3]  }
  0x8e   : > { %p1009_p1 = scmp.ne.s32.totalorder %s1367_s8, %s1008_s13  ;;  %s1013_s20 = sshll.u32 %s1157_s14, 4  ;;  %s1014_s20 = int_to_ptr.vmem [resolvable:$false] %s1013_s20 }
  0x8f   : > { %s1015_s21 = scalar_lea.vmem %s1014_s20, 256  ;;  %p1016_p11 = scmp.lt.s32.totalorder %s1367_s8, %s1014_s20 }
  0x90   : > { %p1011_p4 = pnand %p1009_p1, %p995_p12  ;;  %p1017_p13 = scmp.lt.s32.totalorder %s1015_s21, %s1008_s13 }
  0x92   : > { %p1012_p5 = pneg %p1011_p4  ;;  %p1018_p2 = por %p1017_p13, %p1016_p11 }
  0x94   : > { %p1019_p3 = pnand %p1018_p2, %p1012_p5 }
  0x96   : > { %1022 = shalt.err (!%p1019_p3)
}
  0x97   : > { %s1542_s17 = smov 64   ;;  %s728_s7 = sshll.u32 %s1145_s25, 9 }
  0x98   : > { %797 = dma.hbm_to_vmem [thread:$0]  (!%p1371_p7), %s1365_s9, 128, %s1367_s8, %s274_s16, %s1542_s17, %s1542_s17, %s1155_s30  }
  0x99   : > { %s1412_s14 = scalar_lea.hbm %s1520_s1, %s728_s7  ;;  %s300_s20 = scalar_lea.vmem [#allocation6], %s700_s15 }
  0x9a   : > { %s307_s21 = sshll.u32 %s300_s20, 4  ;;  %s1543_s0 = sand.u32 1, %s1149_s26   ;;  %s1416_s21 = int_to_ptr.vmem [resolvable:$true] %s307_s21 }
  0x9b   : > { %s1420_s2 = scalar_lea.sflag [#allocation7], %s1543_s0  ;;  %s1023_s3 = scalar_lea.hbm %s1412_s14, 512 }
  0x9c   : > { %p1024_p0 = scmp.ne.s32.totalorder %s1412_s14, %s1023_s3  ;;  %s1028_s10 = scalar_lea.hbm %s1520_s1, 1024 }
  0x9d   : > { %p1029_p8 = scmp.lt.u32.totalorder %s1412_s14, %s1520_s1  ;;  %p1030_p10 = scmp.lt.u32.totalorder %s1028_s10, %s1023_s3 }
  0x9e   : > { %p1026_p6 = pnand %p1024_p0, %p995_p12  ;;  %p1032_p4 = scmp.lt.u32.totalorder %s1023_s3, %s1412_s14 }
  0x9f   : > { %p1031_p1 = por %p1030_p10, %p1029_p8 }
  0xa0   : > { %p1027_p9 = pneg %p1026_p6 }
  0xa1   : > { %p1033_p5 = por %p1032_p4, %p1031_p1 }
  0xa3   : > { %p1034_p11 = pnand %p1033_p5, %p1027_p9 }
  0xa5   : > { %1037 = shalt.err (!%p1034_p11)
}
  0xa6   : > { %s1038_s0 = scalar_lea.vmem %s1416_s21, 512  ;;  %s1158_s15 = smov [#allocation6]  }
  0xa7   : > { %p1039_p13 = scmp.ne.s32.totalorder %s1416_s21, %s1038_s0  ;;  %s1043_s12 = sshll.u32 %s1158_s15, 4  ;;  %s1044_s12 = int_to_ptr.vmem [resolvable:$false] %s1043_s12 }
  0xa8   : > { %s1045_s13 = scalar_lea.vmem %s1044_s12, 1024  ;;  %p1046_p0 = scmp.lt.s32.totalorder %s1416_s21, %s1044_s12 }
  0xa9   : > { %p1041_p2 = pnand %p1039_p13, %p995_p12  ;;  %p1047_p6 = scmp.lt.s32.totalorder %s1045_s13, %s1038_s0 }
  0xab   : > { %p1042_p3 = pneg %p1041_p2  ;;  %p1048_p8 = por %p1047_p6, %p1046_p0 }
  0xad   : > { %p1049_p10 = pnand %p1048_p8, %p1042_p3 }
  0xaf   : > { %1052 = shalt.err (!%p1049_p10)
}
  0xb0   : > { %800 = dma.hbm_to_vmem [thread:$0]  (!%p1371_p7), %s1412_s14, 512, %s1416_s21, %s1420_s2, %s1542_s17, %s1542_s17, %s1155_s30  }
  0xb1   : > { %p1544_p12 = scmp.ne.s32.totalorder %s1535_s29, 0 }
  0xb2   : > { %s321_s3 = sand.u32 (!%p1544_p12), 1, %s1133_s22   ;;  %p1545_p9 = scmp.ne.s32.totalorder (!%p1544_p12), %s1534_s28, 0 }
  0xb3   : > { %319 = sbr.rel (%p1544_p12) target bundleno = 796 (0x31c), region = 44  ;;  %s704_s20 = sshll.u32 (!%p1544_p12), %s321_s3, 3 }
  0xb4   : > { %s322_s9 = scalar_lea.sflag (!%p1544_p12), [#allocation4], %s321_s3  ;;  %s1452_s8 = scalar_lea.vmem (!%p1544_p12), [#allocation3], %s704_s20 }
  0xba   : > { %1104 = dma.done.wait (%p1545_p9), %s322_s9, 128  }
  0xbb   : > { %1106 = vsyncadd (%p1545_p9), %s322_s9, 4294967168  ;;  %s330_s11 = sand.u32 1, %s1229_s27   ;;  %s705_s10 = sshll.u32 %s321_s3, 5 }
  0xbc   : > { %s331_s2 = scalar_lea.sflag [#allocation7], %s330_s11  ;;  %s334_s30 = scalar_lea.vmem [#allocation6], %s705_s10 }
  0xbd   : > { %1108 = dma.done.wait (%p1545_p9), %s331_s2, 512  }
  0xbe   : > { %1110 = vsyncadd (%p1545_p9), %s331_s2, 4294966784  ;;  %p1546_p7 = scmp.eq.s32.totalorder %s1229_s27, 0 }
  0xc0   : > { %1112 = dma.done.wait (%p1546_p7), [#allocation7], 16   ;;  %p1547_p1 = pmov %p1546_p7 }
  0xc2   : > { %1114 = vsyncadd (%p1547_p1), [#allocation7], 4294967280  ;;  %p1548_p4 = pmov %p1547_p1 }
  0xc3   : > { %p1549_p5 = pmov %p1547_p1 }
  0xc4   : > { %1116 = dma.done.wait (%p1548_p4), [#allocation10], 144  }
  0xc5   : > { %1118 = vsyncadd (%p1549_p5), [#allocation10], 4294967152  ;;  %p1550_p11 = pmov %p1547_p1 }
  0xc6   : > { %p1551_p13 = pmov %p1547_p1 }
  0xc7   : > { %1120 = dma.done.wait (%p1550_p11), [#allocation13], 16  }
  0xc8   : > { %1122 = vsyncadd (%p1551_p13), [#allocation13], 4294967280  ;;  %p710_p2 = scmp.ne.s32.totalorder %s1141_s24, 0 }
  0xc9   : > { %v1159_v0 = vmov (!%p710_p2), 0.0  }
  0xca   : > { %386 = sbr.rel (%p710_p2) target bundleno = 209 (0xd1), region = 72  ;;  %387 = vst [vmem:[#allocation2] sm:$0xff] (!%p710_p2), %v1159_v0  ;;  %388 = vst [vmem:[#allocation2 + $0x8] sm:$0xff] (!%p710_p2), %v1159_v0 }
  0xd1 PF: > { %v872_v1 = vld [vmem:[%s334_s30] sm:$0xff]   ;;  %v1160_v2 = vmov 0.0   ;;  %v873_v3 = vld [vmem:[%s334_s30 + $0x8] sm:$0xff]   ;;  %vm1161_vm0 = vmmov 0   ;;  %v874_v4 = vld [vmem:[%s334_s30 + $0x10] sm:$0xff]   ;;  %vm430_vm1 = vcmask 523264  }
  0xd2   : > { %745 = vmatprep.subr.bf16.mxu0 %v1160_v2  ;;  %753 = vmatprep.mubr.msk.bf16.mxu0 %vm1161_vm0, %v1160_v2  ;;  %v875_v5 = vld [vmem:[%s334_s30 + $0x18] sm:$0xff]   ;;  %v389_v7 = vld [vmem:[#allocation2] sm:$0xff]  ;;  %v390_v9 = vld [vmem:[#allocation2 + $0x8] sm:$0xff]  ;;  %p717_p3 = scmp.ne.s32.totalorder %s1141_s24, 1 }
  0xd3   : > { %746 = vmatpush3.bf16.msra.mxu0 %v872_v1  ;;  %v876_v6 = vld [vmem:[%s1452_s8] sm:$0xff]   ;;  %v718_v16 = vld [vmem:[#allocation8] ss:$0 sm:$0xff] (!%p717_p3)  ;;  %v732_v17 = vld [vmem:[#allocation9] sm:$0xff] (!%p717_p3)  }
  0xd4   : > { %747 = vmatprep.subr.bf16.mxu0 %v1160_v2  ;;  %v733_v19 = vunpack.c.l.bf16 (!%p717_p3), %v732_v17  ;;  %v734_v21 = vunpack.c.h.bf16 (!%p717_p3), %v732_v17  ;;  %v719_v41 = vld [vmem:[#allocation11] ss:$0 sm:$0xff] (!%p717_p3)  ;;  %v720_v45 = vld [vmem:[#allocation12] ss:$0 sm:$0xff] (!%p717_p3) }
  0xd7   : > { %748 = vmatpush3.bf16.msra.mxu0 %v873_v3 }
  0xd8   : > { %749 = vmatprep.subr.bf16.mxu0 %v1160_v2 }
  0xdb   : > { %750 = vmatpush3.bf16.msra.mxu0 %v874_v4 }
  0xdc   : > { %751 = vmatprep.subr.bf16.mxu0 %v1160_v2 }
  0xdf   : > { %752 = vmatpush3.bf16.msra.mxu0 %v875_v5 }
  0xe2   : > { %754 = vmatmul.mubr.msk.bf16.vlgmr.msra.gmra.mrb[0].mxu0 %vm430_vm1, %v876_v6 }
 0x1b4   : > { %482 = sbr.rel (%p717_p3) target bundleno = 770 (0x302), region = 76 }
 0x1b5   : > { %v468_v8 = vpop.f32.mrb[0].mxu0 }
 0x1b6   : > { %v475_v10 = vadd.f32 %v468_v8, %v389_v7  ;;  %v755_v11 = vpop.f32.mrb[1].mxu0 }
 0x1b7   : > { %v471_v12 = vpop.f32.mrb[2].mxu0 }
 0x1b8   : > { %477 = vst [vmem:[#allocation2] sm:$0xff] %v475_v10  ;;  %v476_v13 = vadd.f32 %v471_v12, %v390_v9  ;;  %v756_v14 = vpop.f32.mrb[3].mxu0 }
 0x1ba   : > { %478 = vst [vmem:[#allocation2 + $0x8] sm:$0xff] %v476_v13 }
 0x1bf   : > { %v483_v15 = vld [vmem:[#allocation2] sm:$0xff] }
 0x1c0   : > { %v492_v18 = vadd.f32 %v718_v16, %v483_v15 }
 0x1c1   : > { %v484_v20 = vld [vmem:[#allocation2 + $0x8] sm:$0xff] }
 0x1c2   : > { %v493_v22 = vadd.f32 %v718_v16, %v484_v20  ;;  %v498_v23 = vadd.f32 %v733_v19, %v492_v18 }
 0x1c4   : > { %502 = vadd.xlane.f32.xlu0 %v498_v23  ;;  %v499_v24 = vadd.f32 %v734_v21, %v493_v22 }
 0x1c8   : > { %504 = vadd.xlane.f32.xlu0 %v499_v24 }
 0x251   : > { %v503_v25 = vpop.xlane.xlu0 %502 }
 0x252   : > { %v507_v26 = vmul.f32 0.0078125, %v503_v25 }
 0x254   : > { %v509_v27 = vsub.f32 %v498_v23, %v507_v26 }
 0x255   : > { %v505_v28 = vpop.xlane.xlu0 %504 }
 0x256   : > { %v508_v29 = vmul.f32 0.0078125, %v505_v28  ;;  %v511_v30 = vmul.f32 %v509_v27, %v509_v27 }
 0x258   : > { %v510_v31 = vsub.f32 %v499_v24, %v508_v29  ;;  %513 = vadd.xlane.f32.xlu1 %v511_v30 }
 0x25a   : > { %v512_v32 = vmul.f32 %v510_v31, %v510_v31 }
 0x25c   : > { %515 = vadd.xlane.f32.xlu1 %v512_v32 }
 0x2e5   : > { %v514_v33 = vpop.xlane.xlu1 %513 }
 0x2e6   : > { %v517_v34 = vmul.f32 0.0078125, %v514_v33 }
 0x2e8   : > { %v519_v35 = vadd.f32 1e-12, %v517_v34 }
 0x2e9   : > { %v516_v36 = vpop.xlane.xlu1 %515 }
 0x2ea   : > { %877 = vrsqrt.f32 %v519_v35  ;;  %v518_v37 = vmul.f32 0.0078125, %v516_v36 }
 0x2ec   : > { %v520_v38 = vadd.f32 1e-12, %v518_v37 }
 0x2ee   : > { %879 = vrsqrt.f32 %v520_v38 }
 0x2f4   : > { %v878_v39 = vpop.eup %877 }
 0x2f5   : > { %v523_v40 = vmul.f32 %v878_v39, %v509_v27 }
 0x2f7   : > { %v531_v43 = vmul.f32 %v719_v41, %v523_v40 }
 0x2f8   : > { %v880_v42 = vpop.eup %879 }
 0x2f9   : > { %v524_v44 = vmul.f32 %v880_v42, %v510_v31  ;;  %v539_v47 = vadd.f32 %v720_v45, %v531_v43 }
 0x2fb   : > { %v532_v46 = vmul.f32 %v719_v41, %v524_v44 }
 0x2fd   : > { %v540_v48 = vadd.f32 %v720_v45, %v532_v46 }
 0x2ff   : > { %v738_v49 = vpack.c.bf16 %v540_v48, %v539_v47 }
 0x301   : > { %739 = vst [vmem:[#allocation14] sm:$0xff] %v738_v49  }
 0x302 PF: > { %p810_p0 = scmp.eq.s32.totalorder %s1229_s27, 1  ;;  %s1162_s24 = smov [#allocation14]  }
 0x303   : > { %s560_s28 = sshll.u32 %s1162_s24, 4  ;;  %s561_s28 = int_to_ptr.vmem [resolvable:$true] %s560_s28 }
 0x304   : > { %s1053_s29 = scalar_lea.vmem %s561_s28, 128  ;;  %p1060_p12 = scmp.lt.s32.totalorder %s561_s28, %s561_s28 }
 0x305   : > { %p1054_p6 = scmp.ne.s32.totalorder %s561_s28, %s1053_s29  ;;  %p1061_p9 = scmp.lt.s32.totalorder %s1053_s29, %s1053_s29 }
 0x307   : > { %p1055_p8 = pnand %p1054_p6, %p810_p0  ;;  %p1062_p7 = por %p1061_p9, %p1060_p12 }
 0x309   : > { %p1056_p10 = pneg %p1055_p8 }
 0x30b   : > { %p1063_p1 = pnand %p1062_p7, %p1056_p10 }
 0x30d   : > { %1066 = shalt.err (!%p1063_p1)
}
 0x30e   : > { %s1067_s21 = scalar_lea.hbm %s1525_s6, 128 }
 0x30f   : > { %p1068_p4 = scmp.ne.s32.totalorder %s1525_s6, %s1067_s21  ;;  %p1073_p13 = scmp.lt.u32.totalorder %s1067_s21, %s1525_s6 }
 0x311   : > { %p1069_p5 = pnand %p1068_p4, %p810_p0 }
 0x313   : > { %p1070_p11 = pneg %p1069_p5 }
 0x315   : > { %p1075_p2 = pnand %p1073_p13, %p1070_p11 }
 0x317   : > { %1078 = shalt.err (!%p1075_p2)
}
 0x318   : > { %s1163_s12 = smov 64   ;;  %s1164_s13 = smov 4  }
 0x319   : > { %778 = dma.vmem_to_hbm [thread:$0]  (%p810_p0), %s561_s28, 128, %s1525_s6, [#allocation5], %s1163_s12, %s1163_s12, %s1164_s13  }
 0x31a   : > { %1124 = dma.done.wait (%p810_p0), [#allocation5], 128  }
 0x31b   : > { %1126 = vsyncadd (%p810_p0), [#allocation5], 4294967168 }
 0x31c PF: > { %s25_s26 = sadd.s32 1, %s1149_s26   ;;  %s1552_s21 = smov %s1133_s22 }
 0x31d   : > { %p22_p3 = scmp.ge.s32.totalorder %s25_s26, 4   ;;  %s1553_s22 = smov %s1137_s23 }
 0x31e   : > { %s1554_s23 = smov %s1360_s19  ;;  %s1555_s24 = smov %s1145_s25 }
 0x31f   : > { %s1556_s25 = smov %s1558_s18  ;;  %24 = sbr.rel (!%p22_p3) target bundleno = 13 (0xd), region = 120 }
 0x326   :  { %576 = vsyncpa [#allocation4], 1 }
 0x327   :  { %578 = vsyncpa [#allocation4 + $0x1], 1 }
 0x328   :  { %579 = vsyncpa [#allocation7], 1 }
 0x329   :  { %581 = vsyncpa [#allocation7 + $0x1], 1 }
 0x32a   :  { %582 = vsyncpa [#allocation10], 1 }
 0x32b   :  { %583 = vsyncpa [#allocation13], 1 }
 0x32c   :  { %584 = vsyncpa [#allocation5], 1 }
 0x32d   :  { %586 = vsyncpa [#allocation5 + $0x1], 1 }

// kernel: nbert_pretrain_forward.21
= control target key start
LH: loop header
LB: loop body
LE: loop exit
PB: predicated region body
PF: predicated region fallthrough
CT: control target
= control target key end

     0   :  { %10 = vsyncpa [#allocation3], 0  ;;  %s638_s0 = inlined_call_operand.hbm [shape: bf16[16,128], index: 0, kind: input, shape index: {}]   ;;  %s639_s1 = inlined_call_operand.hbm [shape: bf16[128,128], index: 1, kind: input, shape index: {}]   ;;  %s640_s2 = inlined_call_operand.hbm [shape: f32[1,128], index: 2, kind: input, shape index: {}]   ;;  %s641_s3 = inlined_call_operand.hbm [shape: f32[1,128], index: 3, kind: input, shape index: {}]   ;;  %s642_s4 = inlined_call_operand.hbm [shape: f32[1,128], index: 4, kind: input, shape index: {}]   ;;  %s643_s5 = inlined_call_operand.hbm [shape: bf16[16,128], index: 5, kind: output, shape index: {}]  }
   0x1   :  { %11 = vsyncpa [#allocation6], 0 }
   0x2   :  { %12 = vsyncpa [#allocation9], 0 }
   0x3   :  { %13 = vsyncpa [#allocation4], 0  ;;  %s509_s18 = smov [#allocation5]   ;;  %s510_s20 = smov [#allocation8]  }
   0x4   :  { %s31_s19 = sshll.u32 %s509_s18, 4  ;;  %s54_s21 = sshll.u32 %s510_s20, 4  ;;  %s32_s19 = int_to_ptr.vmem [resolvable:$true] %s31_s19  ;;  %s549_s21 = int_to_ptr.vmem [resolvable:$true] %s54_s21 }
   0x5   :  { %s369_s24 = scalar_lea.hbm %s639_s1, 1024 }
   0x6   :  { %p370_p0 = scmp.ne.s32.totalorder %s639_s1, %s369_s24  ;;  %p373_p1 = scmp.lt.u32.totalorder %s369_s24, %s639_s1 }
   0x8   :  { %p375_p2 = pnand %p373_p1, %p370_p0 }
   0xa   :  { %378 = shalt.err (!%p375_p2)
}
   0xb   :  { %s379_s29 = scalar_lea.vmem %s32_s19, 1024  ;;  %p384_p4 = scmp.lt.s32.totalorder %s32_s19, %s32_s19 }
   0xc   :  { %p380_p3 = scmp.ne.s32.totalorder %s32_s19, %s379_s29  ;;  %p385_p5 = scmp.lt.s32.totalorder %s379_s29, %s379_s29 }
   0xe   :  { %p386_p6 = por %p385_p5, %p384_p4 }
  0x10   :  { %p387_p7 = pnand %p386_p6, %p380_p3 }
  0x12   :  { %390 = shalt.err (!%p387_p7)
}
  0x13   :  { %s511_s30 = smov 64   ;;  %s512_s6 = smov 4  }
  0x14   :  { %37 = dma.hbm_to_vmem [thread:$0]  %s639_s1, 1024, %s32_s19, [#allocation6], %s511_s30, %s511_s30, %s512_s6  }
  0x15   :  { %s391_s11 = scalar_lea.hbm %s641_s3, 16 }
  0x16   :  { %p392_p8 = scmp.ne.s32.totalorder %s641_s3, %s391_s11  ;;  %p395_p9 = scmp.lt.u32.totalorder %s391_s11, %s641_s3 }
  0x18   :  { %p397_p10 = pnand %p395_p9, %p392_p8 }
  0x1a   :  { %400 = shalt.err (!%p397_p10)
}
  0x1b   :  { %s401_s16 = scalar_lea.vmem %s549_s21, 16  ;;  %s405_s1 = scalar_lea.vmem %s549_s21, 32 }
  0x1c   :  { %p402_p11 = scmp.ne.s32.totalorder %s549_s21, %s401_s16  ;;  %p406_p12 = scmp.lt.s32.totalorder %s549_s21, %s549_s21 }
  0x1d   :  { %p407_p13 = scmp.lt.s32.totalorder %s405_s1, %s401_s16 }
  0x1f   :  { %p408_p0 = por %p407_p13, %p406_p12 }
  0x21   :  { %p409_p1 = pnand %p408_p0, %p402_p11 }
  0x23   :  { %412 = shalt.err (!%p409_p1)
}
  0x24   :  { %57 = dma.hbm_to_vmem [thread:$0]  %s641_s3, 16, %s549_s21, [#allocation9]  }
  0x25   :  { %s513_s19 = smov [#allocation2]   ;;  %s514_s22 = smov [#allocation7]  }
  0x26   :  { %s19_s20 = sshll.u32 %s513_s19, 4  ;;  %s44_s23 = sshll.u32 %s514_s22, 4  ;;  %s20_s20 = int_to_ptr.vmem [resolvable:$true] %s19_s20  ;;  %s45_s23 = int_to_ptr.vmem [resolvable:$true] %s44_s23 }
  0x27   :  { %s413_s26 = scalar_lea.hbm %s638_s0, 128 }
  0x28   :  { %p414_p2 = scmp.ne.s32.totalorder %s638_s0, %s413_s26  ;;  %p417_p3 = scmp.lt.u32.totalorder %s413_s26, %s638_s0 }
  0x2a   :  { %p419_p4 = pnand %p417_p3, %p414_p2 }
  0x2c   :  { %422 = shalt.err (!%p419_p4)
}
  0x2d   :  { %s423_s3 = scalar_lea.vmem %s20_s20, 128  ;;  %p428_p6 = scmp.lt.s32.totalorder %s20_s20, %s20_s20 }
  0x2e   :  { %p424_p5 = scmp.ne.s32.totalorder %s20_s20, %s423_s3  ;;  %p429_p7 = scmp.lt.s32.totalorder %s423_s3, %s423_s3 }
  0x30   :  { %p430_p8 = por %p429_p7, %p428_p6 }
  0x32   :  { %p431_p9 = pnand %p430_p8, %p424_p5 }
  0x34   :  { %434 = shalt.err (!%p431_p9)
}
  0x35   :  { %25 = dma.hbm_to_vmem [thread:$0]  %s638_s0, 128, %s20_s20, [#allocation3], %s511_s30, %s511_s30, %s512_s6  }
  0x36   :  { %s435_s11 = scalar_lea.hbm %s640_s2, 16 }
  0x37   :  { %p436_p10 = scmp.ne.s32.totalorder %s640_s2, %s435_s11  ;;  %p439_p11 = scmp.lt.u32.totalorder %s435_s11, %s640_s2 }
  0x39   :  { %p441_p12 = pnand %p439_p11, %p436_p10 }
  0x3b   :  { %444 = shalt.err (!%p441_p12)
}
  0x3c   :  { %s445_s16 = scalar_lea.vmem %s45_s23, 16  ;;  %s449_s1 = scalar_lea.vmem %s45_s23, 32 }
  0x3d   :  { %p446_p13 = scmp.ne.s32.totalorder %s45_s23, %s445_s16  ;;  %p450_p0 = scmp.lt.s32.totalorder %s45_s23, %s45_s23 }
  0x3e   :  { %p451_p1 = scmp.lt.s32.totalorder %s449_s1, %s445_s16 }
  0x40   :  { %p452_p2 = por %p451_p1, %p450_p0 }
  0x42   :  { %p453_p3 = pnand %p452_p2, %p446_p13 }
  0x44   :  { %456 = shalt.err (!%p453_p3)
}
  0x45   :  { %47 = dma.hbm_to_vmem [thread:$0]  %s640_s2, 16, %s45_s23, [#allocation6]  }
  0x46   :  { %s515_s18 = smov [#allocation10]   ;;  %s457_s24 = scalar_lea.hbm %s642_s4, 16 }
  0x47   :  { %s64_s19 = sshll.u32 %s515_s18, 4  ;;  %p458_p4 = scmp.ne.s32.totalorder %s642_s4, %s457_s24  ;;  %s65_s19 = int_to_ptr.vmem [resolvable:$true] %s64_s19 }
  0x48   :  { %p461_p5 = scmp.lt.u32.totalorder %s457_s24, %s642_s4 }
  0x4a   :  { %p463_p6 = pnand %p461_p5, %p458_p4 }
  0x4c   :  { %466 = shalt.err (!%p463_p6)
}
  0x4d   :  { %s467_s29 = scalar_lea.vmem %s65_s19, 16  ;;  %s471_s2 = scalar_lea.vmem %s65_s19, 32 }
  0x4e   :  { %p468_p7 = scmp.ne.s32.totalorder %s65_s19, %s467_s29  ;;  %p472_p8 = scmp.lt.s32.totalorder %s65_s19, %s65_s19 }
  0x4f   :  { %p473_p9 = scmp.lt.s32.totalorder %s471_s2, %s467_s29 }
  0x51   :  { %p474_p10 = por %p473_p9, %p472_p8 }
  0x53   :  { %p475_p11 = pnand %p474_p10, %p468_p7 }
  0x55   :  { %478 = shalt.err (!%p475_p11)
}
  0x56   :  { %67 = dma.hbm_to_vmem [thread:$0]  %s642_s4, 16, %s65_s19, [#allocation9]  }
  0x57   :  { %501 = dma.done.wait [#allocation3], 128  }
  0x58   :  { %502 = vsyncadd [#allocation3], 4294967168 }
  0x59   :  { %503 = dma.done.wait [#allocation6], 1040  }
  0x5a   :  { %504 = vsyncadd [#allocation6], 4294966256 }
  0x5b   :  { %505 = dma.done.wait [#allocation9], 32  }
  0x5c   :  { %506 = vsyncadd [#allocation9], 4294967264  ;;  %v516_v0 = vmov 0.0   ;;  %vm517_vm0 = vmmov 0   ;;  %v352_v1 = vld [vmem:[#allocation5] sm:$0xff]   ;;  %v353_v2 = vld [vmem:[#allocation5 + $0x8] sm:$0xff]  }
  0x5d   :  { %322 = vmatprep.subr.bf16.mxu0 %v516_v0  ;;  %338 = vmatprep.mubr.msk.bf16.mxu0 %vm517_vm0, %v516_v0  ;;  %v354_v3 = vld [vmem:[#allocation5 + $0x10] sm:$0xff]   ;;  %v355_v4 = vld [vmem:[#allocation5 + $0x18] sm:$0xff]   ;;  %v356_v5 = vld [vmem:[#allocation5 + $0x20] sm:$0xff]   ;;  %s518_s4 = smov [#allocation11]  }
  0x5e   :  { %323 = vmatpush3.bf16.msra.mxu0 %v352_v1  ;;  %v357_v6 = vld [vmem:[#allocation5 + $0x28] sm:$0xff]   ;;  %v358_v7 = vld [vmem:[#allocation5 + $0x30] sm:$0xff]   ;;  %v359_v8 = vld [vmem:[#allocation5 + $0x38] sm:$0xff]   ;;  %s278_s3 = sshll.u32 %s518_s4, 4  ;;  %s279_s3 = int_to_ptr.vmem [resolvable:$true] %s278_s3 }
  0x5f   :  { %324 = vmatprep.subr.bf16.mxu0 %v516_v0  ;;  %v360_v9 = vld [vmem:[#allocation2] sm:$0xff]   ;;  %v292_v10 = vld [vmem:[#allocation7] ss:$0 sm:$0xff]  ;;  %v302_v51 = vld [vmem:[#allocation8] ss:$0 sm:$0xff]  ;;  %s479_s21 = scalar_lea.vmem %s279_s3, 128  ;;  %p484_p13 = scmp.lt.s32.totalorder %s279_s3, %s279_s3 }
  0x60   :  { %v303_v55 = vld [vmem:[#allocation10] ss:$0 sm:$0xff]  ;;  %p480_p12 = scmp.ne.s32.totalorder %s279_s3, %s479_s21  ;;  %p485_p0 = scmp.lt.s32.totalorder %s479_s21, %s479_s21 }
  0x62   :  { %325 = vmatpush3.bf16.msra.mxu0 %v353_v2  ;;  %p486_p1 = por %p485_p0, %p484_p13 }
  0x63   :  { %326 = vmatprep.subr.bf16.mxu0 %v516_v0 }
  0x64   :  { %p487_p2 = pnand %p486_p1, %p480_p12 }
  0x66   :  { %327 = vmatpush3.bf16.msra.mxu0 %v354_v3 }
  0x67   :  { %328 = vmatprep.subr.bf16.mxu0 %v516_v0 }
  0x6a   :  { %329 = vmatpush3.bf16.msra.mxu0 %v355_v4 }
  0x6b   :  { %330 = vmatprep.subr.bf16.mxu0 %v516_v0 }
  0x6e   :  { %331 = vmatpush3.bf16.msra.mxu0 %v356_v5 }
  0x6f   :  { %332 = vmatprep.subr.bf16.mxu0 %v516_v0 }
  0x72   :  { %333 = vmatpush3.bf16.msra.mxu0 %v357_v6 }
  0x73   :  { %334 = vmatprep.subr.bf16.mxu0 %v516_v0 }
  0x76   :  { %335 = vmatpush3.bf16.msra.mxu0 %v358_v7 }
  0x77   :  { %336 = vmatprep.subr.bf16.mxu0 %v516_v0 }
  0x7a   :  { %337 = vmatpush3.bf16.msra.mxu0 %v359_v8 }
  0x7d   :  { %339 = vmatmul.mubr.bf16.vlgmr.msra.gmra.mrb[0].mxu0 %v360_v9 }
 0x150   :  { %v197_v11 = vpop.f32.mrb[0].mxu0 }
 0x151   :  { %v198_v12 = vadd.f32 %v292_v10, %v197_v11  ;;  %v340_v13 = vpop.f32.mrb[1].mxu0 }
 0x152   :  { %v200_v14 = vpop.f32.mrb[2].mxu0 }
 0x153   :  { %v206_v15 = vmul.f32 0.044715, %v198_v12  ;;  %v201_v16 = vadd.f32 %v292_v10, %v200_v14  ;;  %v341_v17 = vpop.f32.mrb[3].mxu0  ;;  %v204_v28 = vmul.f32 0.5, %v198_v12 }
 0x155   :  { %v207_v18 = vmul.f32 0.044715, %v201_v16  ;;  %v208_v19 = vmul.f32 %v206_v15, %v198_v12  ;;  %v205_v33 = vmul.f32 0.5, %v201_v16 }
 0x157   :  { %v210_v20 = vmul.f32 %v208_v19, %v198_v12  ;;  %v209_v21 = vmul.f32 %v207_v18, %v201_v16 }
 0x159   :  { %v212_v22 = vadd.f32 %v210_v20, %v198_v12  ;;  %v211_v23 = vmul.f32 %v209_v21, %v201_v16 }
 0x15b   :  { %v214_v24 = vmul.f32 0.7978846, %v212_v22  ;;  %v213_v25 = vadd.f32 %v211_v23, %v201_v16 }
 0x15d   :  { %361 = vtanh.f32 %v214_v24  ;;  %v215_v26 = vmul.f32 0.7978846, %v213_v25 }
 0x15f   :  { %363 = vtanh.f32 %v215_v26 }
 0x167   :  { %v362_v27 = vpop.eup %361 }
 0x168   :  { %v218_v29 = vadd.f32 1.0, %v362_v27 }
 0x169   :  { %v364_v30 = vpop.eup %363 }
 0x16a   :  { %v220_v31 = vmul.f32 %v218_v29, %v204_v28  ;;  %v219_v32 = vadd.f32 1.0, %v364_v30 }
 0x16c   :  { %224 = vadd.xlane.f32.xlu0 %v220_v31  ;;  %v221_v34 = vmul.f32 %v219_v32, %v205_v33 }
 0x170   :  { %226 = vadd.xlane.f32.xlu0 %v221_v34 }
 0x1f9   :  { %v225_v35 = vpop.xlane.xlu0 %224 }
 0x1fa   :  { %v229_v36 = vmul.f32 0.0078125, %v225_v35 }
 0x1fc   :  { %v231_v37 = vsub.f32 %v220_v31, %v229_v36 }
 0x1fd   :  { %v227_v38 = vpop.xlane.xlu0 %226 }
 0x1fe   :  { %v230_v39 = vmul.f32 0.0078125, %v227_v38  ;;  %v233_v40 = vmul.f32 %v231_v37, %v231_v37 }
 0x200   :  { %v232_v41 = vsub.f32 %v221_v34, %v230_v39  ;;  %235 = vadd.xlane.f32.xlu1 %v233_v40 }
 0x202   :  { %v234_v42 = vmul.f32 %v232_v41, %v232_v41 }
 0x204   :  { %237 = vadd.xlane.f32.xlu1 %v234_v42 }
 0x28d   :  { %v236_v43 = vpop.xlane.xlu1 %235 }
 0x28e   :  { %v239_v44 = vmul.f32 0.0078125, %v236_v43 }
 0x290   :  { %v241_v45 = vadd.f32 1e-12, %v239_v44 }
 0x291   :  { %v238_v46 = vpop.xlane.xlu1 %237 }
 0x292   :  { %365 = vrsqrt.f32 %v241_v45  ;;  %v240_v47 = vmul.f32 0.0078125, %v238_v46 }
 0x294   :  { %v242_v48 = vadd.f32 1e-12, %v240_v47 }
 0x296   :  { %367 = vrsqrt.f32 %v242_v48 }
 0x29c   :  { %v366_v49 = vpop.eup %365 }
 0x29d   :  { %v245_v50 = vmul.f32 %v366_v49, %v231_v37 }
 0x29f   :  { %v253_v54 = vmul.f32 %v302_v51, %v245_v50 }
 0x2a0   :  { %v368_v52 = vpop.eup %367 }
 0x2a1   :  { %v246_v53 = vmul.f32 %v368_v52, %v232_v41  ;;  %v261_v57 = vadd.f32 %v303_v55, %v253_v54 }
 0x2a3   :  { %v254_v56 = vmul.f32 %v302_v51, %v246_v53 }
 0x2a5   :  { %v262_v58 = vadd.f32 %v303_v55, %v254_v56 }
 0x2a7   :  { %v311_v59 = vpack.c.bf16 %v262_v58, %v261_v57 }
 0x2a9   :  { %312 = vst [vmem:[#allocation11] sm:$0xff] %v311_v59  }
 0x2aa   :  { %490 = shalt.err (!%p487_p2)
}
 0x2ab   :  { %s491_s10 = scalar_lea.hbm %s643_s5, 128 }
 0x2ac   :  { %p492_p3 = scmp.ne.s32.totalorder %s643_s5, %s491_s10  ;;  %p495_p4 = scmp.lt.u32.totalorder %s491_s10, %s643_s5 }
 0x2ae   :  { %p497_p5 = pnand %p495_p4, %p492_p3 }
 0x2b0   :  { %500 = shalt.err (!%p497_p5)
}
 0x2b1   :  { %284 = dma.vmem_to_hbm [thread:$0]  %s279_s3, 128, %s643_s5, [#allocation4], %s511_s30, %s511_s30, %s512_s6  }
 0x2b2   :  { %507 = dma.done.wait [#allocation4], 128  }
 0x2b3   :  { %508 = vsyncadd [#allocation4], 4294967168 }
 0x2b4   :  { %288 = vsyncpa [#allocation3], 1 }
 0x2b5   :  { %289 = vsyncpa [#allocation6], 1 }
 0x2b6   :  { %290 = vsyncpa [#allocation9], 1 }
 0x2b7   :  { %291 = vsyncpa [#allocation4], 1 }

// kernel: nbert_pretrain_forward.16
= control target key start
LH: loop header
LB: loop body
LE: loop exit
PB: predicated region body
PF: predicated region fallthrough
CT: control target
= control target key end

     0   :  { %s1895_s0 = inlined_call_operand.hbm [shape: bf16[16,128], index: 0, kind: input, shape index: {}]   ;;  %s1896_s1 = inlined_call_operand.hbm [shape: bf16[128,256], index: 1, kind: input, shape index: {}]   ;;  %s1897_s2 = inlined_call_operand.hbm [shape: f32[1,256], index: 2, kind: input, shape index: {}]   ;;  %s1898_s3 = inlined_call_operand.hbm [shape: bf16[256,128], index: 3, kind: input, shape index: {}]   ;;  %s1899_s4 = inlined_call_operand.hbm [shape: f32[1,128], index: 4, kind: input, shape index: {}]   ;;  %s1900_s5 = inlined_call_operand.hbm [shape: f32[1,128], index: 5, kind: input, shape index: {}]   ;;  %s1901_s6 = inlined_call_operand.hbm [shape: f32[1,128], index: 6, kind: input, shape index: {}]   ;;  %s1902_s7 = inlined_call_operand.hbm [shape: bf16[16,128], index: 7, kind: output, shape index: {}]  }
   0x1   :  { %1921 = sst [smem:[#allocation27_spill]] %s1896_s1 }
   0x2   :  { %1922 = sst [smem:[#allocation28_spill]] %s1899_s4 }
   0x3   :  { %1923 = sst [smem:[#allocation29_spill]] %s1900_s5 }
   0x4   :  { %1924 = sst [smem:[#allocation30_spill]] %s1902_s7 }
   0x5   :  { %12 = vsyncpa [#allocation4], 0 }
   0x6   :  { %13 = vsyncpa [#allocation7], 0 }
   0x7   :  { %15 = vsyncpa [#allocation7 + $0x1], 0 }
   0x8   :  { %16 = vsyncpa [#allocation10], 0 }
   0x9   :  { %18 = vsyncpa [#allocation10 + $0x1], 0 }
   0xa   :  { %19 = vsyncpa [#allocation13], 0 }
   0xb   :  { %20 = vsyncpa [#allocation5], 0  ;;  %s1540_s24 = smov 0   ;;  %s1542_s25 = smov 0  }
   0xc   :  { %s1544_s26 = smov 0   ;;  %s1546_s27 = smov 0  }
   0xd   :  { %s1548_s28 = smov 0   ;;  %s1550_s29 = smov 0  }
   0xe LB: > { %1925 = sst [smem:[#allocation22_spill]] %s1466_s25  ;;  %s1569_s30 = sadd.s32 4294967295, %s1482_s29   ;;  %s1482_s29 = sphi %s1550_s29, %s26_s29   ;;  %s1478_s28 = sphi %s1548_s28, %s1964_s28   ;;  %s1474_s27 = sphi %s1546_s27, %s1963_s27   ;;  %s1470_s26 = sphi %s1544_s26, %s1962_s26   ;;  %s1466_s25 = sphi %s1542_s25, %s1961_s25   ;;  %s1462_s24 = sphi %s1540_s24, %s1958_s24  }
   0xf   : > { %1926 = sst [smem:[#allocation23_spill]] %s1474_s27  ;;  %p84_p0 = scmp.ne.s32.totalorder %s1466_s25, %s1462_s24 }
  0x10   : > { %p1903_p1 = scmp.eq.s32.totalorder %s1569_s30, 0  ;;  %p920_p2 = scmp.ge.s32.totalorder %s1482_s29, 1 }
  0x11   : > { %p236_p3 = scmp.lt.s32.totalorder %s1482_s29, 3  ;;  %s1484_s10 = smov [#allocation11]  }
  0x12   : > { %p1577_p4 = por %p1903_p1, %p84_p0  ;;  %s265_s11 = sshll.u32 %s1484_s10, 4  ;;  %s266_s11 = int_to_ptr.vmem [resolvable:$true] %s265_s11 }
  0x13   : > { %p1581_p5 = pnand %p920_p2, %p236_p3  ;;  %s1485_s12 = smov [#allocation12]  }
  0x14   : > { %s1927_s8 = scalar_select %p1577_p4, 1, 0 }
  0x15   : > { %s1929_s9 = scalar_select %p1581_p5, 1, 0 }
  0x16   : > { %1928 = sst [smem:[#allocation24_spill]] %s1927_s8  ;;  %p1064_p6 = pneg %p1581_p5 }
  0x17   : > { %s276_s13 = sshll.u32 %s1485_s12, 4  ;;  %s1931_s4 = sld [smem:[#allocation28_spill]]  ;;  %s1593_s13 = int_to_ptr.vmem [resolvable:$true] %s276_s13 }
  0x18   : > { %p1589_p7 = pnand %p1064_p6, %p1903_p1 }
  0x1a   : > { %s1930_s14 = scalar_select %p1589_p7, 1, 0 }
  0x1b   : > { %p1603_p9 = pneg %p1589_p7 }
  0x1d   : > { %s1184_s17 = scalar_lea.hbm %s1931_s4, 16 }
  0x1e   : > { %p1185_p8 = scmp.ne.s32.totalorder %s1931_s4, %s1184_s17  ;;  %p1191_p12 = scmp.lt.u32.totalorder %s1184_s17, %s1931_s4 }
  0x1f   : > { %s1932_s20 = scalar_select %p1603_p9, 1, 0 }
  0x20   : > { %p1187_p10 = pnand %p1603_p9, %p1185_p8 }
  0x22   : > { %p1188_p11 = pneg %p1187_p10 }
  0x24   : > { %p1193_p13 = pnand %p1191_p12, %p1188_p11 }
  0x26   : > { %1196 = shalt.err (!%p1193_p13)
}
  0x27   : > { %s1197_s23 = scalar_lea.vmem %s266_s11, 16  ;;  %s1204_s24 = scalar_lea.vmem %s266_s11, 32 }
  0x28   : > { %p1198_p0 = scmp.ne.s32.totalorder %s266_s11, %s1197_s23  ;;  %p1205_p6 = scmp.lt.s32.totalorder %s266_s11, %s266_s11 }
  0x29   : > { %p1206_p1 = scmp.lt.s32.totalorder %s1204_s24, %s1197_s23 }
  0x2a   : > { %p1200_p2 = pnand %p1198_p0, %p1603_p9 }
  0x2b   : > { %p1207_p4 = por %p1206_p1, %p1205_p6 }
  0x2c   : > { %p1201_p3 = pneg %p1200_p2 }
  0x2e   : > { %p1208_p5 = pnand %p1207_p4, %p1201_p3 }
  0x30   : > { %1211 = shalt.err (!%p1208_p5)
}
  0x31   : > { %1070 = dma.hbm_to_vmem [thread:$0]  (!%p1589_p7), %s1931_s4, 16, %s266_s11, [#allocation10]  }
  0x32   : > { %s1933_s5 = sld [smem:[#allocation29_spill]] }
  0x38   : > { %s1212_s17 = scalar_lea.hbm %s1933_s5, 16 }
  0x39   : > { %p1213_p8 = scmp.ne.s32.totalorder %s1933_s5, %s1212_s17  ;;  %p1219_p4 = scmp.lt.u32.totalorder %s1212_s17, %s1933_s5 }
  0x3b   : > { %p1215_p10 = pnand %p1213_p8, %p1603_p9 }
  0x3d   : > { %p1216_p1 = pneg %p1215_p10 }
  0x3f   : > { %p1221_p5 = pnand %p1219_p4, %p1216_p1 }
  0x41   : > { %1224 = shalt.err (!%p1221_p5)
}
  0x42   : > { %s1225_s11 = scalar_lea.vmem %s1593_s13, 16  ;;  %s1232_s23 = scalar_lea.vmem %s1593_s13, 32 }
  0x43   : > { %p1226_p11 = scmp.ne.s32.totalorder %s1593_s13, %s1225_s11  ;;  %p1233_p0 = scmp.lt.s32.totalorder %s1593_s13, %s1593_s13 }
  0x44   : > { %p1234_p2 = scmp.lt.s32.totalorder %s1232_s23, %s1225_s11 }
  0x45   : > { %p1228_p12 = pnand %p1226_p11, %p1603_p9 }
  0x46   : > { %p1235_p3 = por %p1234_p2, %p1233_p0 }
  0x47   : > { %p1229_p13 = pneg %p1228_p12 }
  0x49   : > { %p1236_p6 = pnand %p1235_p3, %p1229_p13 }
  0x4b   : > { %1239 = shalt.err (!%p1236_p6)
}
  0x4c   : > { %1073 = dma.hbm_to_vmem [thread:$0]  (!%p1589_p7), %s1933_s5, 16, %s1593_s13, [#allocation13]  }
  0x4d   : > { %s35_s12 = sadd.s32 1, %s1478_s28  ;;  %s71_s15 = sadd.s32 1, %s1470_s26 }
  0x4e   : > { %p36_p8 = scmp.ge.s32.totalorder %s35_s12, 2  ;;  %p78_p10 = scmp.ne.s32.totalorder %s1470_s26, %s1466_s25 }
  0x4f   : > { %p79_p1 = scmp.eq.s32.totalorder %s1482_s29, 0  ;;  %p1091_p5 = scmp.lt.s32.totalorder %s1482_s29, 2 }
  0x50   : > { %s1966_s12 = smov (%p36_p8, %s35_s12), 0  ;;  %s1907_s17 = sand.u32 1, %s1482_s29  }
  0x51   : > { %1934 = sst [smem:[#allocation25_spill]] %s1966_s12  ;;  %p80_p4 = por %p79_p1, %p78_p10 }
  0x52   : > { %s68_s16 = ssub.s32 %s1478_s28, %s1966_s12  ;;  %s1906_s18 = sand.u32 1, %s1470_s26  }
  0x53   : > { %p69_p11 = scmp.eq.s32.totalorder %s68_s16, 0  ;;  %s1660_s21 = sshll.u32 %s1906_s18, 6 }
  0x54   : > { %s927_s13 = sshll.u32 %s1478_s28, 6  ;;  %s1936_s1 = sld [smem:[#allocation27_spill]] }
  0x55   : > { %s1656_s19 = scalar_select %p69_p11, %s1470_s26, %s71_s15  }
  0x56   : > { %s302_s24 = scalar_lea.vmem [#allocation6], %s1660_s21  ;;  %p1669_p12 = pnand %p1091_p5, %p80_p4 }
  0x57   : > { %1935 = sst [smem:[#allocation26_spill]] %s1656_s19  ;;  %s308_s10 = sshll.u32 %s302_s24, 4  ;;  %s1673_s10 = int_to_ptr.vmem [resolvable:$true] %s308_s10 }
  0x58   : > { %s1937_s16 = scalar_select %p1669_p12, 1, 0 }
  0x59   : > { %s1677_s15 = scalar_lea.sflag [#allocation7], %s1907_s17  ;;  %p1683_p0 = pneg %p1669_p12 }
  0x5a   : > { %s1666_s23 = scalar_lea.hbm %s1936_s1, %s927_s13  ;;  %s1245_s24 = scalar_lea.hbm %s1936_s1, 2048 }
  0x5b   : > { %s1240_s18 = scalar_lea.hbm %s1666_s23, 1024  ;;  %p1246_p6 = scmp.lt.u32.totalorder %s1666_s23, %s1936_s1 }
  0x5c   : > { %p1241_p13 = scmp.ne.s32.totalorder %s1666_s23, %s1240_s18  ;;  %p1247_p8 = scmp.lt.u32.totalorder %s1245_s24, %s1240_s18 }
  0x5d   : > { %s1938_s13 = scalar_select %p1683_p0, 1, 0 }
  0x5e   : > { %p1243_p2 = pnand %p1683_p0, %p1241_p13  ;;  %p1248_p10 = por %p1247_p8, %p1246_p6 }
  0x5f   : > { %p1249_p1 = scmp.lt.u32.totalorder %s1240_s18, %s1666_s23 }
  0x60   : > { %p1244_p3 = pneg %p1243_p2 }
  0x61   : > { %p1250_p4 = por %p1249_p1, %p1248_p10 }
  0x63   : > { %p1251_p5 = pnand %p1250_p4, %p1244_p3 }
  0x65   : > { %1254 = shalt.err (!%p1251_p5)
}
  0x66   : > { %s1255_s17 = scalar_lea.vmem %s1673_s10, 1024  ;;  %s1486_s22 = smov [#allocation6]  }
  0x67   : > { %p1256_p11 = scmp.ne.s32.totalorder %s1673_s10, %s1255_s17  ;;  %s1260_s11 = sshll.u32 %s1486_s22, 4  ;;  %s1261_s11 = int_to_ptr.vmem [resolvable:$false] %s1260_s11 }
  0x68   : > { %s1262_s4 = scalar_lea.vmem %s1261_s11, 2048  ;;  %p1263_p7 = scmp.lt.s32.totalorder %s1673_s10, %s1261_s11 }
  0x69   : > { %p1258_p13 = pnand %p1256_p11, %p1683_p0  ;;  %p1264_p9 = scmp.lt.s32.totalorder %s1262_s4, %s1255_s17 }
  0x6b   : > { %p1259_p2 = pneg %p1258_p13  ;;  %p1265_p6 = por %p1264_p9, %p1263_p7 }
  0x6d   : > { %p1266_p8 = pnand %p1265_p6, %p1259_p2 }
  0x6f   : > { %1269 = shalt.err (!%p1266_p8)
}
  0x70   : > { %s1487_s5 = smov 128   ;;  %s1488_s18 = smov 64  }
  0x71   : > { %s1489_s24 = smov 4   ;;  %s1490_s22 = smov [#allocation3]  }
  0x72   : > { %1080 = dma.hbm_to_vmem [thread:$0]  (!%p1669_p12), %s1666_s23, 1024, %s1673_s10, %s1677_s15, %s1487_s5, %s1488_s18, %s1489_s24  }
  0x73   : > { %s251_s1 = sshll.u32 %s1490_s22, 4  ;;  %s1491_s11 = smov [#allocation14]   ;;  %s252_s1 = int_to_ptr.vmem [resolvable:$true] %s251_s1 }
  0x74   : > { %s287_s17 = sshll.u32 %s1491_s11, 4  ;;  %s1270_s19 = scalar_lea.hbm %s1895_s0, 128  ;;  %s288_s17 = int_to_ptr.vmem [resolvable:$true] %s287_s17 }
  0x75   : > { %p1271_p7 = scmp.ne.s32.totalorder %s1895_s0, %s1270_s19  ;;  %p1939_p9 = scmp.ne.s32.totalorder %s1932_s20, 0 }
  0x76   : > { %p1277_p1 = scmp.lt.u32.totalorder %s1270_s19, %s1895_s0 }
  0x77   : > { %p1273_p3 = pnand %p1271_p7, %p1939_p9 }
  0x79   : > { %p1274_p10 = pneg %p1273_p3 }
  0x7b   : > { %p1279_p4 = pnand %p1277_p1, %p1274_p10 }
  0x7d   : > { %1282 = shalt.err (!%p1279_p4)
}
  0x7e   : > { %s1283_s23 = scalar_lea.vmem %s252_s1, 128  ;;  %p1291_p2 = scmp.lt.s32.totalorder %s252_s1, %s252_s1 }
  0x7f   : > { %p1284_p5 = scmp.ne.s32.totalorder %s252_s1, %s1283_s23  ;;  %p1292_p6 = scmp.lt.s32.totalorder %s1283_s23, %s1283_s23 }
  0x81   : > { %p1286_p11 = pnand %p1284_p5, %p1939_p9  ;;  %p1293_p8 = por %p1292_p6, %p1291_p2 }
  0x83   : > { %p1287_p13 = pneg %p1286_p11 }
  0x85   : > { %p1294_p12 = pnand %p1293_p8, %p1287_p13 }
  0x87   : > { %1297 = shalt.err (!%p1294_p12)
}
  0x88   : > { %p1940_p7 = scmp.ne.s32.totalorder %s1930_s14, 0  ;;  %s1298_s12 = scalar_lea.hbm %s1901_s6, 16 }
  0x89   : > { %p1299_p3 = scmp.ne.s32.totalorder %s1901_s6, %s1298_s12  ;;  %p1305_p1 = scmp.lt.u32.totalorder %s1298_s12, %s1901_s6 }
  0x8a   : > { %1067 = dma.hbm_to_vmem [thread:$0]  (!%p1940_p7), %s1895_s0, 128, %s252_s1, [#allocation4], %s1488_s18, %s1488_s18, %s1489_s24  }
  0x8b   : > { %p1301_p12 = pnand %p1299_p3, %p1939_p9 }
  0x8d   : > { %p1302_p10 = pneg %p1301_p12 }
  0x8f   : > { %p1307_p4 = pnand %p1305_p1, %p1302_p10 }
  0x91   : > { %1310 = shalt.err (!%p1307_p4)
}
  0x92   : > { %s1311_s11 = scalar_lea.vmem %s288_s17, 16  ;;  %s1318_s1 = scalar_lea.vmem %s288_s17, 32 }
  0x93   : > { %p1312_p5 = scmp.ne.s32.totalorder %s288_s17, %s1311_s11  ;;  %p1319_p2 = scmp.lt.s32.totalorder %s288_s17, %s288_s17 }
  0x94   : > { %p1320_p6 = scmp.lt.s32.totalorder %s1318_s1, %s1311_s11 }
  0x95   : > { %p1314_p11 = pnand %p1312_p5, %p1939_p9 }
  0x96   : > { %p1321_p8 = por %p1320_p6, %p1319_p2 }
  0x97   : > { %p1315_p13 = pneg %p1314_p11 }
  0x99   : > { %p1322_p0 = pnand %p1321_p8, %p1315_p13 }
  0x9b   : > { %1325 = shalt.err (!%p1322_p0)
}
  0x9c   : > { %1076 = dma.hbm_to_vmem [thread:$0]  (!%p1940_p7), %s1901_s6, 16, %s288_s17, [#allocation13]  }
  0x9d   : > { %s928_s7 = sshll.u32 %s1478_s28, 4  ;;  %s1941_s25 = sand.u32 1, %s1470_s26  }
  0x9e   : > { %s321_s20 = scalar_lea.vmem [#allocation8], %s1941_s25  ;;  %s326_s19 = scalar_lea.hbm %s1897_s2, %s928_s7 }
  0x9f   : > { %s328_s27 = sshll.u32 %s321_s20, 4  ;;  %s1326_s10 = scalar_lea.hbm %s326_s19, 16  ;;  %s329_s27 = int_to_ptr.vmem [resolvable:$true] %s328_s27 }
  0xa0   : > { %p1327_p0 = scmp.ne.s32.totalorder %s326_s19, %s1326_s10  ;;  %p1942_p9 = scmp.ne.s32.totalorder %s1938_s13, 0 }
  0xa1   : > { %s1331_s22 = scalar_lea.hbm %s1897_s2, 32  ;;  %p1332_p7 = scmp.lt.u32.totalorder %s326_s19, %s1897_s2 }
  0xa2   : > { %p1329_p3 = pnand %p1327_p0, %p1942_p9  ;;  %p1333_p10 = scmp.lt.u32.totalorder %s1331_s22, %s1326_s10 }
  0xa3   : > { %p1335_p4 = scmp.lt.u32.totalorder %s1326_s10, %s326_s19 }
  0xa4   : > { %p1330_p12 = pneg %p1329_p3  ;;  %p1334_p1 = por %p1333_p10, %p1332_p7 }
  0xa6   : > { %p1336_p5 = por %p1335_p4, %p1334_p1 }
  0xa8   : > { %p1337_p11 = pnand %p1336_p5, %p1330_p12 }
  0xaa   : > { %1340 = shalt.err (!%p1337_p11)
}
  0xab   : > { %s1341_s1 = scalar_lea.vmem %s329_s27, 16  ;;  %s1492_s4 = smov [#allocation8]  }
  0xac   : > { %p1342_p13 = scmp.ne.s32.totalorder %s329_s27, %s1341_s1  ;;  %s1346_s23 = sshll.u32 %s1492_s4, 4  ;;  %s1347_s23 = int_to_ptr.vmem [resolvable:$false] %s1346_s23 }
  0xad   : > { %s1348_s7 = scalar_lea.vmem %s1347_s23, 32  ;;  %p1349_p8 = scmp.lt.s32.totalorder %s329_s27, %s1347_s23 }
  0xae   : > { %p1344_p2 = pnand %p1342_p13, %p1942_p9  ;;  %p1350_p0 = scmp.lt.s32.totalorder %s1348_s7, %s1341_s1 }
  0xb0   : > { %p1345_p6 = pneg %p1344_p2  ;;  %p1351_p3 = por %p1350_p0, %p1349_p8 }
  0xb2   : > { %p1352_p7 = pnand %p1351_p3, %p1345_p6 }
  0xb4   : > { %1355 = shalt.err (!%p1352_p7)
}
  0xb5   : > { %p1943_p10 = scmp.ne.s32.totalorder %s1937_s16, 0  ;;  %s968_s25 = sshll.u32 %s1478_s28, 10 }
  0xb6   : > { %s339_s20 = scalar_lea.vmem [#allocation9], %s1660_s21  ;;  %s1772_s14 = scalar_lea.hbm %s1898_s3, %s968_s25 }
  0xb7   : > { %1083 = dma.hbm_to_vmem [thread:$0]  (!%p1943_p10), %s326_s19, 16, %s329_s27, %s1677_s15  }
  0xb8   : > { %s346_s8 = sshll.u32 %s339_s20, 4  ;;  %s1944_s5 = sand.u32 1, %s1482_s29   ;;  %s1774_s8 = int_to_ptr.vmem [resolvable:$true] %s346_s8 }
  0xb9   : > { %s1778_s22 = scalar_lea.sflag [#allocation10], %s1944_s5  ;;  %s1356_s11 = scalar_lea.hbm %s1772_s14, 1024 }
  0xba   : > { %p1357_p12 = scmp.ne.s32.totalorder %s1772_s14, %s1356_s11  ;;  %s1361_s27 = scalar_lea.hbm %s1898_s3, 2048 }
  0xbb   : > { %p1362_p5 = scmp.lt.u32.totalorder %s1772_s14, %s1898_s3  ;;  %p1363_p11 = scmp.lt.u32.totalorder %s1361_s27, %s1356_s11 }
  0xbc   : > { %p1359_p1 = pnand %p1357_p12, %p1942_p9  ;;  %p1365_p2 = scmp.lt.u32.totalorder %s1356_s11, %s1772_s14 }
  0xbd   : > { %p1364_p13 = por %p1363_p11, %p1362_p5 }
  0xbe   : > { %p1360_p4 = pneg %p1359_p1 }
  0xbf   : > { %p1366_p6 = por %p1365_p2, %p1364_p13 }
  0xc1   : > { %p1367_p8 = pnand %p1366_p6, %p1360_p4 }
  0xc3   : > { %1370 = shalt.err (!%p1367_p8)
}
  0xc4   : > { %s1371_s1 = scalar_lea.vmem %s1774_s8, 1024  ;;  %s1493_s4 = smov [#allocation9]  }
  0xc5   : > { %p1372_p0 = scmp.ne.s32.totalorder %s1774_s8, %s1371_s1  ;;  %s1376_s23 = sshll.u32 %s1493_s4, 4  ;;  %s1377_s23 = int_to_ptr.vmem [resolvable:$false] %s1376_s23 }
  0xc6   : > { %s1378_s7 = scalar_lea.vmem %s1377_s23, 2048  ;;  %p1379_p12 = scmp.lt.s32.totalorder %s1774_s8, %s1377_s23 }
  0xc7   : > { %p1374_p3 = pnand %p1372_p0, %p1942_p9  ;;  %p1380_p1 = scmp.lt.s32.totalorder %s1378_s7, %s1371_s1 }
  0xc9   : > { %p1375_p7 = pneg %p1374_p3  ;;  %p1381_p5 = por %p1380_p1, %p1379_p12 }
  0xcb   : > { %p1382_p11 = pnand %p1381_p5, %p1375_p7 }
  0xcd   : > { %1385 = shalt.err (!%p1382_p11)
}
  0xce   : > { %1086 = dma.hbm_to_vmem [thread:$0]  (!%p1943_p10), %s1772_s14, 1024, %s1774_s8, %s1778_s22, %s1488_s18, %s1488_s18, %s1489_s24  }
  0xcf   : > { %p1945_p9 = scmp.ne.s32.totalorder %s1929_s9, 0 }
  0xd0   : > { %p1946_p4 = scmp.eq.s32.totalorder (!%p1945_p9), %s1569_s30, 0 }
  0xd1   : > { %358 = sbr.rel (%p1945_p9) target bundleno = 1103 (0x44f), region = 48 }
  0xd8   : > { %1437 = dma.done.wait (%p1946_p4), [#allocation4], 128   ;;  %p1947_p13 = pmov %p1946_p4 }
  0xd9   : > { %s1948_s13 = sld [smem:[#allocation22_spill]]  ;;  %s1949_s25 = sld [smem:[#allocation24_spill]] }
  0xda   : > { %1439 = vsyncadd (%p1947_p13), [#allocation4], 4294967168  ;;  %s364_s16 = sand.u32 1, %s1569_s30  }
  0xdb   : > { %s365_s10 = scalar_lea.sflag [#allocation7], %s364_s16 }
  0xdf   : > { %s366_s20 = sand.u32 1, %s1948_s13   ;;  %p1950_p2 = scmp.ne.s32.totalorder %s1949_s25, 0 }
  0xe0   : > { %s934_s12 = sshll.u32 %s366_s20, 6 }
  0xe1   : > { %s1813_s5 = scalar_lea.vmem [#allocation6], %s934_s12 }
  0xe2   : > { %1441 = dma.done.wait (%p1950_p2), %s365_s10, 1040  }
  0xe3   : > { %1443 = vsyncadd (%p1950_p2), %s365_s10, 4294966256  ;;  %s1819_s9 = scalar_lea.vmem [#allocation8], %s366_s20  ;;  %s382_s18 = scalar_lea.sflag [#allocation10], %s364_s16 }
  0xe4   : > { %s1821_s24 = scalar_lea.vmem [#allocation9], %s934_s12 }
  0xe5   : > { %1445 = dma.done.wait (%p1950_p2), %s382_s18, 1024  }
  0xe6   : > { %1447 = vsyncadd (%p1950_p2), %s382_s18, 4294966272  ;;  %p1951_p10 = pmov %p1946_p4 }
  0xe7   : > { %p1952_p6 = pmov %p1946_p4 }
  0xe8   : > { %1449 = dma.done.wait (%p1951_p10), [#allocation10], 16  }
  0xe9   : > { %1451 = vsyncadd (%p1952_p6), [#allocation10], 4294967280  ;;  %p1953_p8 = pmov %p1946_p4 }
  0xea   : > { %p1954_p0 = pmov %p1946_p4 }
  0xeb   : > { %1453 = dma.done.wait (%p1953_p8), [#allocation13], 32  }
  0xec   : > { %1455 = vsyncadd (%p1954_p0), [#allocation13], 4294967264  ;;  %s1955_s8 = sld [smem:[#allocation23_spill]] }
  0xf2   : > { %p939_p3 = scmp.ne.s32.totalorder %s1955_s8, 0 }
  0xf3   : > { %v1494_v0 = vmov (!%p939_p3), 0.0  }
  0xf4   : > { %439 = sbr.rel (%p939_p3) target bundleno = 251 (0xfb), region = 80  ;;  %440 = vst [vmem:[#allocation2] sm:$0xff] (!%p939_p3), %v1494_v0  ;;  %441 = vst [vmem:[#allocation2 + $0x8] sm:$0xff] (!%p939_p3), %v1494_v0 }
  0xfb PF: > { %v1159_v1 = vld [vmem:[%s1813_s5] sm:$0xff]   ;;  %v1495_v2 = vmov 0.0   ;;  %v1160_v3 = vld [vmem:[%s1813_s5 + $0x8] sm:$0xff]   ;;  %vm1496_vm0 = vmmov 0   ;;  %v1161_v4 = vld [vmem:[%s1813_s5 + $0x10] sm:$0xff]   ;;  %s1956_s14 = sld [smem:[#allocation23_spill]] }
  0xfc   : > { %998 = vmatprep.subr.bf16.mxu0 %v1495_v2  ;;  %1018 = vmatprep.subr.bf16.mxu1 %v1495_v2  ;;  %v1162_v5 = vld [vmem:[%s1813_s5 + $0x18] sm:$0xff]   ;;  %v1163_v6 = vld [vmem:[%s1813_s5 + $0x20] sm:$0xff]   ;;  %v1164_v7 = vld [vmem:[%s1813_s5 + $0x28] sm:$0xff]  }
  0xfd   : > { %999 = vmatpush3.bf16.msra.mxu0 %v1159_v1  ;;  %1014 = vmatprep.mubr.msk.bf16.mxu0 %vm1496_vm0, %v1495_v2  ;;  %v1165_v8 = vld [vmem:[%s1813_s5 + $0x30] sm:$0xff]   ;;  %v1166_v9 = vld [vmem:[%s1813_s5 + $0x38] sm:$0xff]   ;;  %v1168_v11 = vld [vmem:[%s1821_s24] sm:$0xff]  }
  0xfe   : > { %1000 = vmatprep.subr.bf16.mxu0 %v1495_v2  ;;  %1034 = vmatprep.mubr.msk.bf16.mxu1 %vm1496_vm0, %v1495_v2  ;;  %v1167_v10 = vld [vmem:[#allocation3] sm:$0xff]   ;;  %v1169_v12 = vld [vmem:[%s1821_s24 + $0x8] sm:$0xff]   ;;  %v1172_v15 = vld [vmem:[%s1821_s24 + $0x20] sm:$0xff]  }
  0xff   : > { %1019 = vmatpush3.bf16.msra.mxu1 %v1168_v11  ;;  %v1170_v13 = vld [vmem:[%s1821_s24 + $0x10] sm:$0xff]   ;;  %v1171_v14 = vld [vmem:[%s1821_s24 + $0x18] sm:$0xff]   ;;  %v1173_v16 = vld [vmem:[%s1821_s24 + $0x28] sm:$0xff]  }
 0x100   : > { %1020 = vmatprep.subr.bf16.mxu1 %v1495_v2  ;;  %v1174_v17 = vld [vmem:[%s1821_s24 + $0x30] sm:$0xff]   ;;  %v1175_v18 = vld [vmem:[%s1821_s24 + $0x38] sm:$0xff]   ;;  %v940_v19 = vld [vmem:[%s1819_s9] ss:$0 sm:$0xff] }
 0x101   : > { %1001 = vmatpush3.bf16.msra.mxu0 %v1160_v3  ;;  %v580_v45 = vld [vmem:[#allocation2] sm:$0xff]  ;;  %v581_v47 = vld [vmem:[#allocation2 + $0x8] sm:$0xff]  ;;  %p958_p7 = scmp.ne.s32.totalorder %s1956_s14, 1 }
 0x102   : > { %1002 = vmatprep.subr.bf16.mxu0 %v1495_v2  ;;  %v959_v54 = vld [vmem:[#allocation11] ss:$0 sm:$0xff] (!%p958_p7)  ;;  %v972_v55 = vld [vmem:[#allocation3] sm:$0xff] (!%p958_p7)  }
 0x103   : > { %1021 = vmatpush3.bf16.msra.mxu1 %v1169_v12  ;;  %v973_v57 = vunpack.c.l.bf16 (!%p958_p7), %v972_v55  ;;  %v974_v59 = vunpack.c.h.bf16 (!%p958_p7), %v972_v55 }
 0x104   : > { %1022 = vmatprep.subr.bf16.mxu1 %v1495_v2 }
 0x105   : > { %1003 = vmatpush3.bf16.msra.mxu0 %v1161_v4 }
 0x106   : > { %1004 = vmatprep.subr.bf16.mxu0 %v1495_v2 }
 0x107   : > { %1023 = vmatpush3.bf16.msra.mxu1 %v1170_v13 }
 0x108   : > { %1024 = vmatprep.subr.bf16.mxu1 %v1495_v2 }
 0x109   : > { %1005 = vmatpush3.bf16.msra.mxu0 %v1162_v5 }
 0x10a   : > { %1006 = vmatprep.subr.bf16.mxu0 %v1495_v2 }
 0x10b   : > { %1025 = vmatpush3.bf16.msra.mxu1 %v1171_v14 }
 0x10c   : > { %1026 = vmatprep.subr.bf16.mxu1 %v1495_v2 }
 0x10d   : > { %1007 = vmatpush3.bf16.msra.mxu0 %v1163_v6 }
 0x10e   : > { %1008 = vmatprep.subr.bf16.mxu0 %v1495_v2 }
 0x10f   : > { %1027 = vmatpush3.bf16.msra.mxu1 %v1172_v15  ;;  %v960_v15 = vld [vmem:[#allocation12] ss:$0 sm:$0xff] (!%p958_p7) }
 0x110   : > { %1028 = vmatprep.subr.bf16.mxu1 %v1495_v2 }
 0x111   : > { %1009 = vmatpush3.bf16.msra.mxu0 %v1164_v7 }
 0x112   : > { %1010 = vmatprep.subr.bf16.mxu0 %v1495_v2 }
 0x113   : > { %1029 = vmatpush3.bf16.msra.mxu1 %v1173_v16 }
 0x114   : > { %1030 = vmatprep.subr.bf16.mxu1 %v1495_v2 }
 0x115   : > { %1011 = vmatpush3.bf16.msra.mxu0 %v1165_v8 }
 0x116   : > { %1012 = vmatprep.subr.bf16.mxu0 %v1495_v2 }
 0x117   : > { %1031 = vmatpush3.bf16.msra.mxu1 %v1174_v17 }
 0x118   : > { %1032 = vmatprep.subr.bf16.mxu1 %v1495_v2 }
 0x119   : > { %1013 = vmatpush3.bf16.msra.mxu0 %v1166_v9 }
 0x11b   : > { %1033 = vmatpush3.bf16.msra.mxu1 %v1175_v18 }
 0x11c   : > { %1015 = vmatmul.mubr.bf16.vlgmr.msra.gmra.mrb[0].mxu0 %v1167_v10 }
 0x1ef   : > { %v555_v20 = vpop.f32.mrb[0].mxu0 }
 0x1f0   : > { %v556_v21 = vadd.f32 %v940_v19, %v555_v20  ;;  %v1016_v22 = vpop.f32.mrb[1].mxu0 }
 0x1f1   : > { %v558_v23 = vpop.f32.mrb[2].mxu0 }
 0x1f2   : > { %v564_v24 = vmul.f32 0.044715, %v556_v21  ;;  %v559_v25 = vadd.f32 %v940_v19, %v558_v23  ;;  %v1017_v26 = vpop.f32.mrb[3].mxu0  ;;  %v562_v39 = vmul.f32 0.5, %v556_v21  ;;  %v961_v19 = vld [vmem:[#allocation14] ss:$0 sm:$0xff] (!%p958_p7) }
 0x1f4   : > { %v566_v27 = vmul.f32 %v564_v24, %v556_v21  ;;  %v565_v28 = vmul.f32 0.044715, %v559_v25  ;;  %v563_v40 = vmul.f32 0.5, %v559_v25 }
 0x1f6   : > { %v568_v29 = vmul.f32 %v566_v27, %v556_v21  ;;  %v567_v30 = vmul.f32 %v565_v28, %v559_v25 }
 0x1f8   : > { %v569_v31 = vmul.f32 %v567_v30, %v559_v25  ;;  %v570_v32 = vadd.f32 %v568_v29, %v556_v21 }
 0x1fa   : > { %v571_v33 = vadd.f32 %v569_v31, %v559_v25  ;;  %v572_v34 = vmul.f32 0.7978846, %v570_v32 }
 0x1fc   : > { %v573_v35 = vmul.f32 0.7978846, %v571_v33  ;;  %1176 = vtanh.f32 %v572_v34 }
 0x1fe   : > { %1178 = vtanh.f32 %v573_v35 }
 0x206   : > { %v1177_v36 = vpop.eup %1176 }
 0x207   : > { %v576_v37 = vadd.f32 1.0, %v1177_v36 }
 0x208   : > { %v1179_v38 = vpop.eup %1178 }
 0x209   : > { %v577_v41 = vadd.f32 1.0, %v1179_v38  ;;  %v578_v42 = vmul.f32 %v576_v37, %v562_v39 }
 0x20b   : > { %v579_v43 = vmul.f32 %v577_v41, %v563_v40 }
 0x20d   : > { %v582_v44 = vpack.c.bf16 %v579_v43, %v578_v42 }
 0x20f   : > { %1035 = vmatmul.mubr.bf16.vlgmr.msra.gmra.mrb[0].mxu1 %v582_v44 }
 0x2e1   : > { %695 = sbr.rel (%p958_p7) target bundleno = 1071 (0x42f), region = 84 }
 0x2e2   : > { %v681_v46 = vpop.f32.mrb[0].mxu1 }
 0x2e3   : > { %v688_v48 = vadd.f32 %v681_v46, %v580_v45  ;;  %v1036_v49 = vpop.f32.mrb[1].mxu1 }
 0x2e4   : > { %v684_v50 = vpop.f32.mrb[2].mxu1 }
 0x2e5   : > { %690 = vst [vmem:[#allocation2] sm:$0xff] %v688_v48  ;;  %v689_v51 = vadd.f32 %v684_v50, %v581_v47  ;;  %v1037_v52 = vpop.f32.mrb[3].mxu1 }
 0x2e7   : > { %691 = vst [vmem:[#allocation2 + $0x8] sm:$0xff] %v689_v51 }
 0x2ec   : > { %v696_v53 = vld [vmem:[#allocation2] sm:$0xff] }
 0x2ed   : > { %v705_v56 = vadd.f32 %v959_v54, %v696_v53 }
 0x2ee   : > { %v697_v58 = vld [vmem:[#allocation2 + $0x8] sm:$0xff] }
 0x2ef   : > { %v706_v60 = vadd.f32 %v959_v54, %v697_v58  ;;  %v711_v61 = vadd.f32 %v973_v57, %v705_v56 }
 0x2f1   : > { %715 = vadd.xlane.f32.xlu0 %v711_v61  ;;  %v712_v62 = vadd.f32 %v974_v59, %v706_v60 }
 0x2f5   : > { %717 = vadd.xlane.f32.xlu0 %v712_v62 }
 0x37e   : > { %v716_v63 = vpop.xlane.xlu0 %715 }
 0x37f   : > { %v720_v0 = vmul.f32 0.0078125, %v716_v63 }
 0x381   : > { %v722_v1 = vsub.f32 %v711_v61, %v720_v0 }
 0x382   : > { %v718_v2 = vpop.xlane.xlu0 %717 }
 0x383   : > { %v721_v3 = vmul.f32 0.0078125, %v718_v2  ;;  %v724_v4 = vmul.f32 %v722_v1, %v722_v1 }
 0x385   : > { %v723_v5 = vsub.f32 %v712_v62, %v721_v3  ;;  %726 = vadd.xlane.f32.xlu1 %v724_v4 }
 0x387   : > { %v725_v6 = vmul.f32 %v723_v5, %v723_v5 }
 0x389   : > { %728 = vadd.xlane.f32.xlu1 %v725_v6 }
 0x412   : > { %v727_v7 = vpop.xlane.xlu1 %726 }
 0x413   : > { %v730_v8 = vmul.f32 0.0078125, %v727_v7 }
 0x415   : > { %v732_v9 = vadd.f32 1e-12, %v730_v8 }
 0x416   : > { %v729_v10 = vpop.xlane.xlu1 %728 }
 0x417   : > { %1180 = vrsqrt.f32 %v732_v9  ;;  %v731_v11 = vmul.f32 0.0078125, %v729_v10 }
 0x419   : > { %v733_v12 = vadd.f32 1e-12, %v731_v11 }
 0x41b   : > { %1182 = vrsqrt.f32 %v733_v12 }
 0x421   : > { %v1181_v13 = vpop.eup %1180 }
 0x422   : > { %v736_v14 = vmul.f32 %v1181_v13, %v722_v1 }
 0x424   : > { %v744_v17 = vmul.f32 %v960_v15, %v736_v14 }
 0x425   : > { %v1183_v16 = vpop.eup %1182 }
 0x426   : > { %v737_v18 = vmul.f32 %v1183_v16, %v723_v5  ;;  %v752_v21 = vadd.f32 %v961_v19, %v744_v17 }
 0x428   : > { %v745_v20 = vmul.f32 %v960_v15, %v737_v18 }
 0x42a   : > { %v753_v22 = vadd.f32 %v961_v19, %v745_v20 }
 0x42c   : > { %v978_v23 = vpack.c.bf16 %v753_v22, %v752_v21 }
 0x42e   : > { %979 = vst [vmem:[#allocation15] sm:$0xff] %v978_v23  }
 0x42f PF: > { %p1096_p12 = scmp.eq.s32.totalorder %s1569_s30, 1  ;;  %s1497_s22 = smov [#allocation15]  }
 0x430   : > { %s773_s11 = sshll.u32 %s1497_s22, 4  ;;  %s774_s11 = int_to_ptr.vmem [resolvable:$true] %s773_s11 }
 0x431   : > { %s1386_s21 = scalar_lea.vmem %s774_s11, 128  ;;  %p1393_p9 = scmp.lt.s32.totalorder %s774_s11, %s774_s11 }
 0x432   : > { %p1387_p1 = scmp.ne.s32.totalorder %s774_s11, %s1386_s21  ;;  %p1394_p4 = scmp.lt.s32.totalorder %s1386_s21, %s1386_s21 }
 0x434   : > { %p1388_p5 = pnand %p1387_p1, %p1096_p12  ;;  %p1395_p13 = por %p1394_p4, %p1393_p9 }
 0x436   : > { %p1389_p11 = pneg %p1388_p5 }
 0x438   : > { %p1396_p2 = pnand %p1395_p13, %p1389_p11 }
 0x43a   : > { %1399 = shalt.err (!%p1396_p2)
}
 0x43b   : > { %s1957_s19 = sld [smem:[#allocation30_spill]] }
 0x441   : > { %s1400_s17 = scalar_lea.hbm %s1957_s19, 128 }
 0x442   : > { %p1401_p10 = scmp.ne.s32.totalorder %s1957_s19, %s1400_s17  ;;  %p1406_p0 = scmp.lt.u32.totalorder %s1400_s17, %s1957_s19 }
 0x444   : > { %p1402_p6 = pnand %p1401_p10, %p1096_p12 }
 0x446   : > { %p1403_p8 = pneg %p1402_p6 }
 0x448   : > { %p1408_p3 = pnand %p1406_p0, %p1403_p8 }
 0x44a   : > { %1411 = shalt.err (!%p1408_p3)
}
 0x44b   : > { %s1498_s13 = smov 64   ;;  %s1499_s25 = smov 4  }
 0x44c   : > { %1061 = dma.vmem_to_hbm [thread:$0]  (%p1096_p12), %s774_s11, 128, %s1957_s19, [#allocation5], %s1498_s13, %s1498_s13, %s1499_s25  }
 0x44d   : > { %1457 = dma.done.wait (%p1096_p12), [#allocation5], 128  }
 0x44e   : > { %1459 = vsyncadd (%p1096_p12), [#allocation5], 4294967168 }
 0x44f PF: > { %s26_s29 = sadd.s32 1, %s1482_s29   ;;  %s1958_s24 = sld [smem:[#allocation22_spill]] }
 0x450   : > { %p23_p7 = scmp.ge.s32.totalorder %s26_s29, 4   ;;  %s1959_s12 = sld [smem:[#allocation26_spill]] }
 0x451   : > { %s1960_s10 = sld [smem:[#allocation25_spill]]  ;;  %s1961_s25 = smov %s1470_s26 }
 0x452   : > { %s1963_s27 = smov %s1478_s28  ;;  %25 = sbr.rel (!%p23_p7) target bundleno = 14 (0xe), region = 136 }
 0x456   : > { %s1962_s26 = smov %s1959_s12 }
 0x457   : > { %s1964_s28 = smov %s1960_s10 }
 0x459   :  { %789 = vsyncpa [#allocation4], 1 }
 0x45a   :  { %791 = vsyncpa [#allocation4 + $0x1], 1 }
 0x45b   :  { %792 = vsyncpa [#allocation7], 1 }
 0x45c   :  { %794 = vsyncpa [#allocation7 + $0x1], 1 }
 0x45d   :  { %795 = vsyncpa [#allocation10], 1 }
 0x45e   :  { %797 = vsyncpa [#allocation10 + $0x1], 1 }
 0x45f   :  { %798 = vsyncpa [#allocation13], 1 }
 0x460   :  { %799 = vsyncpa [#allocation5], 1 }
 0x461   :  { %801 = vsyncpa [#allocation5 + $0x1], 1 }

// kernel: nbert_pretrain_forward.22
= control target key start
LH: loop header
LB: loop body
LE: loop exit
PB: predicated region body
PF: predicated region fallthrough
CT: control target
= control target key end

     0   :  { %8 = vsyncpa [#allocation3], 0  ;;  %s432_s0 = inlined_call_operand.hbm [shape: bf16[16,128], index: 0, kind: input, shape index: {}]   ;;  %s433_s1 = inlined_call_operand.hbm [shape: bf16[128,128], index: 1, kind: input, shape index: {}]   ;;  %s434_s2 = inlined_call_operand.hbm [shape: f32[1,128], index: 2, kind: input, shape index: {}]   ;;  %s435_s3 = inlined_call_operand.hbm [shape: f32[16,128], index: 3, kind: output, shape index: {}]  }
   0x1   :  { %9 = vsyncpa [#allocation6], 0 }
   0x2   :  { %10 = vsyncpa [#allocation4], 0  ;;  %s347_s12 = smov [#allocation5]   ;;  %s348_s14 = smov [#allocation2]  }
   0x3   :  { %s28_s13 = sshll.u32 %s347_s12, 4  ;;  %s16_s15 = sshll.u32 %s348_s14, 4  ;;  %s29_s13 = int_to_ptr.vmem [resolvable:$true] %s28_s13  ;;  %s377_s15 = int_to_ptr.vmem [resolvable:$true] %s16_s15 }
   0x4   :  { %s253_s18 = scalar_lea.hbm %s433_s1, 1024 }
   0x5   :  { %p254_p0 = scmp.ne.s32.totalorder %s433_s1, %s253_s18  ;;  %p257_p1 = scmp.lt.u32.totalorder %s253_s18, %s433_s1 }
   0x7   :  { %p259_p2 = pnand %p257_p1, %p254_p0 }
   0x9   :  { %262 = shalt.err (!%p259_p2)
}
   0xa   :  { %s263_s23 = scalar_lea.vmem %s29_s13, 1024  ;;  %p268_p4 = scmp.lt.s32.totalorder %s29_s13, %s29_s13 }
   0xb   :  { %p264_p3 = scmp.ne.s32.totalorder %s29_s13, %s263_s23  ;;  %p269_p5 = scmp.lt.s32.totalorder %s263_s23, %s263_s23 }
   0xd   :  { %p270_p6 = por %p269_p5, %p268_p4 }
   0xf   :  { %p271_p7 = pnand %p270_p6, %p264_p3 }
  0x11   :  { %274 = shalt.err (!%p271_p7)
}
  0x12   :  { %s349_s24 = smov 64   ;;  %s350_s25 = smov 4  }
  0x13   :  { %34 = dma.hbm_to_vmem [thread:$0]  %s433_s1, 1024, %s29_s13, [#allocation6], %s349_s24, %s349_s24, %s350_s25  }
  0x14   :  { %s275_s30 = scalar_lea.hbm %s432_s0, 128 }
  0x15   :  { %p276_p8 = scmp.ne.s32.totalorder %s432_s0, %s275_s30  ;;  %p279_p9 = scmp.lt.u32.totalorder %s275_s30, %s432_s0 }
  0x17   :  { %p281_p10 = pnand %p279_p9, %p276_p8 }
  0x19   :  { %284 = shalt.err (!%p281_p10)
}
  0x1a   :  { %s285_s8 = scalar_lea.vmem %s377_s15, 128  ;;  %p290_p12 = scmp.lt.s32.totalorder %s377_s15, %s377_s15 }
  0x1b   :  { %p286_p11 = scmp.ne.s32.totalorder %s377_s15, %s285_s8  ;;  %p291_p13 = scmp.lt.s32.totalorder %s285_s8, %s285_s8 }
  0x1d   :  { %p292_p0 = por %p291_p13, %p290_p12 }
  0x1f   :  { %p293_p1 = pnand %p292_p0, %p286_p11 }
  0x21   :  { %296 = shalt.err (!%p293_p1)
}
  0x22   :  { %22 = dma.hbm_to_vmem [thread:$0]  %s432_s0, 128, %s377_s15, [#allocation3], %s349_s24, %s349_s24, %s350_s25  }
  0x23   :  { %s351_s10 = smov [#allocation7]   ;;  %s297_s14 = scalar_lea.hbm %s434_s2, 16 }
  0x24   :  { %s41_s11 = sshll.u32 %s351_s10, 4  ;;  %p298_p2 = scmp.ne.s32.totalorder %s434_s2, %s297_s14  ;;  %s42_s11 = int_to_ptr.vmem [resolvable:$true] %s41_s11 }
  0x25   :  { %p301_p3 = scmp.lt.u32.totalorder %s297_s14, %s434_s2 }
  0x27   :  { %p303_p4 = pnand %p301_p3, %p298_p2 }
  0x29   :  { %306 = shalt.err (!%p303_p4)
}
  0x2a   :  { %s307_s20 = scalar_lea.vmem %s42_s11, 16  ;;  %s311_s0 = scalar_lea.vmem %s42_s11, 32 }
  0x2b   :  { %p308_p5 = scmp.ne.s32.totalorder %s42_s11, %s307_s20  ;;  %p312_p6 = scmp.lt.s32.totalorder %s42_s11, %s42_s11 }
  0x2c   :  { %p313_p7 = scmp.lt.s32.totalorder %s311_s0, %s307_s20 }
  0x2e   :  { %p314_p8 = por %p313_p7, %p312_p6 }
  0x30   :  { %p315_p9 = pnand %p314_p8, %p308_p5 }
  0x32   :  { %318 = shalt.err (!%p315_p9)
}
  0x33   :  { %44 = dma.hbm_to_vmem [thread:$0]  %s434_s2, 16, %s42_s11, [#allocation6]  }
  0x34   :  { %341 = dma.done.wait [#allocation3], 128  }
  0x35   :  { %342 = vsyncadd [#allocation3], 4294967168 }
  0x36   :  { %343 = dma.done.wait [#allocation6], 1040  }
  0x37   :  { %344 = vsyncadd [#allocation6], 4294966256  ;;  %v352_v0 = vmov 0.0   ;;  %vm353_vm0 = vmmov 0   ;;  %v244_v1 = vld [vmem:[#allocation5] sm:$0xff]   ;;  %v245_v2 = vld [vmem:[#allocation5 + $0x8] sm:$0xff]  }
  0x38   :  { %214 = vmatprep.subr.bf16.mxu0 %v352_v0  ;;  %230 = vmatprep.mubr.msk.bf16.mxu0 %vm353_vm0, %v352_v0  ;;  %v246_v3 = vld [vmem:[#allocation5 + $0x10] sm:$0xff]   ;;  %v247_v4 = vld [vmem:[#allocation5 + $0x18] sm:$0xff]   ;;  %v248_v5 = vld [vmem:[#allocation5 + $0x20] sm:$0xff]   ;;  %s354_s2 = smov [#allocation8]  }
  0x39   :  { %215 = vmatpush3.bf16.xpose.msra.mxu0 %v244_v1  ;;  %v249_v6 = vld [vmem:[#allocation5 + $0x28] sm:$0xff]   ;;  %v250_v7 = vld [vmem:[#allocation5 + $0x30] sm:$0xff]   ;;  %v251_v8 = vld [vmem:[#allocation5 + $0x38] sm:$0xff]   ;;  %s182_s22 = sshll.u32 %s354_s2, 4  ;;  %s183_s22 = int_to_ptr.vmem [resolvable:$true] %s182_s22 }
  0x3a   :  { %216 = vmatprep.subr.bf16.mxu0 %v352_v0  ;;  %v252_v9 = vld [vmem:[#allocation2] sm:$0xff]   ;;  %v195_v10 = vld [vmem:[#allocation7] ss:$0 sm:$0xff]  ;;  %s319_s23 = scalar_lea.vmem %s183_s22, 256  ;;  %p324_p11 = scmp.lt.s32.totalorder %s183_s22, %s183_s22 }
  0x3b   :  { %p320_p10 = scmp.ne.s32.totalorder %s183_s22, %s319_s23  ;;  %p325_p12 = scmp.lt.s32.totalorder %s319_s23, %s319_s23 }
  0x3d   :  { %p326_p13 = por %p325_p12, %p324_p11 }
  0x3f   :  { %p327_p0 = pnand %p326_p13, %p320_p10 }
  0x41   :  { %217 = vmatpush3.bf16.xpose.msra.mxu0 %v245_v2 }
  0x42   :  { %218 = vmatprep.subr.bf16.mxu0 %v352_v0 }
  0x49   :  { %219 = vmatpush3.bf16.xpose.msra.mxu0 %v246_v3 }
  0x4a   :  { %220 = vmatprep.subr.bf16.mxu0 %v352_v0 }
  0x51   :  { %221 = vmatpush3.bf16.xpose.msra.mxu0 %v247_v4 }
  0x52   :  { %222 = vmatprep.subr.bf16.mxu0 %v352_v0 }
  0x59   :  { %223 = vmatpush3.bf16.xpose.msra.mxu0 %v248_v5 }
  0x5a   :  { %224 = vmatprep.subr.bf16.mxu0 %v352_v0 }
  0x61   :  { %225 = vmatpush3.bf16.xpose.msra.mxu0 %v249_v6 }
  0x62   :  { %226 = vmatprep.subr.bf16.mxu0 %v352_v0 }
  0x69   :  { %227 = vmatpush3.bf16.xpose.msra.mxu0 %v250_v7 }
  0x6a   :  { %228 = vmatprep.subr.bf16.mxu0 %v352_v0 }
  0x71   :  { %229 = vmatpush3.bf16.xpose.msra.mxu0 %v251_v8 }
  0x78   :  { %231 = vmatmul.mubr.bf16.vlgmr.msra.gmra.mrb[0].mxu0 %v252_v9 }
 0x14b   :  { %v168_v11 = vpop.f32.mrb[0].mxu0 }
 0x14c   :  { %v169_v12 = vadd.f32 %v195_v10, %v168_v11  ;;  %v232_v13 = vpop.f32.mrb[1].mxu0 }
 0x14d   :  { %v171_v14 = vpop.f32.mrb[2].mxu0 }
 0x14e   :  { %175 = vst [vmem:[#allocation8] sm:$0xff] %v169_v12  ;;  %v172_v15 = vadd.f32 %v195_v10, %v171_v14  ;;  %v233_v16 = vpop.f32.mrb[3].mxu0 }
 0x150   :  { %176 = vst [vmem:[#allocation8 + $0x8] sm:$0xff] %v172_v15 }
 0x151   :  { %330 = shalt.err (!%p327_p0)
}
 0x152   :  { %s331_s26 = scalar_lea.hbm %s435_s3, 256 }
 0x153   :  { %p332_p1 = scmp.ne.s32.totalorder %s435_s3, %s331_s26  ;;  %p335_p2 = scmp.lt.u32.totalorder %s331_s26, %s435_s3 }
 0x155   :  { %p337_p3 = pnand %p335_p2, %p332_p1 }
 0x157   :  { %340 = shalt.err (!%p337_p3)
}
 0x158   :  { %s355_s4 = smov 128   ;;  %s356_s5 = smov 8  }
 0x159   :  { %188 = dma.vmem_to_hbm [thread:$0]  %s183_s22, 256, %s435_s3, [#allocation4], %s355_s4, %s355_s4, %s356_s5  }
 0x15a   :  { %345 = dma.done.wait [#allocation4], 256  }
 0x15b   :  { %346 = vsyncadd [#allocation4], 4294967040 }
 0x15c   :  { %192 = vsyncpa [#allocation3], 1 }
 0x15d   :  { %193 = vsyncpa [#allocation6], 1 }
 0x15e   :  { %194 = vsyncpa [#allocation4], 1 }

// kernel: nbert_pretrain_forward.23
= control target key start
LH: loop header
LB: loop body
LE: loop exit
PB: predicated region body
PF: predicated region fallthrough
CT: control target
= control target key end

     0   :  { %9 = vsyncpa [#allocation3], 0  ;;  %s304_s0 = inlined_call_operand.hbm [shape: f32[2,128], index: 0, kind: input, shape index: {}]   ;;  %s305_s1 = inlined_call_operand.hbm [shape: s32[2,1], index: 1, kind: input, shape index: {}]   ;;  %s306_s2 = inlined_call_operand.hbm [shape: f32[2,1], index: 2, kind: output, shape index: {0}]   ;;  %s307_s3 = inlined_call_operand.hbm [shape: s32[2,1], index: 3, kind: output, shape index: {1}]  }
   0x1   :  { %10 = vsyncpa [#allocation6], 0 }
   0x2   :  { %11 = vsyncpa [#allocation4], 0 }
   0x3   :  { %12 = vsyncpa [#allocation9], 0  ;;  %s224_s12 = smov [#allocation2]   ;;  %s225_s14 = smov [#allocation5]  }
   0x4   :  { %s19_s13 = sshll.u32 %s224_s12, 4  ;;  %s29_s15 = sshll.u32 %s225_s14, 4  ;;  %s20_s13 = int_to_ptr.vmem [resolvable:$true] %s19_s13  ;;  %s30_s15 = int_to_ptr.vmem [resolvable:$true] %s29_s15 }
   0x5   :  { %s128_s18 = scalar_lea.hbm %s304_s0, 32 }
   0x6   :  { %p129_p0 = scmp.ne.s32.totalorder %s304_s0, %s128_s18  ;;  %p132_p1 = scmp.lt.u32.totalorder %s128_s18, %s304_s0 }
   0x8   :  { %p134_p2 = pnand %p132_p1, %p129_p0 }
   0xa   :  { %137 = shalt.err (!%p134_p2)
}
   0xb   :  { %s138_s23 = scalar_lea.vmem %s20_s13, 32  ;;  %p143_p4 = scmp.lt.s32.totalorder %s20_s13, %s20_s13 }
   0xc   :  { %p139_p3 = scmp.ne.s32.totalorder %s20_s13, %s138_s23  ;;  %p144_p5 = scmp.lt.s32.totalorder %s138_s23, %s138_s23 }
   0xe   :  { %p145_p6 = por %p144_p5, %p143_p4 }
  0x10   :  { %p146_p7 = pnand %p145_p6, %p139_p3 }
  0x12   :  { %149 = shalt.err (!%p146_p7)
}
  0x13   :  { %22 = dma.hbm_to_vmem [thread:$0]  %s304_s0, 32, %s20_s13, [#allocation3]  }
  0x14   :  { %s150_s28 = scalar_lea.hbm %s305_s1, 32 }
  0x15   :  { %p151_p8 = scmp.ne.s32.totalorder %s305_s1, %s150_s28  ;;  %p154_p9 = scmp.lt.u32.totalorder %s150_s28, %s305_s1 }
  0x17   :  { %p156_p10 = pnand %p154_p9, %p151_p8 }
  0x19   :  { %159 = shalt.err (!%p156_p10)
}
  0x1a   :  { %s160_s6 = scalar_lea.vmem %s30_s15, 32  ;;  %p165_p12 = scmp.lt.s32.totalorder %s30_s15, %s30_s15 }
  0x1b   :  { %p161_p11 = scmp.ne.s32.totalorder %s30_s15, %s160_s6  ;;  %p166_p13 = scmp.lt.s32.totalorder %s160_s6, %s160_s6 }
  0x1d   :  { %p167_p0 = por %p166_p13, %p165_p12 }
  0x1f   :  { %p168_p1 = pnand %p167_p0, %p161_p11 }
  0x21   :  { %171 = shalt.err (!%p168_p1)
}
  0x22   :  { %32 = dma.hbm_to_vmem [thread:$0]  %s305_s1, 32, %s30_s15, [#allocation6]  }
  0x23   :  { %216 = dma.done.wait [#allocation3], 32  }
  0x24   :  { %217 = vsyncadd [#allocation3], 4294967264 }
  0x25   :  { %218 = dma.done.wait [#allocation6], 32  }
  0x26   :  { %219 = vsyncadd [#allocation6], 4294967264  ;;  %v226_v0 = vmov 0   ;;  %v40_v1 = vld [vmem:[#allocation5] sm:$0x3]  ;;  %vm50_vm0 = vcmask 1041408   ;;  %v41_v4 = vlaneseq }
  0x27   :  { %123 = vset.pattern.permute.xlu0 %v226_v0  ;;  %v39_v2 = vld [vmem:[#allocation2] sm:$0x3]  ;;  %v227_v7 = vmov 0.0   ;;  %s228_s1 = smov [#allocation7]   ;;  %vm67_vm3 = vcmask 1024  }
  0x28   :  { %44 = vperm.xlu0 %123, %v40_v1   ;;  %v54_v3 = vsel %vm50_vm0, %v39_v2, -inf  ;;  %v42_v5 = vand.u32 127, %v41_v4  ;;  %s92_s8 = sshll.u32 %s228_s1, 4  ;;  %s93_s8 = int_to_ptr.vmem [resolvable:$true] %s92_s8 }
  0x29   :  { %s172_s9 = scalar_lea.vmem %s93_s8, 32  ;;  %p177_p3 = scmp.lt.s32.totalorder %s93_s8, %s93_s8 }
  0x2a   :  { %p173_p2 = scmp.ne.s32.totalorder %s93_s8, %s172_s9  ;;  %p178_p4 = scmp.lt.s32.totalorder %s172_s9, %s172_s9 }
  0x2c   :  { %p179_p5 = por %p178_p4, %p177_p3 }
  0x2e   :  { %p180_p6 = pnand %p179_p5, %p173_p2 }
  0x47   :  { %55 = vmax.xlane.f32.xlu0 %v54_v3 }
  0xa7   :  { %v45_v6 = vpop.permute.xlu0 %44 }
  0xa8   :  { %vm46_vm1 = vcmp.eq.s32.totalorder %v42_v5, %v45_v6 }
  0xa9   :  { %v116_v8 = vsel %vm46_vm1, 1.0, %v227_v7 }
  0xaa   :  { %v49_v9 = vmul.f32 %v116_v8, %v39_v2 }
  0xac   :  { %v51_v10 = vsel %vm50_vm0, %v49_v9, 0.0 }
  0xad   :  { %52 = vadd.xlane.f32.xlu1 %v51_v10 }
  0xd4   :  { %v56_v11 = vpop.xlane.xlu0 %55 }
  0xd5   :  { %v57_v12 = vsub.f32 %v39_v2, %v56_v11 }
  0xd7   :  { %v58_v13 = vmul.f32 1.442695, %v57_v12 }
  0xd9   :  { %124 = vpow2.f32 %v58_v13 }
  0xe3   :  { %v125_v14 = vpop.eup %124 }
  0xe4   :  { %v60_v15 = vsel %vm50_vm0, %v125_v14, 0.0 }
  0xe5   :  { %61 = vadd.xlane.f32.xlu1 %v60_v15 }
 0x13a   :  { %v53_v16 = vpop.xlane.xlu1 %52 }
 0x13b   :  { %vm69_vm2 = vcmp.gt.f32.partialorder %v39_v2, %v53_v16 }
 0x13c   :  { %v70_v17 = vsel %vm69_vm2, 1, %v226_v0 }
 0x13d   :  { %v71_v18 = vsel %vm50_vm0, %v70_v17, 0 }
 0x13e   :  { %v73_v19 = vshrl.u32 %v71_v18, 16  ;;  %v72_v21 = vand.u32 65535, %v71_v18 }
 0x140   :  { %v75_v20 = vcvt.s32.f32 %v73_v19  ;;  %v74_v22 = vcvt.s32.f32 %v72_v21 }
 0x142   :  { %78 = vadd.xlane.f32.xlu1 %v75_v20 }
 0x146   :  { %76 = vadd.xlane.f32.xlu1 %v74_v22 }
 0x172   :  { %v62_v23 = vpop.xlane.xlu1 %61 }
 0x173   :  { %126 = vlog2.f32 %v62_v23 }
 0x17d   :  { %v127_v24 = vpop.eup %126 }
 0x17e   :  { %v64_v25 = vmul.f32 0.6931472, %v127_v24 }
 0x180   :  { %v65_v26 = vadd.f32 %v64_v25, %v56_v11 }
 0x182   :  { %v66_v27 = vsub.f32 %v65_v26, %v53_v16 }
 0x184   :  { %68 = vst.msk [vmem:[#allocation7] sm:$0x3] %vm67_vm3, %v66_v27 }
 0x185   :  { %183 = shalt.err (!%p180_p6)
}
 0x186   :  { %s184_s12 = scalar_lea.hbm %s306_s2, 32 }
 0x187   :  { %p185_p7 = scmp.ne.s32.totalorder %s306_s2, %s184_s12  ;;  %p188_p8 = scmp.lt.u32.totalorder %s184_s12, %s306_s2 }
 0x189   :  { %p190_p9 = pnand %p188_p8, %p185_p7 }
 0x18b   :  { %193 = shalt.err (!%p190_p9)
}
 0x18c   :  { %95 = dma.vmem_to_hbm [thread:$0]  %s93_s8, 32, %s306_s2, [#allocation4]  }
 0x18d   :  { %s229_s19 = smov [#allocation8]  }
 0x18e   :  { %s102_s20 = sshll.u32 %s229_s19, 4  ;;  %s103_s20 = int_to_ptr.vmem [resolvable:$true] %s102_s20 }
 0x18f   :  { %s194_s21 = scalar_lea.vmem %s103_s20, 32  ;;  %p199_p11 = scmp.lt.s32.totalorder %s103_s20, %s103_s20 }
 0x190   :  { %p195_p10 = scmp.ne.s32.totalorder %s103_s20, %s194_s21  ;;  %p200_p12 = scmp.lt.s32.totalorder %s194_s21, %s194_s21 }
 0x192   :  { %p201_p13 = por %p200_p12, %p199_p11 }
 0x194   :  { %p202_p0 = pnand %p201_p13, %p195_p10 }
 0x1cf   :  { %v79_v28 = vpop.xlane.xlu1 %78 }
 0x1d0   :  { %v81_v29 = vcvt.f32.s32 %v79_v28 }
 0x1d2   :  { %v82_v31 = vshll.u32 %v81_v29, 16 }
 0x1d3   :  { %v77_v30 = vpop.xlane.xlu1 %76 }
 0x1d4   :  { %v80_v32 = vcvt.f32.s32 %v77_v30 }
 0x1d6   :  { %v83_v33 = vadd.s32 %v82_v31, %v80_v32 }
 0x1d8   :  { %v84_v34 = vadd.s32 1, %v83_v33 }
 0x1da   :  { %85 = vst.msk [vmem:[#allocation8] sm:$0x3] %vm67_vm3, %v84_v34 }
 0x1db   :  { %205 = shalt.err (!%p202_p0)
}
 0x1dc   :  { %s206_s23 = scalar_lea.hbm %s307_s3, 32 }
 0x1dd   :  { %p207_p1 = scmp.ne.s32.totalorder %s307_s3, %s206_s23  ;;  %p210_p2 = scmp.lt.u32.totalorder %s206_s23, %s307_s3 }
 0x1df   :  { %p212_p3 = pnand %p210_p2, %p207_p1 }
 0x1e1   :  { %215 = shalt.err (!%p212_p3)
}
 0x1e2   :  { %105 = dma.vmem_to_hbm [thread:$0]  %s103_s20, 32, %s307_s3, [#allocation9]  }
 0x1e3   :  { %220 = dma.done.wait [#allocation4], 32  }
 0x1e4   :  { %221 = vsyncadd [#allocation4], 4294967264 }
 0x1e5   :  { %222 = dma.done.wait [#allocation9], 32  }
 0x1e6   :  { %223 = vsyncadd [#allocation9], 4294967264 }
 0x1e7   :  { %112 = vsyncpa [#allocation3], 1 }
 0x1e8   :  { %113 = vsyncpa [#allocation6], 1 }
 0x1e9   :  { %114 = vsyncpa [#allocation4], 1 }
 0x1ea   :  { %115 = vsyncpa [#allocation9], 1 }

</bundles_post_ra>
